<compile_context>
chip_gen: v7x
topology: tpu7x:2x2x1
jax: 0.10.0
libtpu: 0.0.40
codegen_flags: <defaults>
</compile_context>

<pallas_src>
import functools

import jax
import jax.numpy as jnp
from jax.experimental import pallas as pl
from jax.experimental.pallas import tpu as pltpu


# ---------------------------------------------------------------------------
# Kernel A: fused conv1(1x1) -> conv2(3x3, stride 1, pad 1) -> conv3(1x1),
# each with folded BN + ReLU.  One grid step per batch element.
# ---------------------------------------------------------------------------
def _bottleneck_kernel(x_ref, mask_ref, w1_ref, s1_ref, sh1_ref,
                       w2_ref, s2_ref, sh2_ref, w3_ref, s3_ref, sh3_ref,
                       o_ref, *, Wp, Ho):
    x = x_ref[0]                                     # (Lp_pad, Cin)  bf16
    # conv1 (1x1) + BN + ReLU on the zero-padded flat grid, then zero the
    # padding ring so conv2 sees a zero-padded conv1 *output* (as PyTorch does).
    h1 = jnp.dot(x, w1_ref[...], preferred_element_type=jnp.float32)
    h1 = jnp.maximum(h1 * s1_ref[...] + sh1_ref[...], 0.0) * mask_ref[...]

    # conv2 (3x3, stride 1) as 9 shifted matmuls over the padded flat grid.
    Lw = Ho * Wp                                     # "wide" output rows
    ch = w2_ref.shape[2]
    acc = jnp.zeros((Lw, ch), jnp.float32)
    t = 0
    for dy in range(3):
        for dx in range(3):
            off = dy * Wp + dx
            tap = h1[off:off + Lw, :].astype(jnp.bfloat16)
            acc = acc + jnp.dot(tap, w2_ref[t],
                                preferred_element_type=jnp.float32)
            t += 1
    h2 = jnp.maximum(acc * s2_ref[...] + sh2_ref[...], 0.0).astype(jnp.bfloat16)

    # conv3 (1x1) + BN + ReLU
    h3 = jnp.dot(h2, w3_ref[...], preferred_element_type=jnp.float32)
    h3 = jnp.maximum(h3 * s3_ref[...] + sh3_ref[...], 0.0)
    o_ref[0] = h3.astype(o_ref.dtype)


def fused_bottleneck(xp_flat, mask, w1, s1, sh1, w2, s2, sh2, w3, s3, sh3,
                     *, Wp, Ho):
    N, Lp_pad, Cin = xp_flat.shape
    ch = w1.shape[1]
    C = w3.shape[1]
    Lw = Ho * Wp
    kern = functools.partial(_bottleneck_kernel, Wp=Wp, Ho=Ho)
    full = lambda shape: pl.BlockSpec(shape, lambda n: (0,) * len(shape))
    return pl.pallas_call(
        kern,
        out_shape=jax.ShapeDtypeStruct((N, Lw, C), jnp.bfloat16),
        grid_spec=pltpu.PrefetchScalarGridSpec(
            num_scalar_prefetch=0,
            grid=(N,),
            in_specs=[
                pl.BlockSpec((1, Lp_pad, Cin), lambda n: (n, 0, 0)),
                full((Lp_pad, 1)),
                full((Cin, ch)), full((1, ch)), full((1, ch)),
                full((9, ch, ch)), full((1, ch)), full((1, ch)),
                full((ch, C)), full((1, C)), full((1, C)),
            ],
            out_specs=pl.BlockSpec((1, Lw, C), lambda n: (n, 0, 0)),
        ),
        compiler_params=pltpu.CompilerParams(dimension_semantics=("parallel",)),
    )(xp_flat, mask, w1, s1, sh1, w2, s2, sh2, w3, s3, sh3)


# ---------------------------------------------------------------------------
# Kernel B: fused excite branch (depthwise 3x3 stride-2 + BN -> MLP 1x1 convs)
# + nearest-neighbour upsample + sigmoid gate + residual add.
# ---------------------------------------------------------------------------
def _excite_gate_kernel(p00_ref, p01_ref, p10_ref, p11_ref, out_ref, id_ref,
                        sup_ref, wdw_ref, sdw_ref, shdw_ref, wm1_ref, wm2_ref,
                        o_ref, *, Wq, H2):
    C = wdw_ref.shape[2]
    Lw = H2 * Wq                                     # "wide" low-res rows
    planes = (p00_ref[0].astype(jnp.float32), p01_ref[0].astype(jnp.float32),
              p10_ref[0].astype(jnp.float32), p11_ref[0].astype(jnp.float32))
    # depthwise 3x3 / stride 2 / pad 1 via the 4 parity planes of the padded
    # feature map: every tap becomes a contiguous slice (no strided loads).
    acc = jnp.zeros((Lw, C), jnp.float32)
    t = 0
    for ky in range(3):
        for kx in range(3):
            plane = planes[(ky % 2) * 2 + (kx % 2)]
            start = (ky // 2) * Wq + (kx // 2)
            acc = acc + plane[start:start + Lw, :] * wdw_ref[t]
            t += 1
    mp = acc * sdw_ref[...] + shdw_ref[...]          # Downblock BN, no ReLU

    # mlp: 1x1 (C -> C/16) + ReLU, 1x1 (C/16 -> C); intermediate stays in vregs.
    hmid = jnp.maximum(
        jnp.dot(mp.astype(jnp.bfloat16), wm1_ref[...],
                preferred_element_type=jnp.float32), 0.0)
    m = jnp.dot(hmid.astype(jnp.bfloat16), wm2_ref[...],
                preferred_element_type=jnp.float32)

    # F.interpolate(..., nearest) as a constant 0/1 selection matmul.
    m_up = jnp.dot(sup_ref[...], m.astype(jnp.bfloat16),
                   preferred_element_type=jnp.float32)

    # identity + out * sigmoid(map)
    gate = jax.nn.sigmoid(m_up)
    o_ref[0] = (id_ref[0] + out_ref[0].astype(jnp.float32) * gate
                ).astype(o_ref.dtype)


def fused_excite_gate(p00, p01, p10, p11, out3_rows, ident, s_up,
                      w_dw, sdw, shdw, w_m1, w_m2, *, Wq, H2):
    N, Lq_pad, C = p00.shape
    L = out3_rows.shape[1]
    hid = w_m1.shape[1]
    Lw = H2 * Wq
    kern = functools.partial(_excite_gate_kernel, Wq=Wq, H2=H2)
    plane_spec = pl.BlockSpec((1, Lq_pad, C), lambda n: (n, 0, 0))
    row_spec = pl.BlockSpec((1, L, C), lambda n: (n, 0, 0))
    full = lambda shape: pl.BlockSpec(shape, lambda n: (0,) * len(shape))
    return pl.pallas_call(
        kern,
        out_shape=jax.ShapeDtypeStruct((N, L, C), jnp.float32),
        grid_spec=pltpu.PrefetchScalarGridSpec(
            num_scalar_prefetch=0,
            grid=(N,),
            in_specs=[plane_spec, plane_spec, plane_spec, plane_spec,
                      row_spec, row_spec,
                      full((L, Lw)),
                      full((9, 1, C)), full((1, C)), full((1, C)),
                      full((C, hid)), full((hid, C))],
            out_specs=row_spec,
        ),
        compiler_params=pltpu.CompilerParams(dimension_semantics=("parallel",)),
    )(p00, p01, p10, p11, out3_rows, ident, s_up, w_dw, sdw, shdw, w_m1, w_m2)


# ---------------------------------------------------------------------------
# Generic row-tiled matmul + folded BN + activation (only used on the fallback
# paths: convShortcut and stride>1).  Bigger tiles + M padding per the review.
# ---------------------------------------------------------------------------
def _mm_bn_act_kernel(x_ref, w_ref, scale_ref, shift_ref, o_ref, *, act):
    acc = jnp.dot(x_ref[...], w_ref[...], preferred_element_type=jnp.float32)
    y = acc * scale_ref[...] + shift_ref[...]
    if act == "relu":
        y = jnp.maximum(y, 0.0)
    o_ref[...] = y.astype(o_ref.dtype)


def mm_bn_act(x, w, scale, shift, act="none", out_dtype=None):
    M, K = x.shape
    Nout = w.shape[1]
    out_dtype = out_dtype or x.dtype
    tm = min(512, M) if M % 8 == 0 else M
    Mp = ((M + tm - 1) // tm) * tm
    xp = jnp.pad(x, ((0, Mp - M), (0, 0))) if Mp != M else x
    out = pl.pallas_call(
        functools.partial(_mm_bn_act_kernel, act=act),
        out_shape=jax.ShapeDtypeStruct((Mp, Nout), out_dtype),
        grid_spec=pltpu.PrefetchScalarGridSpec(
            num_scalar_prefetch=0,
            grid=(Mp // tm,),
            in_specs=[
                pl.BlockSpec((tm, K), lambda i: (i, 0)),
                pl.BlockSpec((K, Nout), lambda i: (0, 0)),
                pl.BlockSpec((1, Nout), lambda i: (0, 0)),
                pl.BlockSpec((1, Nout), lambda i: (0, 0)),
            ],
            out_specs=pl.BlockSpec((tm, Nout), lambda i: (i, 0)),
        ),
        compiler_params=pltpu.CompilerParams(dimension_semantics=("parallel",)),
    )(xp, w, scale, shift)
    return out if Mp == M else out[:M]


# ---------------- JAX glue (layout / BN folding / params) ----------------

def _im2col(x, k, stride, pad):
    """(N, H, W, C) NHWC -> (N*Ho*Wo, k*k*C) patches (tap-major, then Cin)."""
    N, H, W, C = x.shape
    xp = jnp.pad(x, ((0, 0), (pad, pad), (pad, pad), (0, 0)))
    Ho = (H + 2 * pad - k) // stride + 1
    Wo = (W + 2 * pad - k) // stride + 1
    cols = [xp[:, dy:dy + stride * Ho:stride, dx:dx + stride * Wo:stride, :]
            for dy in range(k) for dx in range(k)]
    patches = jnp.stack(cols, axis=3)                # (N, Ho, Wo, k*k, C)
    return patches.reshape(N * Ho * Wo, k * k * C), Ho, Wo


def _fold_bn(gamma, beta, mean, var, bias=None, eps=1e-5):
    s = gamma / jnp.sqrt(var + eps)
    sh = beta - mean * s
    if bias is not None:
        sh = sh + bias * s
    return s[None, :], sh[None, :]


def init_ge_params(key, in_planes, out_planes):
    channel = out_planes // 4      # bottleneck width (expansion = 4)
    hidden = out_planes // 16      # mlp hidden width
    keys = jax.random.split(key, 16)

    def w(k, shape, scale=0.1):
        return (scale * jax.random.normal(k, shape)).astype(jnp.float32)

    def bn(k, c):
        kg, kb = jax.random.split(k)
        return dict(
            gamma=(1.0 + 0.1 * jax.random.normal(kg, (c,))).astype(jnp.float32),
            beta=(0.05 * jax.random.normal(kb, (c,))).astype(jnp.float32),
            mean=jnp.zeros((c,), jnp.float32),
            var=jnp.ones((c,), jnp.float32),
        )

    p = {}
    p["w1"], p["b1"], p["bn1"] = w(keys[0], (in_planes, channel)), w(keys[1], (channel,), 0.05), bn(keys[2], channel)
    p["w2"], p["b2"], p["bn2"] = w(keys[3], (9, channel, channel)), w(keys[4], (channel,), 0.05), bn(keys[5], channel)
    p["w3"], p["b3"], p["bn3"] = w(keys[6], (channel, out_planes)), w(keys[7], (out_planes,), 0.05), bn(keys[8], out_planes)
    p["w_dw"], p["bn_dw"] = w(keys[9], (9, 1, out_planes)), bn(keys[10], out_planes)  # depthwise, no bias
    p["w_m1"] = w(keys[11], (out_planes, hidden))   # mlp conv1, no bias
    p["w_m2"] = w(keys[12], (hidden, out_planes))   # mlp conv2, no bias
    if in_planes != out_planes:
        p["w_sc"] = w(keys[13], (in_planes, out_planes))  # convShortcut, no bias
    return p


def ge_block_forward(x_nchw, params, stride=1):
    """GEBlock forward (extent=2, extra_params=True, mlp=True, dropRate=0.0)."""
    x = jnp.transpose(x_nchw, (0, 2, 3, 1)).astype(jnp.float32)   # NCHW -> NHWC
    N, H, W, Cin = x.shape
    ch = params["w1"].shape[1]
    C = params["w3"].shape[1]

    s1, sh1 = _fold_bn(**params["bn1"], bias=params["b1"])
    s2, sh2 = _fold_bn(**params["bn2"], bias=params["b2"])
    s3, sh3 = _fold_bn(**params["bn3"], bias=params["b3"])

    if stride == 1:
        # Fused conv1 -> conv2 -> conv3 (kernel A), per batch element.
        Ho, Wo = H, W
        Hp, Wp = H + 2, W + 2
        Lp = Hp * Wp
        Lp_pad = ((Lp + 2 + 7) // 8) * 8             # room for the largest tap shift
        xp = jnp.pad(x, ((0, 0), (1, 1), (1, 1), (0, 0))).reshape(N, Lp, Cin)
        xp = jnp.pad(xp, ((0, 0), (0, Lp_pad - Lp), (0, 0))).astype(jnp.bfloat16)
        yy = jnp.arange(Hp)[:, None]
        xx = jnp.arange(Wp)[None, :]
        mask = ((yy >= 1) & (yy <= H) & (xx >= 1) & (xx <= W)).astype(jnp.float32)
        mask = jnp.pad(mask.reshape(Lp, 1), ((0, Lp_pad - Lp), (0, 0)))
        out_wide = fused_bottleneck(
            xp, mask,
            params["w1"].astype(jnp.bfloat16), s1, sh1,
            params["w2"].astype(jnp.bfloat16), s2, sh2,
            params["w3"].astype(jnp.bfloat16), s3, sh3,
            Wp=Wp, Ho=Ho)
        out3 = out_wide.reshape(N, Ho, Wp, C)[:, :, :Wo, :]   # drop wide-grid junk cols
    else:
        # TODO(synk): stride > 1 falls back to im2col + generic matmuls (correct,
        # but keeps the patch materialization the fused stride-1 path avoids).
        h1 = mm_bn_act(x.reshape(N * H * W, Cin).astype(jnp.bfloat16),
                       params["w1"].astype(jnp.bfloat16), s1, sh1, "relu")
        patches, Ho, Wo = _im2col(h1.reshape(N, H, W, ch), 3, stride, 1)
        h2 = mm_bn_act(patches, params["w2"].reshape(9 * ch, ch).astype(jnp.bfloat16),
                       s2, sh2, "relu")
        out3 = mm_bn_act(h2, params["w3"].astype(jnp.bfloat16), s3, sh3, "relu",
                         out_dtype=jnp.bfloat16).reshape(N, Ho, Wo, C)

    # ---- excite branch + gate + residual (kernel B) ----
    assert Ho % 2 == 0 and Wo % 2 == 0, "stride-2 downop path expects even maps"
    H2, W2 = Ho // 2, Wo // 2
    Hq, Wq = H2 + 1, W2 + 1
    Lq = Hq * Wq
    Lq_pad = ((Lq + 1 + 7) // 8) * 8
    out3_pad = jnp.pad(out3, ((0, 0), (1, 1), (1, 1), (0, 0)))
    planes = [out3_pad[:, py::2, px::2, :].reshape(N, Lq, C)
              for py in (0, 1) for px in (0, 1)]
    planes = [jnp.pad(p, ((0, 0), (0, Lq_pad - Lq), (0, 0))) for p in planes]

    # nearest-neighbour upsample (F.interpolate) as a constant selection matrix
    Lw = H2 * Wq
    rows = jnp.arange(Ho * Wo)
    hi = ((rows // Wo) * H2) // Ho
    wi = ((rows % Wo) * W2) // Wo
    s_up = ((hi * Wq + wi)[:, None] == jnp.arange(Lw)[None, :]).astype(jnp.bfloat16)

    sdw, shdw = _fold_bn(**params["bn_dw"])
    out3_rows = out3.reshape(N, Ho * Wo, C)

    if "w_sc" in params:                              # convShortcut (1x1, stride)
        xs = x[:, ::stride, ::stride, :].reshape(N * Ho * Wo, Cin)
        ident = mm_bn_act(xs.astype(jnp.bfloat16), params["w_sc"].astype(jnp.bfloat16),
                          jnp.ones((1, C), jnp.float32), jnp.zeros((1, C), jnp.float32),
                          "none", out_dtype=jnp.float32).reshape(N, Ho * Wo, C)
    else:                                             # equalInOut identity
        assert stride == 1, "equalInOut identity requires stride == 1"
        ident = x.reshape(N, Ho * Wo, C)

    res = fused_excite_gate(planes[0], planes[1], planes[2], planes[3],
                            out3_rows, ident, s_up,
                            params["w_dw"], sdw, shdw,
                            params["w_m1"].astype(jnp.bfloat16),
                            params["w_m2"].astype(jnp.bfloat16),
                            Wq=Wq, H2=H2)
    res = res.reshape(N, Ho, Wo, C)
    return jnp.transpose(res, (0, 3, 1, 2))           # NHWC -> NCHW


if __name__ == "__main__":
    key = jax.random.PRNGKey(0)
    kx, kp = jax.random.split(key)
    # GEBlock(in_planes=32, out_planes=32, stride=1, spatial=16, extent=2,
    #         extra_params=True, mlp=True) -> equalInOut, channel=8, mlp hidden=2
    N, in_planes, out_planes, spatial, stride = 2, 32, 32, 16, 1
    x = jax.random.normal(kx, (N, in_planes, spatial, spatial), dtype=jnp.float32)
    params = init_ge_params(kp, in_planes, out_planes)

    fwd = jax.jit(functools.partial(ge_block_forward, stride=stride))
    y = jax.block_until_ready(fwd(x, params))
    assert y.shape == (N, out_planes, spatial, spatial), y.shape
    assert bool(jnp.all(jnp.isfinite(y)))
    print("KERNEL_OK")
</pallas_src>

<mosaic_0001>
module attributes {stable_mosaic.version = 11 : i64} {
  func.func @_bottleneck_kernel(%arg0: i32, %arg1: memref<1x328x32xbf16, #tpu.memory_space<vmem>>, %arg2: memref<328x1xf32, #tpu.memory_space<vmem>>, %arg3: memref<32x8xbf16, #tpu.memory_space<vmem>>, %arg4: memref<1x8xf32, #tpu.memory_space<vmem>>, %arg5: memref<1x8xf32, #tpu.memory_space<vmem>>, %arg6: memref<9x8x8xbf16, #tpu.memory_space<vmem>>, %arg7: memref<1x8xf32, #tpu.memory_space<vmem>>, %arg8: memref<1x8xf32, #tpu.memory_space<vmem>>, %arg9: memref<8x32xbf16, #tpu.memory_space<vmem>>, %arg10: memref<1x32xf32, #tpu.memory_space<vmem>>, %arg11: memref<1x32xf32, #tpu.memory_space<vmem>>, %arg12: memref<1x288x32xbf16, #tpu.memory_space<vmem>>) attributes {dimension_semantics = [#tpu.dimension_semantics<parallel>], iteration_bounds = array<i64: 2>, scalar_prefetch = 0 : i64, scratch_operands = 0 : i64, tpu.core_type = #tpu.core_type<tc>, window_params = [{transform_indices = @transform_0, window_bounds = array<i64: 1, 328, 32>}, {pipeline_mode = #tpu.pipeline_mode<synchronous>, transform_indices = @transform_1, window_bounds = array<i64: 328, 1>}, {pipeline_mode = #tpu.pipeline_mode<synchronous>, transform_indices = @transform_2, window_bounds = array<i64: 32, 8>}, {pipeline_mode = #tpu.pipeline_mode<synchronous>, transform_indices = @transform_3, window_bounds = array<i64: 1, 8>}, {pipeline_mode = #tpu.pipeline_mode<synchronous>, transform_indices = @transform_4, window_bounds = array<i64: 1, 8>}, {pipeline_mode = #tpu.pipeline_mode<synchronous>, transform_indices = @transform_5, window_bounds = array<i64: 9, 8, 8>}, {pipeline_mode = #tpu.pipeline_mode<synchronous>, transform_indices = @transform_6, window_bounds = array<i64: 1, 8>}, {pipeline_mode = #tpu.pipeline_mode<synchronous>, transform_indices = @transform_7, window_bounds = array<i64: 1, 8>}, {pipeline_mode = #tpu.pipeline_mode<synchronous>, transform_indices = @transform_8, window_bounds = array<i64: 8, 32>}, {pipeline_mode = #tpu.pipeline_mode<synchronous>, transform_indices = @transform_9, window_bounds = array<i64: 1, 32>}, {pipeline_mode = #tpu.pipeline_mode<synchronous>, transform_indices = @transform_10, window_bounds = array<i64: 1, 32>}, {transform_indices = @transform_11, window_bounds = array<i64: 1, 288, 32>}]} {
    %c0 = arith.constant 0 : index
    %c0_0 = arith.constant 0 : index
    %c0_1 = arith.constant 0 : index
    %0 = vector.load %arg1[%c0, %c0_0, %c0_1] : memref<1x328x32xbf16, #tpu.memory_space<vmem>>, vector<1x328x32xbf16>
    %1 = vector.shape_cast %0 : vector<1x328x32xbf16> to vector<328x32xbf16>
    %c0_2 = arith.constant 0 : index
    %c0_3 = arith.constant 0 : index
    %2 = vector.load %arg3[%c0_2, %c0_3] : memref<32x8xbf16, #tpu.memory_space<vmem>>, vector<32x8xbf16>
    %cst = arith.constant dense<0.000000e+00> : vector<328x8xf32>
    %3 = tpu.matmul %1, %2, %cst {dimension_numbers = #tpu.dot_dimension_numbers<[1], [0], [0], [1], [0, 0, 1, 1], [], []>} : vector<328x32xbf16>, vector<32x8xbf16>, vector<328x8xf32> -> vector<328x8xf32>
    %c0_4 = arith.constant 0 : index
    %c0_5 = arith.constant 0 : index
    %4 = vector.load %arg4[%c0_4, %c0_5] : memref<1x8xf32, #tpu.memory_space<vmem>>, vector<1x8xf32>
    %5 = vector.broadcast %4 : vector<1x8xf32> to vector<328x8xf32>
    %6 = arith.mulf %3, %5 : vector<328x8xf32>
    %c0_6 = arith.constant 0 : index
    %c0_7 = arith.constant 0 : index
    %7 = vector.load %arg5[%c0_6, %c0_7] : memref<1x8xf32, #tpu.memory_space<vmem>>, vector<1x8xf32>
    %8 = vector.broadcast %7 : vector<1x8xf32> to vector<328x8xf32>
    %9 = arith.addf %6, %8 : vector<328x8xf32>
    %cst_8 = arith.constant 0.000000e+00 : f32
    %10 = vector.broadcast %cst_8 : f32 to vector<328x8xf32>
    %11 = arith.maximumf %9, %10 : vector<328x8xf32>
    %c0_9 = arith.constant 0 : index
    %c0_10 = arith.constant 0 : index
    %12 = vector.load %arg2[%c0_9, %c0_10] : memref<328x1xf32, #tpu.memory_space<vmem>>, vector<328x1xf32>
    %13 = vector.broadcast %12 : vector<328x1xf32> to vector<328x8xf32>
    %14 = arith.mulf %11, %13 : vector<328x8xf32>
    %cst_11 = arith.constant 0.000000e+00 : f32
    %15 = vector.broadcast %cst_11 : f32 to vector<288x8xf32>
    %16 = vector.extract_strided_slice %14 {offsets = [0, 0], sizes = [288, 8], strides = [1, 1]} : vector<328x8xf32> to vector<288x8xf32>
    %17 = arith.truncf %16 : vector<288x8xf32> to vector<288x8xbf16>
    %c0_12 = arith.constant 0 : index
    %c0_13 = arith.constant 0 : index
    %c0_14 = arith.constant 0 : index
    %18 = vector.load %arg6[%c0_12, %c0_13, %c0_14] : memref<9x8x8xbf16, #tpu.memory_space<vmem>>, vector<1x8x8xbf16>
    %19 = vector.shape_cast %18 : vector<1x8x8xbf16> to vector<8x8xbf16>
    %cst_15 = arith.constant dense<0.000000e+00> : vector<288x8xf32>
    %20 = tpu.matmul %17, %19, %cst_15 {dimension_numbers = #tpu.dot_dimension_numbers<[1], [0], [0], [1], [0, 0, 1, 1], [], []>} : vector<288x8xbf16>, vector<8x8xbf16>, vector<288x8xf32> -> vector<288x8xf32>
    %21 = arith.addf %15, %20 : vector<288x8xf32>
    %22 = vector.extract_strided_slice %14 {offsets = [1, 0], sizes = [288, 8], strides = [1, 1]} : vector<328x8xf32> to vector<288x8xf32>
    %23 = arith.truncf %22 : vector<288x8xf32> to vector<288x8xbf16>
    %c1 = arith.constant 1 : index
    %c0_16 = arith.constant 0 : index
    %c0_17 = arith.constant 0 : index
    %24 = vector.load %arg6[%c1, %c0_16, %c0_17] : memref<9x8x8xbf16, #tpu.memory_space<vmem>>, vector<1x8x8xbf16>
    %25 = vector.shape_cast %24 : vector<1x8x8xbf16> to vector<8x8xbf16>
    %cst_18 = arith.constant dense<0.000000e+00> : vector<288x8xf32>
    %26 = tpu.matmul %23, %25, %cst_18 {dimension_numbers = #tpu.dot_dimension_numbers<[1], [0], [0], [1], [0, 0, 1, 1], [], []>} : vector<288x8xbf16>, vector<8x8xbf16>, vector<288x8xf32> -> vector<288x8xf32>
    %27 = arith.addf %21, %26 : vector<288x8xf32>
    %28 = vector.extract_strided_slice %14 {offsets = [2, 0], sizes = [288, 8], strides = [1, 1]} : vector<328x8xf32> to vector<288x8xf32>
    %29 = arith.truncf %28 : vector<288x8xf32> to vector<288x8xbf16>
    %c2 = arith.constant 2 : index
    %c0_19 = arith.constant 0 : index
    %c0_20 = arith.constant 0 : index
    %30 = vector.load %arg6[%c2, %c0_19, %c0_20] : memref<9x8x8xbf16, #tpu.memory_space<vmem>>, vector<1x8x8xbf16>
    %31 = vector.shape_cast %30 : vector<1x8x8xbf16> to vector<8x8xbf16>
    %cst_21 = arith.constant dense<0.000000e+00> : vector<288x8xf32>
    %32 = tpu.matmul %29, %31, %cst_21 {dimension_numbers = #tpu.dot_dimension_numbers<[1], [0], [0], [1], [0, 0, 1, 1], [], []>} : vector<288x8xbf16>, vector<8x8xbf16>, vector<288x8xf32> -> vector<288x8xf32>
    %33 = arith.addf %27, %32 : vector<288x8xf32>
    %34 = vector.extract_strided_slice %14 {offsets = [18, 0], sizes = [288, 8], strides = [1, 1]} : vector<328x8xf32> to vector<288x8xf32>
    %35 = arith.truncf %34 : vector<288x8xf32> to vector<288x8xbf16>
    %c3 = arith.constant 3 : index
    %c0_22 = arith.constant 0 : index
    %c0_23 = arith.constant 0 : index
    %36 = vector.load %arg6[%c3, %c0_22, %c0_23] : memref<9x8x8xbf16, #tpu.memory_space<vmem>>, vector<1x8x8xbf16>
    %37 = vector.shape_cast %36 : vector<1x8x8xbf16> to vector<8x8xbf16>
    %cst_24 = arith.constant dense<0.000000e+00> : vector<288x8xf32>
    %38 = tpu.matmul %35, %37, %cst_24 {dimension_numbers = #tpu.dot_dimension_numbers<[1], [0], [0], [1], [0, 0, 1, 1], [], []>} : vector<288x8xbf16>, vector<8x8xbf16>, vector<288x8xf32> -> vector<288x8xf32>
    %39 = arith.addf %33, %38 : vector<288x8xf32>
    %40 = vector.extract_strided_slice %14 {offsets = [19, 0], sizes = [288, 8], strides = [1, 1]} : vector<328x8xf32> to vector<288x8xf32>
    %41 = arith.truncf %40 : vector<288x8xf32> to vector<288x8xbf16>
    %c4 = arith.constant 4 : index
    %c0_25 = arith.constant 0 : index
    %c0_26 = arith.constant 0 : index
    %42 = vector.load %arg6[%c4, %c0_25, %c0_26] : memref<9x8x8xbf16, #tpu.memory_space<vmem>>, vector<1x8x8xbf16>
    %43 = vector.shape_cast %42 : vector<1x8x8xbf16> to vector<8x8xbf16>
    %cst_27 = arith.constant dense<0.000000e+00> : vector<288x8xf32>
    %44 = tpu.matmul %41, %43, %cst_27 {dimension_numbers = #tpu.dot_dimension_numbers<[1], [0], [0], [1], [0, 0, 1, 1], [], []>} : vector<288x8xbf16>, vector<8x8xbf16>, vector<288x8xf32> -> vector<288x8xf32>
    %45 = arith.addf %39, %44 : vector<288x8xf32>
    %46 = vector.extract_strided_slice %14 {offsets = [20, 0], sizes = [288, 8], strides = [1, 1]} : vector<328x8xf32> to vector<288x8xf32>
    %47 = arith.truncf %46 : vector<288x8xf32> to vector<288x8xbf16>
    %c5 = arith.constant 5 : index
    %c0_28 = arith.constant 0 : index
    %c0_29 = arith.constant 0 : index
    %48 = vector.load %arg6[%c5, %c0_28, %c0_29] : memref<9x8x8xbf16, #tpu.memory_space<vmem>>, vector<1x8x8xbf16>
    %49 = vector.shape_cast %48 : vector<1x8x8xbf16> to vector<8x8xbf16>
    %cst_30 = arith.constant dense<0.000000e+00> : vector<288x8xf32>
    %50 = tpu.matmul %47, %49, %cst_30 {dimension_numbers = #tpu.dot_dimension_numbers<[1], [0], [0], [1], [0, 0, 1, 1], [], []>} : vector<288x8xbf16>, vector<8x8xbf16>, vector<288x8xf32> -> vector<288x8xf32>
    %51 = arith.addf %45, %50 : vector<288x8xf32>
    %52 = vector.extract_strided_slice %14 {offsets = [36, 0], sizes = [288, 8], strides = [1, 1]} : vector<328x8xf32> to vector<288x8xf32>
    %53 = arith.truncf %52 : vector<288x8xf32> to vector<288x8xbf16>
    %c6 = arith.constant 6 : index
    %c0_31 = arith.constant 0 : index
    %c0_32 = arith.constant 0 : index
    %54 = vector.load %arg6[%c6, %c0_31, %c0_32] : memref<9x8x8xbf16, #tpu.memory_space<vmem>>, vector<1x8x8xbf16>
    %55 = vector.shape_cast %54 : vector<1x8x8xbf16> to vector<8x8xbf16>
    %cst_33 = arith.constant dense<0.000000e+00> : vector<288x8xf32>
    %56 = tpu.matmul %53, %55, %cst_33 {dimension_numbers = #tpu.dot_dimension_numbers<[1], [0], [0], [1], [0, 0, 1, 1], [], []>} : vector<288x8xbf16>, vector<8x8xbf16>, vector<288x8xf32> -> vector<288x8xf32>
    %57 = arith.addf %51, %56 : vector<288x8xf32>
    %58 = vector.extract_strided_slice %14 {offsets = [37, 0], sizes = [288, 8], strides = [1, 1]} : vector<328x8xf32> to vector<288x8xf32>
    %59 = arith.truncf %58 : vector<288x8xf32> to vector<288x8xbf16>
    %c7 = arith.constant 7 : index
    %c0_34 = arith.constant 0 : index
    %c0_35 = arith.constant 0 : index
    %60 = vector.load %arg6[%c7, %c0_34, %c0_35] : memref<9x8x8xbf16, #tpu.memory_space<vmem>>, vector<1x8x8xbf16>
    %61 = vector.shape_cast %60 : vector<1x8x8xbf16> to vector<8x8xbf16>
    %cst_36 = arith.constant dense<0.000000e+00> : vector<288x8xf32>
    %62 = tpu.matmul %59, %61, %cst_36 {dimension_numbers = #tpu.dot_dimension_numbers<[1], [0], [0], [1], [0, 0, 1, 1], [], []>} : vector<288x8xbf16>, vector<8x8xbf16>, vector<288x8xf32> -> vector<288x8xf32>
    %63 = arith.addf %57, %62 : vector<288x8xf32>
    %64 = vector.extract_strided_slice %14 {offsets = [38, 0], sizes = [288, 8], strides = [1, 1]} : vector<328x8xf32> to vector<288x8xf32>
    %65 = arith.truncf %64 : vector<288x8xf32> to vector<288x8xbf16>
    %c8 = arith.constant 8 : index
    %c0_37 = arith.constant 0 : index
    %c0_38 = arith.constant 0 : index
    %66 = vector.load %arg6[%c8, %c0_37, %c0_38] : memref<9x8x8xbf16, #tpu.memory_space<vmem>>, vector<1x8x8xbf16>
    %67 = vector.shape_cast %66 : vector<1x8x8xbf16> to vector<8x8xbf16>
    %cst_39 = arith.constant dense<0.000000e+00> : vector<288x8xf32>
    %68 = tpu.matmul %65, %67, %cst_39 {dimension_numbers = #tpu.dot_dimension_numbers<[1], [0], [0], [1], [0, 0, 1, 1], [], []>} : vector<288x8xbf16>, vector<8x8xbf16>, vector<288x8xf32> -> vector<288x8xf32>
    %69 = arith.addf %63, %68 : vector<288x8xf32>
    %c0_40 = arith.constant 0 : index
    %c0_41 = arith.constant 0 : index
    %70 = vector.load %arg7[%c0_40, %c0_41] : memref<1x8xf32, #tpu.memory_space<vmem>>, vector<1x8xf32>
    %71 = vector.broadcast %70 : vector<1x8xf32> to vector<288x8xf32>
    %72 = arith.mulf %69, %71 : vector<288x8xf32>
    %c0_42 = arith.constant 0 : index
    %c0_43 = arith.constant 0 : index
    %73 = vector.load %arg8[%c0_42, %c0_43] : memref<1x8xf32, #tpu.memory_space<vmem>>, vector<1x8xf32>
    %74 = vector.broadcast %73 : vector<1x8xf32> to vector<288x8xf32>
    %75 = arith.addf %72, %74 : vector<288x8xf32>
    %cst_44 = arith.constant 0.000000e+00 : f32
    %76 = vector.broadcast %cst_44 : f32 to vector<288x8xf32>
    %77 = arith.maximumf %75, %76 : vector<288x8xf32>
    %78 = arith.truncf %77 : vector<288x8xf32> to vector<288x8xbf16>
    %c0_45 = arith.constant 0 : index
    %c0_46 = arith.constant 0 : index
    %79 = vector.load %arg9[%c0_45, %c0_46] : memref<8x32xbf16, #tpu.memory_space<vmem>>, vector<8x32xbf16>
    %cst_47 = arith.constant dense<0.000000e+00> : vector<288x32xf32>
    %80 = tpu.matmul %78, %79, %cst_47 {dimension_numbers = #tpu.dot_dimension_numbers<[1], [0], [0], [1], [0, 0, 1, 1], [], []>} : vector<288x8xbf16>, vector<8x32xbf16>, vector<288x32xf32> -> vector<288x32xf32>
    %c0_48 = arith.constant 0 : index
    %c0_49 = arith.constant 0 : index
    %81 = vector.load %arg10[%c0_48, %c0_49] : memref<1x32xf32, #tpu.memory_space<vmem>>, vector<1x32xf32>
    %82 = vector.broadcast %81 : vector<1x32xf32> to vector<288x32xf32>
    %83 = arith.mulf %80, %82 : vector<288x32xf32>
    %c0_50 = arith.constant 0 : index
    %c0_51 = arith.constant 0 : index
    %84 = vector.load %arg11[%c0_50, %c0_51] : memref<1x32xf32, #tpu.memory_space<vmem>>, vector<1x32xf32>
    %85 = vector.broadcast %84 : vector<1x32xf32> to vector<288x32xf32>
    %86 = arith.addf %83, %85 : vector<288x32xf32>
    %cst_52 = arith.constant 0.000000e+00 : f32
    %87 = vector.broadcast %cst_52 : f32 to vector<288x32xf32>
    %88 = arith.maximumf %86, %87 : vector<288x32xf32>
    %89 = arith.truncf %88 : vector<288x32xf32> to vector<288x32xbf16>
    %c0_53 = arith.constant 0 : index
    %c0_54 = arith.constant 0 : index
    %c0_55 = arith.constant 0 : index
    %90 = vector.load %arg12[%c0_53, %c0_54, %c0_55] : memref<1x288x32xbf16, #tpu.memory_space<vmem>>, vector<1x288x32xbf16>
    %91 = vector.shape_cast %90 : vector<1x288x32xbf16> to vector<288x32xbf16>
    %92 = vector.shape_cast %89 : vector<288x32xbf16> to vector<1x288x32xbf16>
    tpu.vector_store %arg12[%c0_53, %c0_54, %c0_55], %92 {strides = array<i32>} : memref<1x288x32xbf16, #tpu.memory_space<vmem>>, vector<1x288x32xbf16>,
    return
  }
  func.func @transform_0(%arg0: i32) -> (i32, i32, i32) {
    %c0_i32 = arith.constant 0 : i32
    %c0_i32_0 = arith.constant 0 : i32
    %c0_i32_1 = arith.constant 0 : i32
    return %arg0, %c0_i32, %c0_i32_0 : i32, i32, i32
  }
  func.func @transform_1(%arg0: i32) -> (i32, i32) {
    %c0_i32 = arith.constant 0 : i32
    %c0_i32_0 = arith.constant 0 : i32
    %c0_i32_1 = arith.constant 0 : i32
    return %c0_i32, %c0_i32_0 : i32, i32
  }
  func.func @transform_2(%arg0: i32) -> (i32, i32) {
    %c0_i32 = arith.constant 0 : i32
    %c0_i32_0 = arith.constant 0 : i32
    %c0_i32_1 = arith.constant 0 : i32
    return %c0_i32, %c0_i32_0 : i32, i32
  }
  func.func @transform_3(%arg0: i32) -> (i32, i32) {
    %c0_i32 = arith.constant 0 : i32
    %c0_i32_0 = arith.constant 0 : i32
    %c0_i32_1 = arith.constant 0 : i32
    return %c0_i32, %c0_i32_0 : i32, i32
  }
  func.func @transform_4(%arg0: i32) -> (i32, i32) {
    %c0_i32 = arith.constant 0 : i32
    %c0_i32_0 = arith.constant 0 : i32
    %c0_i32_1 = arith.constant 0 : i32
    return %c0_i32, %c0_i32_0 : i32, i32
  }
  func.func @transform_5(%arg0: i32) -> (i32, i32, i32) {
    %c0_i32 = arith.constant 0 : i32
    %c0_i32_0 = arith.constant 0 : i32
    %c0_i32_1 = arith.constant 0 : i32
    %c0_i32_2 = arith.constant 0 : i32
    return %c0_i32, %c0_i32_0, %c0_i32_1 : i32, i32, i32
  }
  func.func @transform_6(%arg0: i32) -> (i32, i32) {
    %c0_i32 = arith.constant 0 : i32
    %c0_i32_0 = arith.constant 0 : i32
    %c0_i32_1 = arith.constant 0 : i32
    return %c0_i32, %c0_i32_0 : i32, i32
  }
  func.func @transform_7(%arg0: i32) -> (i32, i32) {
    %c0_i32 = arith.constant 0 : i32
    %c0_i32_0 = arith.constant 0 : i32
    %c0_i32_1 = arith.constant 0 : i32
    return %c0_i32, %c0_i32_0 : i32, i32
  }
  func.func @transform_8(%arg0: i32) -> (i32, i32) {
    %c0_i32 = arith.constant 0 : i32
    %c0_i32_0 = arith.constant 0 : i32
    %c0_i32_1 = arith.constant 0 : i32
    return %c0_i32, %c0_i32_0 : i32, i32
  }
  func.func @transform_9(%arg0: i32) -> (i32, i32) {
    %c0_i32 = arith.constant 0 : i32
    %c0_i32_0 = arith.constant 0 : i32
    %c0_i32_1 = arith.constant 0 : i32
    return %c0_i32, %c0_i32_0 : i32, i32
  }
  func.func @transform_10(%arg0: i32) -> (i32, i32) {
    %c0_i32 = arith.constant 0 : i32
    %c0_i32_0 = arith.constant 0 : i32
    %c0_i32_1 = arith.constant 0 : i32
    return %c0_i32, %c0_i32_0 : i32, i32
  }
  func.func @transform_11(%arg0: i32) -> (i32, i32, i32) {
    %c0_i32 = arith.constant 0 : i32
    %c0_i32_0 = arith.constant 0 : i32
    %c0_i32_1 = arith.constant 0 : i32
    return %arg0, %c0_i32, %c0_i32_0 : i32, i32, i32
  }
}

module attributes {stable_mosaic.version = 11 : i64} {
  func.func @_excite_gate_kernel(%arg0: i32, %arg1: memref<1x88x32xbf16, #tpu.memory_space<vmem>>, %arg2: memref<1x88x32xbf16, #tpu.memory_space<vmem>>, %arg3: memref<1x88x32xbf16, #tpu.memory_space<vmem>>, %arg4: memref<1x88x32xbf16, #tpu.memory_space<vmem>>, %arg5: memref<1x256x32xbf16, #tpu.memory_space<vmem>>, %arg6: memref<1x256x32xf32, #tpu.memory_space<vmem>>, %arg7: memref<256x72xbf16, #tpu.memory_space<vmem>>, %arg8: memref<9x1x32xf32, #tpu.memory_space<vmem>>, %arg9: memref<1x32xf32, #tpu.memory_space<vmem>>, %arg10: memref<1x32xf32, #tpu.memory_space<vmem>>, %arg11: memref<32x2xbf16, #tpu.memory_space<vmem>>, %arg12: memref<2x32xbf16, #tpu.memory_space<vmem>>, %arg13: memref<1x256x32xf32, #tpu.memory_space<vmem>>) attributes {dimension_semantics = [#tpu.dimension_semantics<parallel>], iteration_bounds = array<i64: 2>, scalar_prefetch = 0 : i64, scratch_operands = 0 : i64, tpu.core_type = #tpu.core_type<tc>, window_params = [{transform_indices = @transform_0, window_bounds = array<i64: 1, 88, 32>}, {transform_indices = @transform_1, window_bounds = array<i64: 1, 88, 32>}, {transform_indices = @transform_2, window_bounds = array<i64: 1, 88, 32>}, {transform_indices = @transform_3, window_bounds = array<i64: 1, 88, 32>}, {transform_indices = @transform_4, window_bounds = array<i64: 1, 256, 32>}, {transform_indices = @transform_5, window_bounds = array<i64: 1, 256, 32>}, {pipeline_mode = #tpu.pipeline_mode<synchronous>, transform_indices = @transform_6, window_bounds = array<i64: 256, 72>}, {pipeline_mode = #tpu.pipeline_mode<synchronous>, transform_indices = @transform_7, window_bounds = array<i64: 9, 1, 32>}, {pipeline_mode = #tpu.pipeline_mode<synchronous>, transform_indices = @transform_8, window_bounds = array<i64: 1, 32>}, {pipeline_mode = #tpu.pipeline_mode<synchronous>, transform_indices = @transform_9, window_bounds = array<i64: 1, 32>}, {pipeline_mode = #tpu.pipeline_mode<synchronous>, transform_indices = @transform_10, window_bounds = array<i64: 32, 2>}, {pipeline_mode = #tpu.pipeline_mode<synchronous>, transform_indices = @transform_11, window_bounds = array<i64: 2, 32>}, {transform_indices = @transform_12, window_bounds = array<i64: 1, 256, 32>}]} {
    %c0 = arith.constant 0 : index
    %c0_0 = arith.constant 0 : index
    %c0_1 = arith.constant 0 : index
    %0 = vector.load %arg1[%c0, %c0_0, %c0_1] : memref<1x88x32xbf16, #tpu.memory_space<vmem>>, vector<1x88x32xbf16>
    %1 = vector.shape_cast %0 : vector<1x88x32xbf16> to vector<88x32xbf16>
    %2 = arith.extf %1 : vector<88x32xbf16> to vector<88x32xf32>
    %c0_2 = arith.constant 0 : index
    %c0_3 = arith.constant 0 : index
    %c0_4 = arith.constant 0 : index
    %3 = vector.load %arg2[%c0_2, %c0_3, %c0_4] : memref<1x88x32xbf16, #tpu.memory_space<vmem>>, vector<1x88x32xbf16>
    %4 = vector.shape_cast %3 : vector<1x88x32xbf16> to vector<88x32xbf16>
    %5 = arith.extf %4 : vector<88x32xbf16> to vector<88x32xf32>
    %c0_5 = arith.constant 0 : index
    %c0_6 = arith.constant 0 : index
    %c0_7 = arith.constant 0 : index
    %6 = vector.load %arg3[%c0_5, %c0_6, %c0_7] : memref<1x88x32xbf16, #tpu.memory_space<vmem>>, vector<1x88x32xbf16>
    %7 = vector.shape_cast %6 : vector<1x88x32xbf16> to vector<88x32xbf16>
    %8 = arith.extf %7 : vector<88x32xbf16> to vector<88x32xf32>
    %c0_8 = arith.constant 0 : index
    %c0_9 = arith.constant 0 : index
    %c0_10 = arith.constant 0 : index
    %9 = vector.load %arg4[%c0_8, %c0_9, %c0_10] : memref<1x88x32xbf16, #tpu.memory_space<vmem>>, vector<1x88x32xbf16>
    %10 = vector.shape_cast %9 : vector<1x88x32xbf16> to vector<88x32xbf16>
    %11 = arith.extf %10 : vector<88x32xbf16> to vector<88x32xf32>
    %cst = arith.constant 0.000000e+00 : f32
    %12 = vector.broadcast %cst : f32 to vector<72x32xf32>
    %13 = vector.extract_strided_slice %2 {offsets = [0, 0], sizes = [72, 32], strides = [1, 1]} : vector<88x32xf32> to vector<72x32xf32>
    %c0_11 = arith.constant 0 : index
    %c0_12 = arith.constant 0 : index
    %c0_13 = arith.constant 0 : index
    %14 = vector.load %arg8[%c0_11, %c0_12, %c0_13] : memref<9x1x32xf32, #tpu.memory_space<vmem>>, vector<1x1x32xf32>
    %15 = vector.shape_cast %14 : vector<1x1x32xf32> to vector<1x32xf32>
    %16 = vector.broadcast %15 : vector<1x32xf32> to vector<72x32xf32>
    %17 = arith.mulf %13, %16 : vector<72x32xf32>
    %18 = arith.addf %12, %17 : vector<72x32xf32>
    %19 = vector.extract_strided_slice %5 {offsets = [0, 0], sizes = [72, 32], strides = [1, 1]} : vector<88x32xf32> to vector<72x32xf32>
    %c1 = arith.constant 1 : index
    %c0_14 = arith.constant 0 : index
    %c0_15 = arith.constant 0 : index
    %20 = vector.load %arg8[%c1, %c0_14, %c0_15] : memref<9x1x32xf32, #tpu.memory_space<vmem>>, vector<1x1x32xf32>
    %21 = vector.shape_cast %20 : vector<1x1x32xf32> to vector<1x32xf32>
    %22 = vector.broadcast %21 : vector<1x32xf32> to vector<72x32xf32>
    %23 = arith.mulf %19, %22 : vector<72x32xf32>
    %24 = arith.addf %18, %23 : vector<72x32xf32>
    %25 = vector.extract_strided_slice %2 {offsets = [1, 0], sizes = [72, 32], strides = [1, 1]} : vector<88x32xf32> to vector<72x32xf32>
    %c2 = arith.constant 2 : index
    %c0_16 = arith.constant 0 : index
    %c0_17 = arith.constant 0 : index
    %26 = vector.load %arg8[%c2, %c0_16, %c0_17] : memref<9x1x32xf32, #tpu.memory_space<vmem>>, vector<1x1x32xf32>
    %27 = vector.shape_cast %26 : vector<1x1x32xf32> to vector<1x32xf32>
    %28 = vector.broadcast %27 : vector<1x32xf32> to vector<72x32xf32>
    %29 = arith.mulf %25, %28 : vector<72x32xf32>
    %30 = arith.addf %24, %29 : vector<72x32xf32>
    %31 = vector.extract_strided_slice %8 {offsets = [0, 0], sizes = [72, 32], strides = [1, 1]} : vector<88x32xf32> to vector<72x32xf32>
    %c3 = arith.constant 3 : index
    %c0_18 = arith.constant 0 : index
    %c0_19 = arith.constant 0 : index
    %32 = vector.load %arg8[%c3, %c0_18, %c0_19] : memref<9x1x32xf32, #tpu.memory_space<vmem>>, vector<1x1x32xf32>
    %33 = vector.shape_cast %32 : vector<1x1x32xf32> to vector<1x32xf32>
    %34 = vector.broadcast %33 : vector<1x32xf32> to vector<72x32xf32>
    %35 = arith.mulf %31, %34 : vector<72x32xf32>
    %36 = arith.addf %30, %35 : vector<72x32xf32>
    %37 = vector.extract_strided_slice %11 {offsets = [0, 0], sizes = [72, 32], strides = [1, 1]} : vector<88x32xf32> to vector<72x32xf32>
    %c4 = arith.constant 4 : index
    %c0_20 = arith.constant 0 : index
    %c0_21 = arith.constant 0 : index
    %38 = vector.load %arg8[%c4, %c0_20, %c0_21] : memref<9x1x32xf32, #tpu.memory_space<vmem>>, vector<1x1x32xf32>
    %39 = vector.shape_cast %38 : vector<1x1x32xf32> to vector<1x32xf32>
    %40 = vector.broadcast %39 : vector<1x32xf32> to vector<72x32xf32>
    %41 = arith.mulf %37, %40 : vector<72x32xf32>
    %42 = arith.addf %36, %41 : vector<72x32xf32>
    %43 = vector.extract_strided_slice %8 {offsets = [1, 0], sizes = [72, 32], strides = [1, 1]} : vector<88x32xf32> to vector<72x32xf32>
    %c5 = arith.constant 5 : index
    %c0_22 = arith.constant 0 : index
    %c0_23 = arith.constant 0 : index
    %44 = vector.load %arg8[%c5, %c0_22, %c0_23] : memref<9x1x32xf32, #tpu.memory_space<vmem>>, vector<1x1x32xf32>
    %45 = vector.shape_cast %44 : vector<1x1x32xf32> to vector<1x32xf32>
    %46 = vector.broadcast %45 : vector<1x32xf32> to vector<72x32xf32>
    %47 = arith.mulf %43, %46 : vector<72x32xf32>
    %48 = arith.addf %42, %47 : vector<72x32xf32>
    %49 = vector.extract_strided_slice %2 {offsets = [9, 0], sizes = [72, 32], strides = [1, 1]} : vector<88x32xf32> to vector<72x32xf32>
    %c6 = arith.constant 6 : index
    %c0_24 = arith.constant 0 : index
    %c0_25 = arith.constant 0 : index
    %50 = vector.load %arg8[%c6, %c0_24, %c0_25] : memref<9x1x32xf32, #tpu.memory_space<vmem>>, vector<1x1x32xf32>
    %51 = vector.shape_cast %50 : vector<1x1x32xf32> to vector<1x32xf32>
    %52 = vector.broadcast %51 : vector<1x32xf32> to vector<72x32xf32>
    %53 = arith.mulf %49, %52 : vector<72x32xf32>
    %54 = arith.addf %48, %53 : vector<72x32xf32>
    %55 = vector.extract_strided_slice %5 {offsets = [9, 0], sizes = [72, 32], strides = [1, 1]} : vector<88x32xf32> to vector<72x32xf32>
    %c7 = arith.constant 7 : index
    %c0_26 = arith.constant 0 : index
    %c0_27 = arith.constant 0 : index
    %56 = vector.load %arg8[%c7, %c0_26, %c0_27] : memref<9x1x32xf32, #tpu.memory_space<vmem>>, vector<1x1x32xf32>
    %57 = vector.shape_cast %56 : vector<1x1x32xf32> to vector<1x32xf32>
    %58 = vector.broadcast %57 : vector<1x32xf32> to vector<72x32xf32>
    %59 = arith.mulf %55, %58 : vector<72x32xf32>
    %60 = arith.addf %54, %59 : vector<72x32xf32>
    %61 = vector.extract_strided_slice %2 {offsets = [10, 0], sizes = [72, 32], strides = [1, 1]} : vector<88x32xf32> to vector<72x32xf32>
    %c8 = arith.constant 8 : index
    %c0_28 = arith.constant 0 : index
    %c0_29 = arith.constant 0 : index
    %62 = vector.load %arg8[%c8, %c0_28, %c0_29] : memref<9x1x32xf32, #tpu.memory_space<vmem>>, vector<1x1x32xf32>
    %63 = vector.shape_cast %62 : vector<1x1x32xf32> to vector<1x32xf32>
    %64 = vector.broadcast %63 : vector<1x32xf32> to vector<72x32xf32>
    %65 = arith.mulf %61, %64 : vector<72x32xf32>
    %66 = arith.addf %60, %65 : vector<72x32xf32>
    %c0_30 = arith.constant 0 : index
    %c0_31 = arith.constant 0 : index
    %67 = vector.load %arg9[%c0_30, %c0_31] : memref<1x32xf32, #tpu.memory_space<vmem>>, vector<1x32xf32>
    %68 = vector.broadcast %67 : vector<1x32xf32> to vector<72x32xf32>
    %69 = arith.mulf %66, %68 : vector<72x32xf32>
    %c0_32 = arith.constant 0 : index
    %c0_33 = arith.constant 0 : index
    %70 = vector.load %arg10[%c0_32, %c0_33] : memref<1x32xf32, #tpu.memory_space<vmem>>, vector<1x32xf32>
    %71 = vector.broadcast %70 : vector<1x32xf32> to vector<72x32xf32>
    %72 = arith.addf %69, %71 : vector<72x32xf32>
    %73 = arith.truncf %72 : vector<72x32xf32> to vector<72x32xbf16>
    %c0_34 = arith.constant 0 : index
    %c0_35 = arith.constant 0 : index
    %74 = vector.load %arg11[%c0_34, %c0_35] : memref<32x2xbf16, #tpu.memory_space<vmem>>, vector<32x2xbf16>
    %cst_36 = arith.constant dense<0.000000e+00> : vector<72x2xf32>
    %75 = tpu.matmul %73, %74, %cst_36 {dimension_numbers = #tpu.dot_dimension_numbers<[1], [0], [0], [1], [0, 0, 1, 1], [], []>} : vector<72x32xbf16>, vector<32x2xbf16>, vector<72x2xf32> -> vector<72x2xf32>
    %cst_37 = arith.constant 0.000000e+00 : f32
    %76 = vector.broadcast %cst_37 : f32 to vector<72x2xf32>
    %77 = arith.maximumf %75, %76 : vector<72x2xf32>
    %78 = arith.truncf %77 : vector<72x2xf32> to vector<72x2xbf16>
    %c0_38 = arith.constant 0 : index
    %c0_39 = arith.constant 0 : index
    %79 = vector.load %arg12[%c0_38, %c0_39] : memref<2x32xbf16, #tpu.memory_space<vmem>>, vector<2x32xbf16>
    %cst_40 = arith.constant dense<0.000000e+00> : vector<72x32xf32>
    %80 = tpu.matmul %78, %79, %cst_40 {dimension_numbers = #tpu.dot_dimension_numbers<[1], [0], [0], [1], [0, 0, 1, 1], [], []>} : vector<72x2xbf16>, vector<2x32xbf16>, vector<72x32xf32> -> vector<72x32xf32>
    %c0_41 = arith.constant 0 : index
    %c0_42 = arith.constant 0 : index
    %81 = vector.load %arg7[%c0_41, %c0_42] : memref<256x72xbf16, #tpu.memory_space<vmem>>, vector<256x72xbf16>
    %82 = arith.truncf %80 : vector<72x32xf32> to vector<72x32xbf16>
    %cst_43 = arith.constant dense<0.000000e+00> : vector<256x32xf32>
    %83 = tpu.matmul %81, %82, %cst_43 {dimension_numbers = #tpu.dot_dimension_numbers<[1], [0], [0], [1], [0, 0, 1, 1], [], []>} : vector<256x72xbf16>, vector<72x32xbf16>, vector<256x32xf32> -> vector<256x32xf32>
    %84 = arith.negf %83 : vector<256x32xf32>
    %85 = math.exp %84 : vector<256x32xf32>
    %cst_44 = arith.constant 1.000000e+00 : f32
    %86 = vector.broadcast %cst_44 : f32 to vector<256x32xf32>
    %87 = arith.addf %86, %85 : vector<256x32xf32>
    %88 = arith.divf %86, %87 : vector<256x32xf32>
    %c0_45 = arith.constant 0 : index
    %c0_46 = arith.constant 0 : index
    %c0_47 = arith.constant 0 : index
    %89 = vector.load %arg6[%c0_45, %c0_46, %c0_47] : memref<1x256x32xf32, #tpu.memory_space<vmem>>, vector<1x256x32xf32>
    %90 = vector.shape_cast %89 : vector<1x256x32xf32> to vector<256x32xf32>
    %c0_48 = arith.constant 0 : index
    %c0_49 = arith.constant 0 : index
    %c0_50 = arith.constant 0 : index
    %91 = vector.load %arg5[%c0_48, %c0_49, %c0_50] : memref<1x256x32xbf16, #tpu.memory_space<vmem>>, vector<1x256x32xbf16>
    %92 = vector.shape_cast %91 : vector<1x256x32xbf16> to vector<256x32xbf16>
    %93 = arith.extf %92 : vector<256x32xbf16> to vector<256x32xf32>
    %94 = arith.mulf %93, %88 : vector<256x32xf32>
    %95 = arith.addf %90, %94 : vector<256x32xf32>
    %c0_51 = arith.constant 0 : index
    %c0_52 = arith.constant 0 : index
    %c0_53 = arith.constant 0 : index
    %96 = vector.load %arg13[%c0_51, %c0_52, %c0_53] : memref<1x256x32xf32, #tpu.memory_space<vmem>>, vector<1x256x32xf32>
    %97 = vector.shape_cast %96 : vector<1x256x32xf32> to vector<256x32xf32>
    %98 = vector.shape_cast %95 : vector<256x32xf32> to vector<1x256x32xf32>
    tpu.vector_store %arg13[%c0_51, %c0_52, %c0_53], %98 {strides = array<i32>} : memref<1x256x32xf32, #tpu.memory_space<vmem>>, vector<1x256x32xf32>,
    return
  }
  func.func @transform_0(%arg0: i32) -> (i32, i32, i32) {
    %c0_i32 = arith.constant 0 : i32
    %c0_i32_0 = arith.constant 0 : i32
    %c0_i32_1 = arith.constant 0 : i32
    return %arg0, %c0_i32, %c0_i32_0 : i32, i32, i32
  }
  func.func @transform_1(%arg0: i32) -> (i32, i32, i32) {
    %c0_i32 = arith.constant 0 : i32
    %c0_i32_0 = arith.constant 0 : i32
    %c0_i32_1 = arith.constant 0 : i32
    return %arg0, %c0_i32, %c0_i32_0 : i32, i32, i32
  }
  func.func @transform_2(%arg0: i32) -> (i32, i32, i32) {
    %c0_i32 = arith.constant 0 : i32
    %c0_i32_0 = arith.constant 0 : i32
    %c0_i32_1 = arith.constant 0 : i32
    return %arg0, %c0_i32, %c0_i32_0 : i32, i32, i32
  }
  func.func @transform_3(%arg0: i32) -> (i32, i32, i32) {
    %c0_i32 = arith.constant 0 : i32
    %c0_i32_0 = arith.constant 0 : i32
    %c0_i32_1 = arith.constant 0 : i32
    return %arg0, %c0_i32, %c0_i32_0 : i32, i32, i32
  }
  func.func @transform_4(%arg0: i32) -> (i32, i32, i32) {
    %c0_i32 = arith.constant 0 : i32
    %c0_i32_0 = arith.constant 0 : i32
    %c0_i32_1 = arith.constant 0 : i32
    return %arg0, %c0_i32, %c0_i32_0 : i32, i32, i32
  }
  func.func @transform_5(%arg0: i32) -> (i32, i32, i32) {
    %c0_i32 = arith.constant 0 : i32
    %c0_i32_0 = arith.constant 0 : i32
    %c0_i32_1 = arith.constant 0 : i32
    return %arg0, %c0_i32, %c0_i32_0 : i32, i32, i32
  }
  func.func @transform_6(%arg0: i32) -> (i32, i32) {
    %c0_i32 = arith.constant 0 : i32
    %c0_i32_0 = arith.constant 0 : i32
    %c0_i32_1 = arith.constant 0 : i32
    return %c0_i32, %c0_i32_0 : i32, i32
  }
  func.func @transform_7(%arg0: i32) -> (i32, i32, i32) {
    %c0_i32 = arith.constant 0 : i32
    %c0_i32_0 = arith.constant 0 : i32
    %c0_i32_1 = arith.constant 0 : i32
    %c0_i32_2 = arith.constant 0 : i32
    return %c0_i32, %c0_i32_0, %c0_i32_1 : i32, i32, i32
  }
  func.func @transform_8(%arg0: i32) -> (i32, i32) {
    %c0_i32 = arith.constant 0 : i32
    %c0_i32_0 = arith.constant 0 : i32
    %c0_i32_1 = arith.constant 0 : i32
    return %c0_i32, %c0_i32_0 : i32, i32
  }
  func.func @transform_9(%arg0: i32) -> (i32, i32) {
    %c0_i32 = arith.constant 0 : i32
    %c0_i32_0 = arith.constant 0 : i32
    %c0_i32_1 = arith.constant 0 : i32
    return %c0_i32, %c0_i32_0 : i32, i32
  }
  func.func @transform_10(%arg0: i32) -> (i32, i32) {
    %c0_i32 = arith.constant 0 : i32
    %c0_i32_0 = arith.constant 0 : i32
    %c0_i32_1 = arith.constant 0 : i32
    return %c0_i32, %c0_i32_0 : i32, i32
  }
  func.func @transform_11(%arg0: i32) -> (i32, i32) {
    %c0_i32 = arith.constant 0 : i32
    %c0_i32_0 = arith.constant 0 : i32
    %c0_i32_1 = arith.constant 0 : i32
    return %c0_i32, %c0_i32_0 : i32, i32
  }
  func.func @transform_12(%arg0: i32) -> (i32, i32, i32) {
    %c0_i32 = arith.constant 0 : i32
    %c0_i32_0 = arith.constant 0 : i32
    %c0_i32_1 = arith.constant 0 : i32
    return %arg0, %c0_i32, %c0_i32_0 : i32, i32, i32
  }
}

</mosaic_0001>

<bundles_post_ra>
// kernel: ge_block_forward.3
= control target key start
LH: loop header
LB: loop body
LE: loop exit
PB: predicated region body
PF: predicated region fallthrough
CT: control target
= control target key end

     0   :  { %s3779_s0 = inlined_call_operand.vmem [shape: bf16[2,88,32], index: 0, kind: input, shape index: {}]   ;;  %s3780_s1 = inlined_call_operand.vmem [shape: bf16[2,88,32], index: 1, kind: input, shape index: {}]   ;;  %s3781_s2 = inlined_call_operand.vmem [shape: bf16[2,88,32], index: 2, kind: input, shape index: {}]   ;;  %s3782_s3 = inlined_call_operand.vmem [shape: bf16[2,88,32], index: 3, kind: input, shape index: {}]   ;;  %s3783_s4 = inlined_call_operand.vmem [shape: bf16[2,256,32], index: 4, kind: input, shape index: {}]   ;;  %s3784_s5 = inlined_call_operand.vmem [shape: f32[2,256,32], index: 5, kind: input, shape index: {}]   ;;  %s3785_s6 = inlined_call_operand.vmem [shape: bf16[256,72], index: 6, kind: input, shape index: {}]   ;;  %s3786_s7 = inlined_call_operand.vmem [shape: f32[9,1,32], index: 7, kind: input, shape index: {}]   ;;  %s3787_s8 = inlined_call_operand.vmem [shape: f32[1,32], index: 8, kind: input, shape index: {}]   ;;  %s3788_s9 = inlined_call_operand.vmem [shape: f32[1,32], index: 9, kind: input, shape index: {}]   ;;  %s3789_s10 = inlined_call_operand.vmem [shape: bf16[32,2], index: 10, kind: input, shape index: {}]   ;;  %s3790_s11 = inlined_call_operand.vmem [shape: bf16[2,32], index: 11, kind: input, shape index: {}]   ;;  %s3791_s12 = inlined_call_operand.hbm [shape: f32[2,256,32], index: 12, kind: output, shape index: {}]  }
   0x1   :  { %3793 = sst [smem:[#allocation7_spill]] %s3779_s0 }
   0x2   :  { %3794 = sst [smem:[#allocation8_spill]] %s3789_s10 }
   0x3   :  { %17 = vsyncpa [#allocation3], 0 }
   0x4   :  { %19 = vsyncpa [#allocation3 + $0x1], 0  ;;  %s2868_s21 = smov 0   ;;  %s2870_s22 = smov 0  }
   0x5   :  { %s2872_s23 = smov 0   ;;  %s2874_s24 = smov 0  }
   0x6 LB: > { %3795 = sst [smem:[#allocation5_spill]] %s2792_s23  ;;  %s2889_s25 = sadd.s32 4294967295, %s2796_s24   ;;  %s2796_s24 = sphi %s2874_s24, %s3805_s24   ;;  %s2792_s23 = sphi %s2872_s23, %s3802_s23   ;;  %s2788_s22 = sphi %s2870_s22, %s3804_s22   ;;  %s2784_s21 = sphi %s2868_s21, %s3803_s21  }
   0x7   : > { %s2124_s26 = sadd.s32 4294967294, %s2796_s24   ;;  %s2893_s27 = sadd.s32 1, %s2796_s24  }
   0x8   : > { %s314_s28 = sadd.s32 1, %s2792_s23  ;;  %s311_s29 = ssub.s32 %s2796_s24, %s2893_s27 }
   0x9   : > { %p324_p0 = scmp.ne.s32.totalorder %s2792_s23, %s2788_s22  ;;  %p312_p1 = scmp.eq.s32.totalorder %s311_s29, 0 }
   0xa   : > { %p325_p2 = scmp.eq.s32.totalorder %s2889_s25, 1  ;;  %p330_p3 = scmp.ne.s32.totalorder %s2788_s22, %s2784_s21 }
   0xb   : > { %p331_p4 = scmp.eq.s32.totalorder %s2124_s26, 1  ;;  %p2127_p7 = scmp.ge.s32.totalorder %s2796_s24, 1 }
   0xc   : > { %s2904_s30 = scalar_select %p312_p1, %s2792_s23, %s314_s28  }
   0xd   : > { %p2906_p5 = por %p325_p2, %p324_p0  ;;  %p2910_p6 = por %p331_p4, %p330_p3 }
   0xe   : > { %3796 = sst [smem:[#allocation6_spill]] %s2904_s30  ;;  %p415_p8 = scmp.lt.s32.totalorder %s2796_s24, 3 }
  0x10   : > { %p416_p9 = pnand %p2127_p7, %p415_p8 }
  0x11   : > { %s3799_s10 = sld [smem:[#allocation8_spill]] (!%p416_p9)  ;;  %v2798_v1 = vmov (!%p416_p9), 0.0   ;;  %vm2799_vm0 = vmmov (!%p416_p9), 0   ;;  %p482_p10 = scmp.lt.s32.totalorder (!%p416_p9), %s2889_s25, 1  ;;  %v2947_v3 = vld [vmem:[%s3786_s7] ss:$0 sm:$0xff] (!%p416_p9) }
  0x12   : > { %419 = sbr.rel (%p416_p9) target bundleno = 874 (0x36a), region = 68  ;;  %2444 = vmatprep.subr.bf16.mxu0 (!%p416_p9), %v2798_v1  ;;  %2468 = vmatprep.subr.bf16.mxu1 (!%p416_p9), %v2798_v1  ;;  %s3800_s0 = sld [smem:[#allocation7_spill]] (!%p416_p9)  ;;  %v2952_v4 = vld [vmem:[%s3786_s7 + $0x1] ss:$0 sm:$0xff] (!%p416_p9)  ;;  %vm674_vm1 = vcmask (!%p416_p9), 1046528   ;;  %vm987_vm2 = vcmask (!%p416_p9), 1045504  }
  0x13   : > { %2448 = vmatprep.mubr.msk.bf16.mxu0 (!%p416_p9), %vm2799_vm0, %v2798_v1  ;;  %2470 = vmatprep.mubr.msk.bf16.mxu1 (!%p416_p9), %vm2799_vm0, %v2798_v1  ;;  %v2986_v20 = vld [vmem:[%s3786_s7 + $0x2] ss:$0 sm:$0xff] (!%p416_p9)  ;;  %v2992_v25 = vld [vmem:[%s3786_s7 + $0x3] ss:$0 sm:$0xff] (!%p416_p9)  ;;  %v3001_v30 = vld [vmem:[%s3786_s7 + $0x4] ss:$0 sm:$0xff] (!%p416_p9) }
  0x14   : > { %v3014_v35 = vld [vmem:[%s3786_s7 + $0x5] ss:$0 sm:$0xff] (!%p416_p9)  ;;  %v3026_v40 = vld [vmem:[%s3786_s7 + $0x6] ss:$0 sm:$0xff] (!%p416_p9)  ;;  %v3033_v45 = vld [vmem:[%s3786_s7 + $0x7] ss:$0 sm:$0xff] (!%p416_p9) }
  0x15   : > { %v3059_v58 = vld [vmem:[%s3786_s7 + $0x8] ss:$0 sm:$0xff] (!%p416_p9)  ;;  %vm1078_vm3 = vcmask (!%p416_p9), 261120   ;;  %vm1197_vm4 = vcmask (!%p416_p9), 1040384   ;;  %vm1181_vm5 = vcmask (!%p416_p9), 15360   ;;  %vm1390_vm6 = vcmask (!%p416_p9), 588800  }
  0x16   : > { %vm1439_vm7 = vcmask (!%p416_p9), 1043456   ;;  %s2239_s28 = sshll.u32 (!%p416_p9), %s2889_s25, 12 }
  0x17   : > { %v2588_v0 = vld [vmem:[%s3799_s10] sm:$0xff] (!%p416_p9)   ;;  %v2589_v2 = vld [vmem:[%s3799_s10 + $0x8] sm:$0xff] (!%p416_p9)  }
  0x18   : > { %2445 = vmatpush3.bf16.msra.mxu0 (!%p416_p9), %v2588_v0 }
  0x19   : > { %2446 = vmatprep.subr.bf16.mxu0 %v2798_v1  ;;  %s2931_s19 = scalar_select %p482_p10, %s2889_s25, 1 }
  0x1b   : > { %s2544_s20 = smul.u32 44, %s2931_s19 }
  0x1c   : > { %2447 = vmatpush3.bf16.msra.mxu0 %v2589_v2 }
  0x1d   : > { %s2937_s29 = scalar_lea.vmem %s3800_s0, %s2544_s20  ;;  %s2942_s17 = scalar_lea.vmem %s3780_s1, %s2544_s20 }
  0x1e   : > { %s2957_s15 = scalar_lea.vmem %s3781_s2, %s2544_s20  ;;  %s2962_s10 = scalar_lea.vmem %s3782_s3, %s2544_s20  ;;  %v2241_v5 = vld [vmem:[%s2937_s29] sm:$0xff]   ;;  %v2380_v6 = vld [vmem:[%s2937_s29 + $0x8] sm:$0xff]  }
  0x1f   : > { %v2261_v7 = vld [vmem:[%s2942_s17] sm:$0xff]   ;;  %v2242_v8 = vunpack.c.l.bf16 %v2241_v5  ;;  %v2967_v9 = vunpack.c.h.bf16 %v2241_v5  ;;  %v2969_v10 = vunpack.c.l.bf16 %v2380_v6  ;;  %v2971_v11 = vunpack.c.h.bf16 %v2380_v6  ;;  %v2974_v12 = vld [vmem:[%s2942_s17 + $0x8] sm:$0xff]   ;;  %v2381_v6 = vld [vmem:[%s2937_s29 + $0x10] sm:$0xff]   ;;  %s2237_s0 = sshll.u32 %s2931_s19, 7 }
  0x20   : > { %v2281_v13 = vld [vmem:[%s2957_s15] sm:$0xff]   ;;  %v2978_v14 = vld [vmem:[%s2957_s15 + $0x8] sm:$0xff]   ;;  %v2262_v15 = vunpack.c.l.bf16 %v2261_v7  ;;  %v2263_v16 = vunpack.c.h.bf16 %v2261_v7  ;;  %v2266_v17 = vunpack.c.l.bf16 %v2974_v12  ;;  %v2267_v18 = vunpack.c.h.bf16 %v2974_v12 }
  0x21   : > { %v2301_v19 = vld [vmem:[%s2962_s10] sm:$0xff]   ;;  %v2282_v21 = vunpack.c.l.bf16 %v2281_v13  ;;  %v2283_v22 = vunpack.c.h.bf16 %v2281_v13  ;;  %v2286_v23 = vunpack.c.l.bf16 %v2978_v14  ;;  %v602_v27 = vmul.f32 %v2242_v8, %v2947_v3 }
  0x22   : > { %v2302_v24 = vunpack.c.l.bf16 %v2301_v19  ;;  %v2303_v26 = vunpack.c.h.bf16 %v2301_v19  ;;  %v603_v28 = vmul.f32 %v2967_v9, %v2947_v3  ;;  %v628_v29 = vmul.f32 %v2262_v15, %v2952_v4 }
  0x23   : > { %v629_v31 = vmul.f32 %v2263_v16, %v2952_v4  ;;  %v3005_v32 = vmul.f32 %v2266_v17, %v2952_v4  ;;  %v3008_v33 = vmul.f32 %v2267_v18, %v2952_v4  ;;  %v654_v34 = vmul.f32 %v2242_v8, %v2986_v20 }
  0x24   : > { %v637_v36 = vadd.f32 %v628_v29, %v602_v27  ;;  %v655_v37 = vmul.f32 %v2967_v9, %v2986_v20  ;;  %v3020_v38 = vmul.f32 %v2969_v10, %v2986_v20  ;;  %v720_v39 = vmul.f32 %v2282_v21, %v2992_v25 }
  0x25   : > { %v638_v41 = vadd.f32 %v629_v31, %v603_v28  ;;  %v675_v42 = vrot.slane %v654_v34, 1  ;;  %v721_v43 = vmul.f32 %v2283_v22, %v2992_v25  ;;  %v746_v44 = vmul.f32 %v2302_v24, %v3001_v30  ;;  %v3080_v28 = vld [vmem:[%s2942_s17 + $0x10] sm:$0xff]  }
  0x26   : > { %v676_v46 = vrot.slane %v655_v37, 1  ;;  %v678_v47 = vrot.slane %v3020_v38, 1  ;;  %v747_v48 = vmul.f32 %v2303_v26, %v3001_v30  ;;  %v772_v49 = vmul.f32 %v2282_v21, %v3014_v35 }
  0x27   : > { %v773_v50 = vmul.f32 %v2283_v22, %v3014_v35  ;;  %v3042_v51 = vmul.f32 %v2286_v23, %v3014_v35  ;;  %v837_v52 = vmul.f32 %v2967_v9, %v3026_v40  ;;  %v838_v53 = vmul.f32 %v2969_v10, %v3026_v40 }
  0x28   : > { %v677_v54 = vsel %vm674_vm1, %v675_v42, %v676_v46  ;;  %v679_v55 = vsel %vm674_vm1, %v676_v46, %v678_v47  ;;  %v792_v56 = vrot.slane %v772_v49, 1  ;;  %v3054_v57 = vmul.f32 %v2971_v11, %v3026_v40 }
  0x29   : > { %v703_v59 = vadd.f32 %v677_v54, %v637_v36  ;;  %v704_v60 = vadd.f32 %v679_v55, %v638_v41  ;;  %v793_v61 = vrot.slane %v773_v50, 1  ;;  %v795_v62 = vrot.slane %v3042_v51, 1  ;;  %v2382_v51 = vld [vmem:[%s2937_s29 + $0x18] sm:$0xff]  }
  0x2a   : > { %v857_v63 = vrot.slane %v837_v52, 1  ;;  %v858_v0 = vrot.slane %v838_v53, 1  ;;  %v860_v2 = vrot.slane %v3054_v57, 1  ;;  %v902_v5 = vmul.f32 %v2263_v16, %v3033_v45 }
  0x2b   : > { %v729_v7 = vadd.f32 %v720_v39, %v703_v59  ;;  %v730_v8 = vadd.f32 %v721_v43, %v704_v60  ;;  %v794_v12 = vsel %vm674_vm1, %v792_v56, %v793_v61  ;;  %v796_v13 = vsel %vm674_vm1, %v793_v61, %v795_v62 }
  0x2c   : > { %v859_v15 = vsel %vm674_vm1, %v857_v63, %v858_v0  ;;  %v861_v19 = vsel %vm674_vm1, %v858_v0, %v860_v2  ;;  %v903_v21 = vmul.f32 %v2266_v17, %v3033_v45  ;;  %v3075_v16 = vmul.f32 %v2267_v18, %v3033_v45  ;;  %v3090_v18 = vld [vmem:[%s2957_s15 + $0x10] sm:$0xff]   ;;  %v3113_v0 = vld [vmem:[%s3787_s8] ss:$0 sm:$0xff] }
  0x2d   : > { %v755_v22 = vadd.f32 %v746_v44, %v729_v7  ;;  %v756_v24 = vadd.f32 %v747_v48, %v730_v8  ;;  %v922_v26 = vrot.slane %v902_v5, 1  ;;  %v967_v27 = vmul.f32 %v2967_v9, %v3059_v58  ;;  %v2392_v9 = vld [vmem:[%s2962_s10 + $0x8] sm:$0xff]  }
  0x2e   : > { %v923_v29 = vrot.slane %v903_v21, 1  ;;  %v925_v31 = vrot.slane %v3075_v16, 1  ;;  %v968_v34 = vmul.f32 %v2969_v10, %v3059_v58  ;;  %v3087_v17 = vmul.f32 %v2971_v11, %v3059_v58  ;;  %v3130_v21 = vld [vmem:[%s3788_s9] ss:$0 sm:$0xff] }
  0x2f   : > { %v820_v36 = vadd.f32 %v794_v12, %v755_v22  ;;  %v821_v37 = vadd.f32 %v796_v13, %v756_v24  ;;  %v988_v39 = vrot.slane %v967_v27, 2  ;;  %v3092_v41 = vunpack.c.l.bf16 %v2381_v6 }
  0x30   : > { %v924_v42 = vsel %vm674_vm1, %v922_v26, %v923_v29  ;;  %v926_v43 = vsel %vm674_vm1, %v923_v29, %v925_v31  ;;  %v989_v44 = vrot.slane %v968_v34, 2  ;;  %v991_v46 = vrot.slane %v3087_v17, 2 }
  0x31   : > { %v885_v48 = vadd.f32 %v859_v15, %v820_v36  ;;  %v886_v49 = vadd.f32 %v861_v19, %v821_v37  ;;  %v3100_v50 = vunpack.c.h.bf16 %v2381_v6  ;;  %v2270_v52 = vunpack.c.l.bf16 %v3080_v28 }
  0x32   : > { %v990_v53 = vsel %vm987_vm2, %v988_v39, %v989_v44  ;;  %v992_v54 = vsel %vm987_vm2, %v989_v44, %v991_v46  ;;  %v2271_v55 = vunpack.c.h.bf16 %v3080_v28  ;;  %v2287_v56 = vunpack.c.h.bf16 %v2978_v14 }
  0x33   : > { %v950_v59 = vadd.f32 %v924_v42, %v885_v48  ;;  %v951_v60 = vadd.f32 %v926_v43, %v886_v49  ;;  %v2290_v61 = vunpack.c.l.bf16 %v3090_v18  ;;  %v2306_v63 = vunpack.c.l.bf16 %v2392_v9 }
  0x34   : > { %v2307_v5 = vunpack.c.h.bf16 %v2392_v9  ;;  %v604_v6 = vmul.f32 %v2969_v10, %v2947_v3  ;;  %v605_v7 = vmul.f32 %v2971_v11, %v2947_v3  ;;  %v3120_v8 = vmul.f32 %v2270_v52, %v2952_v4 }
  0x35   : > { %v1016_v12 = vadd.f32 %v990_v53, %v950_v59  ;;  %v1017_v13 = vadd.f32 %v992_v54, %v951_v60  ;;  %v3123_v15 = vmul.f32 %v2271_v55, %v2952_v4  ;;  %v657_v19 = vmul.f32 %v2971_v11, %v2986_v20 }
  0x36   : > { %v639_v10 = vadd.f32 %v3005_v32, %v604_v6  ;;  %v640_v22 = vadd.f32 %v3008_v33, %v605_v7  ;;  %v3136_v24 = vmul.f32 %v3092_v41, %v2986_v20  ;;  %v722_v26 = vmul.f32 %v2286_v23, %v2992_v25 }
  0x37   : > { %v1032_v27 = vmul.f32 %v3113_v0, %v1016_v12  ;;  %v1033_v11 = vmul.f32 %v3113_v0, %v1017_v13  ;;  %v680_v28 = vrot.slane %v657_v19, 1  ;;  %v723_v29 = vmul.f32 %v2287_v56, %v2992_v25 }
  0x38   : > { %v682_v34 = vrot.slane %v3136_v24, 1  ;;  %v748_v32 = vmul.f32 %v2306_v63, %v3001_v30  ;;  %v749_v33 = vmul.f32 %v2307_v5, %v3001_v30  ;;  %v775_v36 = vmul.f32 %v2287_v56, %v3014_v35 }
  0x39   : > { %v1048_v37 = vadd.f32 %v3130_v21, %v1032_v27  ;;  %v1049_v14 = vadd.f32 %v3130_v21, %v1033_v11  ;;  %v681_v23 = vsel %vm674_vm1, %v678_v47, %v680_v28  ;;  %v3156_v39 = vmul.f32 %v2290_v61, %v3014_v35  ;;  %v3205_v11 = vld [vmem:[%s2957_s15 + $0x18] sm:$0xff]  }
  0x3a   : > { %v683_v9 = vsel %vm674_vm1, %v680_v28, %v682_v34  ;;  %v705_v42 = vadd.f32 %v681_v23, %v639_v10  ;;  %v797_v43 = vrot.slane %v775_v36, 1  ;;  %v840_v44 = vmul.f32 %v3092_v41, %v3026_v40  ;;  %v2393_v36 = vld [vmem:[%s2962_s10 + $0x10] sm:$0xff]  }
  0x3b   : > { %v1057_v48 = vpack.c.bf16 %v1049_v14, %v1048_v37  ;;  %v706_v49 = vadd.f32 %v683_v9, %v640_v22  ;;  %v799_v38 = vrot.slane %v3156_v39, 1  ;;  %v3166_v47 = vmul.f32 %v3100_v50, %v3026_v40  ;;  %v3197_v22 = vld [vmem:[%s2942_s17 + $0x18] sm:$0xff]  }
  0x3c   : > { %v731_v53 = vadd.f32 %v722_v26, %v705_v42  ;;  %v798_v54 = vsel %vm674_vm1, %v795_v62, %v797_v43  ;;  %v862_v56 = vrot.slane %v840_v44, 1  ;;  %v905_v59 = vmul.f32 %v2270_v52, %v3033_v45 }
  0x3d   : > { %2449 = vmatmul.mubr.msk.bf16.vlgmr.msra.gmra.mrb[0].mxu0 %vm1078_vm3, %v1057_v48  ;;  %v732_v60 = vadd.f32 %v723_v29, %v706_v49  ;;  %v800_v63 = vsel %vm674_vm1, %v797_v43, %v799_v38  ;;  %v864_v5 = vrot.slane %v3166_v47, 1  ;;  %v3178_v6 = vmul.f32 %v2271_v55, %v3033_v45 }
  0x3e   : > { %2452 = vmatprep.mubr.msk.bf16.mxu0 %vm2799_vm0, %v2798_v1  ;;  %v757_v62 = vadd.f32 %v748_v32, %v731_v53  ;;  %v863_v52 = vsel %vm674_vm1, %v860_v2, %v862_v56  ;;  %v927_v7 = vrot.slane %v905_v59, 1  ;;  %v970_v12 = vmul.f32 %v3092_v41, %v3059_v58 }
  0x3f   : > { %v758_v13 = vadd.f32 %v749_v33, %v732_v60  ;;  %v865_v55 = vsel %vm674_vm1, %v862_v56, %v864_v5  ;;  %v929_v19 = vrot.slane %v3178_v6, 1  ;;  %v3194_v10 = vmul.f32 %v3100_v50, %v3059_v58 }
  0x40   : > { %v822_v57 = vadd.f32 %v798_v54, %v757_v62  ;;  %v928_v2 = vsel %vm674_vm1, %v925_v31, %v927_v7  ;;  %v993_v26 = vrot.slane %v970_v12, 2  ;;  %v3202_v27 = vunpack.c.l.bf16 %v2382_v51 }
  0x41   : > { %v823_v28 = vadd.f32 %v800_v63, %v758_v13  ;;  %v930_v29 = vsel %vm674_vm1, %v927_v7, %v929_v19  ;;  %v995_v32 = vrot.slane %v3194_v10, 2  ;;  %v3211_v33 = vunpack.c.h.bf16 %v2382_v51 }
  0x42   : > { %v887_v37 = vadd.f32 %v863_v52, %v822_v57  ;;  %v994_v16 = vsel %vm987_vm2, %v991_v46, %v993_v26  ;;  %v2274_v31 = vunpack.c.l.bf16 %v3197_v22  ;;  %v2275_v14 = vunpack.c.h.bf16 %v3197_v22 }
  0x43   : > { %v888_v23 = vadd.f32 %v865_v55, %v823_v28  ;;  %v996_v9 = vsel %vm987_vm2, %v993_v26, %v995_v32  ;;  %v2291_v42 = vunpack.c.h.bf16 %v3090_v18  ;;  %v2294_v43 = vunpack.c.l.bf16 %v3205_v11 }
  0x44   : > { %v952_v44 = vadd.f32 %v928_v2, %v887_v37  ;;  %v2310_v48 = vunpack.c.l.bf16 %v2393_v36  ;;  %v2311_v49 = vunpack.c.h.bf16 %v2393_v36  ;;  %v606_v17 = vmul.f32 %v3092_v41, %v2947_v3 }
  0x45   : > { %v953_v46 = vadd.f32 %v930_v29, %v888_v23  ;;  %v607_v53 = vmul.f32 %v3100_v50, %v2947_v3  ;;  %v3229_v54 = vmul.f32 %v2274_v31, %v2952_v4  ;;  %v3232_v56 = vmul.f32 %v2275_v14, %v2952_v4 }
  0x46   : > { %v1018_v59 = vadd.f32 %v994_v16, %v952_v44  ;;  %v641_v60 = vadd.f32 %v3120_v8, %v606_v17  ;;  %v659_v63 = vmul.f32 %v3100_v50, %v2986_v20  ;;  %v3239_v51 = vmul.f32 %v3202_v27, %v2986_v20 }
  0x47   : > { %v1019_v41 = vadd.f32 %v996_v9, %v953_v46  ;;  %v642_v62 = vadd.f32 %v3123_v15, %v607_v53  ;;  %v724_v52 = vmul.f32 %v2290_v61, %v2992_v25  ;;  %v725_v7 = vmul.f32 %v2291_v42, %v2992_v25 }
  0x48   : > { %v1034_v12 = vmul.f32 %v3113_v0, %v1018_v59  ;;  %v684_v13 = vrot.slane %v659_v63, 1  ;;  %v686_v8 = vrot.slane %v3239_v51, 1  ;;  %v750_v50 = vmul.f32 %v2310_v48, %v3001_v30  ;;  %v3291_v63 = vld [vmem:[%s2942_s17 + $0x20] sm:$0xff]  }
  0x49   : > { %v1035_v55 = vmul.f32 %v3113_v0, %v1019_v41  ;;  %v751_v22 = vmul.f32 %v2311_v49, %v3001_v30  ;;  %v777_v57 = vmul.f32 %v2291_v42, %v3014_v35  ;;  %v3255_v18 = vmul.f32 %v2294_v43, %v3014_v35  ;;  %v2383_v49 = vld [vmem:[%s2937_s29 + $0x20] sm:$0xff]  }
  0x4a   : > { %v1050_v61 = vadd.f32 %v3130_v21, %v1034_v12  ;;  %v685_v15 = vsel %vm674_vm1, %v682_v34, %v684_v13  ;;  %v687_v2 = vsel %vm674_vm1, %v684_v13, %v686_v8  ;;  %v842_v26 = vmul.f32 %v3202_v27, %v3026_v40  ;;  %v3309_v13 = vld [vmem:[%s2957_s15 + $0x20] sm:$0xff]   ;;  %s2238_s15 = sshll.u32 %s2931_s19, 8 }
  0x4b   : > { %v1051_v28 = vadd.f32 %v3130_v21, %v1035_v55  ;;  %v707_v29 = vadd.f32 %v685_v15, %v641_v60  ;;  %v708_v36 = vadd.f32 %v687_v2, %v642_v62  ;;  %v801_v37 = vrot.slane %v777_v57, 1  ;;  %s3536_s19 = scalar_lea.vmem %s3784_s5, %s2238_s15  ;;  %s2800_s15 = smov [#allocation2]  }
  0x4c   : > { %v803_v16 = vrot.slane %v3255_v18, 1  ;;  %v3270_v24 = vmul.f32 %v3211_v33, %v3026_v40  ;;  %v866_v23 = vrot.slane %v842_v26, 1  ;;  %v907_v34 = vmul.f32 %v2274_v31, %v3033_v45  ;;  %s2738_s30 = sshll.u32 %s2800_s15, 4  ;;  %s2739_s30 = int_to_ptr.vmem [resolvable:$false] %s2738_s30 }
  0x4d   : > { %v1058_v9 = vpack.c.bf16 %v1051_v28, %v1050_v61  ;;  %v733_v42 = vadd.f32 %v724_v52, %v707_v29  ;;  %v734_v44 = vadd.f32 %v725_v7, %v708_v36  ;;  %v802_v48 = vsel %vm674_vm1, %v799_v38, %v801_v37  ;;  %s2740_s20 = scalar_lea.vmem %s2739_s30, 8192 }
  0x4e   : > { %v804_v17 = vsel %vm674_vm1, %v801_v37, %v803_v16  ;;  %v867_v46 = vsel %vm674_vm1, %v864_v5, %v866_v23  ;;  %v868_v53 = vrot.slane %v3270_v24, 1  ;;  %v3285_v31 = vmul.f32 %v2275_v14, %v3033_v45 }
  0x4f   : > { %2453 = vmatmul.mubr.msk.bf16.gmra.mrb[4].mxu0 %vm1078_vm3, %v1058_v9  ;;  %v759_v39 = vadd.f32 %v750_v50, %v733_v42  ;;  %v760_v38 = vadd.f32 %v751_v22, %v734_v44  ;;  %v931_v59 = vrot.slane %v907_v34, 1  ;;  %v972_v60 = vmul.f32 %v3202_v27, %v3059_v58  ;;  %v2394_v50 = vld [vmem:[%s2962_s10 + $0x18] sm:$0xff]  }
  0x50   : > { %2456 = vmatprep.mubr.msk.bf16.mxu0 %vm2799_vm0, %v2798_v1  ;;  %v869_v47 = vsel %vm674_vm1, %v866_v23, %v868_v53  ;;  %v933_v5 = vrot.slane %v3285_v31, 1  ;;  %v3301_v14 = vmul.f32 %v3211_v33, %v3059_v58  ;;  %v3303_v41 = vunpack.c.l.bf16 %v2383_v49 }
  0x51   : > { %v824_v62 = vadd.f32 %v802_v48, %v759_v39  ;;  %v825_v52 = vadd.f32 %v804_v17, %v760_v38  ;;  %v932_v7 = vsel %vm674_vm1, %v929_v19, %v931_v59  ;;  %v997_v12 = vrot.slane %v972_v60, 2 }
  0x52   : > { %v934_v55 = vsel %vm674_vm1, %v931_v59, %v933_v5  ;;  %v999_v22 = vrot.slane %v3301_v14, 2  ;;  %v3316_v57 = vunpack.c.h.bf16 %v2383_v49  ;;  %v2278_v61 = vunpack.c.l.bf16 %v3291_v63 }
  0x53   : > { %v889_v15 = vadd.f32 %v867_v46, %v824_v62  ;;  %v890_v2 = vadd.f32 %v869_v47, %v825_v52  ;;  %v998_v6 = vsel %vm987_vm2, %v995_v32, %v997_v12  ;;  %v2279_v19 = vunpack.c.h.bf16 %v3291_v63 }
  0x54   : > { %v1000_v26 = vsel %vm987_vm2, %v997_v12, %v999_v22  ;;  %v2295_v28 = vunpack.c.h.bf16 %v3205_v11  ;;  %v2298_v29 = vunpack.c.l.bf16 %v3309_v13  ;;  %v2314_v36 = vunpack.c.l.bf16 %v2394_v50 }
  0x55   : > { %v954_v37 = vadd.f32 %v932_v7, %v889_v15  ;;  %v955_v23 = vadd.f32 %v934_v55, %v890_v2  ;;  %v2315_v34 = vunpack.c.h.bf16 %v2394_v50  ;;  %v608_v9 = vmul.f32 %v3202_v27, %v2947_v3 }
  0x56   : > { %v609_v10 = vmul.f32 %v3211_v33, %v2947_v3  ;;  %v3333_v32 = vmul.f32 %v2278_v61, %v2952_v4  ;;  %v661_v42 = vmul.f32 %v3211_v33, %v2986_v20  ;;  %v3339_v44 = vmul.f32 %v3303_v41, %v2986_v20 }
  0x57   : > { %v1020_v48 = vadd.f32 %v998_v6, %v954_v37  ;;  %v1021_v49 = vadd.f32 %v1000_v26, %v955_v23  ;;  %v643_v17 = vadd.f32 %v3229_v54, %v608_v9  ;;  %v663_v27 = vmul.f32 %v3316_v57, %v2986_v20 }
  0x58   : > { %v644_v46 = vadd.f32 %v3232_v56, %v609_v10  ;;  %v688_v39 = vrot.slane %v661_v42, 1  ;;  %v690_v4 = vrot.slane %v3339_v44, 1  ;;  %v726_v33 = vmul.f32 %v2294_v43, %v2992_v25  ;;  %v523_v10 = vld [vmem:[%s2937_s29 + $0x28] sm:$0xf]  ;;  %s3728_s29 = scalar_lea.hbm %s3791_s12, %s2239_s28 }
  0x59   : > { %v1036_v38 = vmul.f32 %v3113_v0, %v1020_v48  ;;  %v1037_v59 = vmul.f32 %v3113_v0, %v1021_v49  ;;  %v692_v60 = vrot.slane %v663_v27, 1  ;;  %v727_v63 = vmul.f32 %v2295_v28, %v2992_v25  ;;  %v545_v42 = vld [vmem:[%s2942_s17 + $0x28] sm:$0xf]  ;;  %s3521_s17 = scalar_lea.vmem %s3783_s4, %s2237_s0 }
  0x5a   : > { %v689_v20 = vsel %vm674_vm1, %v686_v8, %v688_v39  ;;  %v691_v54 = vsel %vm674_vm1, %v688_v39, %v690_v4  ;;  %v752_v56 = vmul.f32 %v2314_v36, %v3001_v30  ;;  %v753_v47 = vmul.f32 %v2315_v34, %v3001_v30  ;;  %v585_v39 = vld [vmem:[%s2962_s10 + $0x20] sm:$0xf]  ;;  %s479_s10 = sand.u32 1, %s2788_s22  }
  0x5b   : > { %v1052_v11 = vadd.f32 %v3130_v21, %v1036_v38  ;;  %v1053_v43 = vadd.f32 %v3130_v21, %v1037_v59  ;;  %v709_v62 = vadd.f32 %v689_v20, %v643_v17  ;;  %v710_v52 = vadd.f32 %v691_v54, %v644_v46  ;;  %s3549_s18 = sshll.u32 %s479_s10, 8  ;;  %s3738_s25 = scalar_lea.sflag [#allocation3], %s479_s10 }
  0x5c   : > { %v779_v7 = vmul.f32 %v2295_v28, %v3014_v35  ;;  %v3364_v51 = vmul.f32 %v2298_v29, %v3014_v35  ;;  %v844_v8 = vmul.f32 %v3303_v41, %v3026_v40  ;;  %v3370_v12 = vmul.f32 %v3316_v57, %v3026_v40  ;;  %s3567_s26 = scalar_lea.vmem [#allocation2], %s3549_s18 }
  0x5d   : > { %v1059_v50 = vpack.c.bf16 %v1053_v43, %v1052_v11  ;;  %v735_v55 = vadd.f32 %v726_v33, %v709_v62  ;;  %v736_v15 = vadd.f32 %v727_v63, %v710_v52  ;;  %v909_v2 = vmul.f32 %v2278_v61, %v3033_v45  ;;  %s2002_s16 = sshll.u32 %s3567_s26, 4  ;;  %s3730_s16 = int_to_ptr.vmem [resolvable:$true] %s2002_s16 }
  0x5e   : > { %v805_v6 = vrot.slane %v779_v7, 1  ;;  %v807_v26 = vrot.slane %v3364_v51, 1  ;;  %v870_v28 = vrot.slane %v844_v8, 1  ;;  %v872_v36 = vrot.slane %v3370_v12, 1  ;;  %p2741_p0 = scmp.lt.s32.totalorder %s3730_s16, %s2739_s30 }
  0x5f   : > { %2457 = vmatmul.mubr.msk.bf16.gmra.mrb[8].mxu0 %vm1078_vm3, %v1059_v50  ;;  %v761_v37 = vadd.f32 %v752_v56, %v735_v55  ;;  %v762_v23 = vadd.f32 %v753_v47, %v736_v15  ;;  %v910_v34 = vmul.f32 %v2279_v19, %v3033_v45  ;;  %v935_v9 = vrot.slane %v909_v2, 1 }
  0x60   : > { %2460 = vmatprep.mubr.msk.bf16.mxu0 %vm2799_vm0, %v2798_v1  ;;  %v806_v61 = vsel %vm674_vm1, %v803_v16, %v805_v6  ;;  %v808_v44 = vsel %vm674_vm1, %v805_v6, %v807_v26  ;;  %v871_v48 = vsel %vm674_vm1, %v868_v53, %v870_v28  ;;  %v873_v49 = vsel %vm674_vm1, %v870_v28, %v872_v36 }
  0x61   : > { %v826_v17 = vadd.f32 %v806_v61, %v761_v37  ;;  %v827_v19 = vadd.f32 %v808_v44, %v762_v23  ;;  %v936_v27 = vsel %vm674_vm1, %v933_v5, %v935_v9  ;;  %v937_v46 = vrot.slane %v910_v34, 1 }
  0x62   : > { %v974_v18 = vmul.f32 %v3303_v41, %v3059_v58  ;;  %v975_v16 = vmul.f32 %v3316_v57, %v3059_v58  ;;  %v534_v33 = vunpack.c.l.bf16 %v523_v10  ;;  %v556_v24 = vunpack.c.l.bf16 %v545_v42 }
  0x63   : > { %v891_v38 = vadd.f32 %v871_v48, %v826_v17  ;;  %v892_v53 = vadd.f32 %v873_v49, %v827_v19  ;;  %v938_v59 = vsel %vm674_vm1, %v935_v9, %v937_v46  ;;  %v2299_v63 = vunpack.c.h.bf16 %v3309_v13 }
  0x64   : > { %v1001_v20 = vrot.slane %v974_v18, 2  ;;  %v1003_v31 = vrot.slane %v975_v16, 2  ;;  %v594_v54 = vunpack.c.l.bf16 %v585_v39  ;;  %v610_v5 = vmul.f32 %v3303_v41, %v2947_v3 }
  0x65   : > { %v956_v56 = vadd.f32 %v936_v27, %v891_v38  ;;  %v957_v47 = vadd.f32 %v938_v59, %v892_v53  ;;  %v693_v11 = vsel %vm674_vm1, %v690_v4, %v692_v60  ;;  %v728_v52 = vmul.f32 %v2298_v29, %v2992_v25 }
  0x66   : > { %v1002_v57 = vsel %vm987_vm2, %v999_v22, %v1001_v20  ;;  %v1004_v43 = vsel %vm987_vm2, %v1001_v20, %v1003_v31  ;;  %v645_v62 = vadd.f32 %v3333_v32, %v610_v5  ;;  %v781_v3 = vmul.f32 %v2299_v63, %v3014_v35 }
  0x67   : > { %v1022_v7 = vadd.f32 %v1002_v57, %v956_v56  ;;  %v1023_v51 = vadd.f32 %v1004_v43, %v957_v47  ;;  %v846_v41 = vmul.f32 %v3026_v40, %v534_v33  ;;  %v754_v4 = vmul.f32 %v3001_v30, %v594_v54 }
  0x68   : > { %v711_v8 = vadd.f32 %v693_v11, %v645_v62  ;;  %v911_v14 = vmul.f32 %v3033_v45, %v556_v24  ;;  %v976_v22 = vmul.f32 %v3059_v58, %v534_v33  ;;  %v809_v12 = vrot.slane %v781_v3, 1 }
  0x69   : > { %v1038_v60 = vmul.f32 %v3113_v0, %v1022_v7  ;;  %v1039_v32 = vmul.f32 %v3113_v0, %v1023_v51  ;;  %v874_v13 = vrot.slane %v846_v41, 1  ;;  %v2590_v41 = vld [vmem:[%s3785_s6 + $0x30] sm:$0xff]  }
  0x6a   : > { %v737_v25 = vadd.f32 %v728_v52, %v711_v8  ;;  %v810_v40 = vsel %vm674_vm1, %v807_v26, %v809_v12  ;;  %v939_v50 = vrot.slane %v911_v14, 1  ;;  %v1005_v15 = vrot.slane %v976_v22, 2  ;;  %v2594_v8 = vld [vmem:[%s3785_s6] sm:$0xff]  }
  0x6b   : > { %v1054_v29 = vadd.f32 %v3130_v21, %v1038_v60  ;;  %v1055_v35 = vadd.f32 %v3130_v21, %v1039_v32  ;;  %v875_v45 = vsel %vm674_vm1, %v872_v36, %v874_v13  ;;  %v1180_v36 = vld [vmem:[%s3790_s11] sm:$0x1] }
  0x6c   : > { %v763_v55 = vadd.f32 %v754_v4, %v737_v25  ;;  %v940_v2 = vsel %vm674_vm1, %v937_v46, %v939_v50  ;;  %v1006_v28 = vsel %vm987_vm2, %v1003_v31, %v1005_v15  ;;  %v1199_v10 = vsel %vm1197_vm4, %v1180_v36, 0  ;;  %v2591_v36 = vld [vmem:[%s3785_s6 + $0x38] sm:$0xff]  }
  0x6d   : > { %v1060_v30 = vpack.c.bf16 %v1055_v35, %v1054_v29  ;;  %2469 = vmatpush3.bf16.msra.mxu1 %v1199_v10  ;;  %v2596_v10 = vld [vmem:[%s3785_s6 + $0x8] sm:$0xff]  }
  0x6e   : > { %v828_v58 = vadd.f32 %v810_v40, %v763_v55 }
  0x6f   : > { %2461 = vmatmul.mubr.msk.bf16.gmra.mrb[12].mxu0 %vm1078_vm3, %v1060_v30 }
  0x70   : > { %2464 = vmatprep.mubr.msk.bf16.mxu0 %vm2799_vm0, %v2798_v1  ;;  %v893_v6 = vadd.f32 %v875_v45, %v828_v58 }
  0x72   : > { %v958_v37 = vadd.f32 %v940_v2, %v893_v6 }
  0x74   : > { %v1024_v23 = vadd.f32 %v1006_v28, %v958_v37 }
  0x76   : > { %v1040_v26 = vmul.f32 %v3113_v0, %v1024_v23 }
  0x78   : > { %v1056_v34 = vadd.f32 %v3130_v21, %v1040_v26 }
  0x7a   : > { %v1061_v9 = vpack.c.bf16 %v1056_v34, %v1056_v34 }
  0x7c   : > { %2465 = vmatmul.mubr.msk.bf16.gmra.mrb[16].mxu0 %vm1078_vm3, %v1061_v9 }
  0x7d   : > { %2500 = vmatprep.mubr.msk.bf16.mxu0 %vm1390_vm6, %v2594_v8 }
 0x110   : > { %v1128_v42 = vpop.f32.mrb[0].mxu0 }
 0x111   : > { %v2450_v61 = vpop.f32.mrb[1].mxu0  ;;  %v1166_v48 = vmax.f32 %v1128_v42, 0.0  ;;  %v2592_v42 = vld [vmem:[%s3785_s6 + $0x40] sm:$0xff]  }
 0x112   : > { %v1131_v44 = vpop.f32.mrb[2].mxu0  ;;  %v2598_v61 = vld [vmem:[%s3785_s6 + $0x10] sm:$0xff]  }
 0x113   : > { %v1167_v49 = vmax.f32 %v1131_v44, 0.0  ;;  %v2451_v17 = vpop.f32.mrb[3].mxu0  ;;  %v2593_v44 = vld [vmem:[%s3785_s6 + $0x48] sm:$0xff]  }
 0x114   : > { %v2602_v17 = vld [vmem:[%s3785_s6 + $0x20] sm:$0xff]  }
 0x115   : > { %v1175_v0 = vpack.c.bf16 %v1167_v49, %v1166_v48  ;;  %v2600_v48 = vld [vmem:[%s3785_s6 + $0x18] sm:$0xff]   ;;  %v2595_v49 = vld [vmem:[%s3785_s6 + $0x50] sm:$0xff]  }
 0x117   : > { %2471 = vmatmul.mubr.msk.bf16.vlgmr.msra.gmra.mrb[0].mxu1 %vm1181_vm5, %v1175_v0  ;;  %v2597_v0 = vld [vmem:[%s3785_s6 + $0x58] sm:$0xff]  }
 0x118   : > { %2474 = vmatprep.mubr.msk.bf16.mxu1 %vm2799_vm0, %v2798_v1 }
 0x122   : > { %v1136_v21 = vpop.f32.mrb[4].mxu0 }
 0x123   : > { %v2454_v19 = vpop.f32.mrb[5].mxu0  ;;  %v1168_v46 = vmax.f32 %v1136_v21, 0.0  ;;  %v2604_v21 = vld [vmem:[%s3785_s6 + $0x28] sm:$0xff]  }
 0x124   : > { %v1139_v27 = vpop.f32.mrb[6].mxu0  ;;  %v2599_v19 = vld [vmem:[%s3785_s6 + $0x60] sm:$0xff]  }
 0x125   : > { %v1169_v39 = vmax.f32 %v1139_v27, 0.0  ;;  %v2455_v18 = vpop.f32.mrb[7].mxu0  ;;  %v2601_v27 = vld [vmem:[%s3785_s6 + $0x68] sm:$0xff]  }
 0x127   : > { %v1176_v16 = vpack.c.bf16 %v1169_v39, %v1168_v46  ;;  %v2603_v46 = vld [vmem:[%s3785_s6 + $0x70] sm:$0xff]   ;;  %v2605_v39 = vld [vmem:[%s3785_s6 + $0x78] sm:$0xff]  }
 0x129   : > { %2475 = vmatmul.mubr.msk.bf16.gmra.mrb[4].mxu1 %vm1181_vm5, %v1176_v16 }
 0x12a   : > { %2478 = vmatprep.mubr.msk.bf16.mxu1 %vm2799_vm0, %v2798_v1 }
 0x132   : > { %v1144_v33 = vpop.f32.mrb[8].mxu0 }
 0x133   : > { %v2458_v24 = vpop.f32.mrb[9].mxu0  ;;  %v1170_v53 = vmax.f32 %v1144_v33, 0.0 }
 0x134   : > { %v1147_v38 = vpop.f32.mrb[10].mxu0 }
 0x135   : > { %v1171_v59 = vmax.f32 %v1147_v38, 0.0  ;;  %v2459_v63 = vpop.f32.mrb[11].mxu0 }
 0x137   : > { %v1177_v20 = vpack.c.bf16 %v1171_v59, %v1170_v53 }
 0x139   : > { %2479 = vmatmul.mubr.msk.bf16.gmra.mrb[8].mxu1 %vm1181_vm5, %v1177_v20 }
 0x13a   : > { %2482 = vmatprep.mubr.msk.bf16.mxu1 %vm2799_vm0, %v2798_v1 }
 0x142   : > { %v1152_v31 = vpop.f32.mrb[12].mxu0 }
 0x143   : > { %v2462_v54 = vpop.f32.mrb[13].mxu0  ;;  %v1172_v56 = vmax.f32 %v1152_v31, 0.0 }
 0x144   : > { %v1155_v5 = vpop.f32.mrb[14].mxu0 }
 0x145   : > { %v1173_v47 = vmax.f32 %v1155_v5, 0.0  ;;  %v2463_v11 = vpop.f32.mrb[15].mxu0 }
 0x147   : > { %v1178_v57 = vpack.c.bf16 %v1173_v47, %v1172_v56 }
 0x149   : > { %2483 = vmatmul.mubr.msk.bf16.gmra.mrb[12].mxu1 %vm1181_vm5, %v1178_v57 }
 0x14a   : > { %2486 = vmatprep.mubr.msk.bf16.mxu1 %vm2799_vm0, %v2798_v1 }
 0x14f   : > { %v1160_v43 = vpop.f32.mrb[16].mxu0 }
 0x150   : > { %v1174_v62 = vmax.f32 %v1160_v43, 0.0  ;;  %v2466_v52 = vpop.f32.mrb[17].mxu0 }
 0x151   : > { %v1163_v7 = vpop.f32.mrb[18].mxu0 }
 0x152   : > { %v1179_v51 = vpack.c.bf16 %v1174_v62, %v1174_v62  ;;  %v2467_v3 = vpop.f32.mrb[19].mxu0 }
 0x154   : > { %2487 = vmatmul.mubr.msk.bf16.gmra.mrb[16].mxu1 %vm1181_vm5, %v1179_v51 }
 0x155   : > { %2512 = vmatprep.mubr.msk.bf16.mxu1 %vm1390_vm6, %v2590_v41 }
 0x1ea   : > { %v1235_v1 = vpop.f32.mrb[0].mxu1 }
 0x1eb   : > { %v2472_v4 = vpop.f32.mrb[1].mxu1 }
 0x1ec   : > { %v1238_v14 = vpop.f32.mrb[2].mxu1 }
 0x1ed   : > { %v1305_v22 = vpack.c.bf16 %v1238_v14, %v1235_v1  ;;  %v2473_v60 = vpop.f32.mrb[3].mxu1 }
 0x1ef   : > { %2490 = vmatprep.subr.bf16.mxu0 %v1305_v22  ;;  %2532 = vmatprep.subr.bf16.mxu1 %v1305_v22 }
 0x1f0   : > { %2491 = vmatpush3.bf16.msra.mxu0 %v1305_v22  ;;  %2537 = vmatpush3.bf16.msra.mxu1 %v1305_v22 }
 0x1fc   : > { %v1243_v32 = vpop.f32.mrb[4].mxu1 }
 0x1fd   : > { %v2476_v12 = vpop.f32.mrb[5].mxu1 }
 0x1fe   : > { %v1246_v13 = vpop.f32.mrb[6].mxu1 }
 0x1ff   : > { %v1306_v25 = vpack.c.bf16 %v1246_v13, %v1243_v32  ;;  %v2477_v29 = vpop.f32.mrb[7].mxu1 }
 0x201   : > { %2492 = vmatprep.subr.bf16.mxu0 %v1306_v25  ;;  %2533 = vmatprep.subr.bf16.mxu1 %v1306_v25 }
 0x202   : > { %2493 = vmatpush3.bf16.msra.mxu0 %v1306_v25  ;;  %2538 = vmatpush3.bf16.msra.mxu1 %v1306_v25 }
 0x20c   : > { %v1251_v35 = vpop.f32.mrb[8].mxu1 }
 0x20d   : > { %v2480_v40 = vpop.f32.mrb[9].mxu1 }
 0x20e   : > { %v1254_v50 = vpop.f32.mrb[10].mxu1 }
 0x20f   : > { %v1307_v55 = vpack.c.bf16 %v1254_v50, %v1251_v35  ;;  %v2481_v30 = vpop.f32.mrb[11].mxu1 }
 0x211   : > { %2494 = vmatprep.subr.bf16.mxu0 %v1307_v55  ;;  %2534 = vmatprep.subr.bf16.mxu1 %v1307_v55 }
 0x212   : > { %2495 = vmatpush3.bf16.msra.mxu0 %v1307_v55  ;;  %2539 = vmatpush3.bf16.msra.mxu1 %v1307_v55 }
 0x21c   : > { %v1259_v45 = vpop.f32.mrb[12].mxu1 }
 0x21d   : > { %v2484_v15 = vpop.f32.mrb[13].mxu1 }
 0x21e   : > { %v1262_v58 = vpop.f32.mrb[14].mxu1 }
 0x21f   : > { %v1308_v2 = vpack.c.bf16 %v1262_v58, %v1259_v45  ;;  %v2485_v6 = vpop.f32.mrb[15].mxu1 }
 0x221   : > { %2496 = vmatprep.subr.bf16.mxu0 %v1308_v2  ;;  %2535 = vmatprep.subr.bf16.mxu1 %v1308_v2 }
 0x222   : > { %2497 = vmatpush3.bf16.msra.mxu0 %v1308_v2  ;;  %2540 = vmatpush3.bf16.msra.mxu1 %v1308_v2 }
 0x227   : > { %v1267_v28 = vpop.f32.mrb[16].mxu1 }
 0x228   : > { %v1309_v37 = vpack.c.bf16 %v1267_v28, %v1267_v28  ;;  %v2488_v23 = vpop.f32.mrb[17].mxu1 }
 0x229   : > { %v1270_v26 = vpop.f32.mrb[18].mxu1 }
 0x22a   : > { %v2489_v34 = vpop.f32.mrb[19].mxu1  ;;  %2542 = vmatprep.subr.msk.bf16.mxu0 %vm1439_vm7, %v1309_v37  ;;  %2543 = vmatprep.subr.msk.bf16.mxu1 %vm1439_vm7, %v1309_v37  ;;  %v1441_v9 = vsel %vm1439_vm7, %v1309_v37, 0 }
 0x22b   : > { %2499 = vmatpush3.bf16.msra.mxu0 %v1441_v9  ;;  %2541 = vmatpush3.bf16.msra.mxu1 %v1441_v9 }
 0x22e   : > { %2513 = vmatmul.mubr.msk.bf16.vlgmr.msra.gmra.mrb[20].mxu1 %vm1390_vm6, %v2591_v36  ;;  %2501 = vmatmul.mubr.msk.bf16.vlgmr.msra.gmra.mrb[20].mxu0 %vm1390_vm6, %v2596_v10  ;;  %v2401_v10 = vld [vmem:[%s3521_s17 + $0x38] sm:$0xff]  }
 0x22f   : > { %2516 = vmatprep.mubr.msk.bf16.mxu1 %vm1390_vm6, %v2592_v42  ;;  %2504 = vmatprep.mubr.msk.bf16.mxu0 %vm1390_vm6, %v2598_v61  ;;  %v2400_v42 = vld [vmem:[%s3521_s17 + $0x30] sm:$0xff]  }
 0x236   : > { %2517 = vmatmul.mubr.msk.bf16.gmra.mrb[24].mxu1 %vm1390_vm6, %v2593_v44  ;;  %2505 = vmatmul.mubr.msk.bf16.gmra.mrb[24].mxu0 %vm1390_vm6, %v2600_v48 }
 0x237   : > { %2520 = vmatprep.mubr.msk.bf16.mxu1 %vm1390_vm6, %v2595_v49  ;;  %2508 = vmatprep.mubr.msk.bf16.mxu0 %vm1390_vm6, %v2602_v17 }
 0x23e   : > { %2521 = vmatmul.mubr.msk.bf16.gmra.mrb[28].mxu1 %vm1390_vm6, %v2597_v0  ;;  %2509 = vmatmul.mubr.msk.bf16.gmra.mrb[28].mxu0 %vm1390_vm6, %v2604_v21  ;;  %v2346_v21 = vunpack.c.l.bf16 %v2401_v10 }
 0x23f   : > { %2524 = vmatprep.mubr.msk.bf16.mxu1 %vm1390_vm6, %v2599_v19  ;;  %v2342_v19 = vunpack.c.l.bf16 %v2400_v42 }
 0x246   : > { %2525 = vmatmul.mubr.msk.bf16.gmra.mrb[32].mxu1 %vm1390_vm6, %v2601_v27  ;;  %v3539_v27 = vld [vmem:[%s3521_s17 + $0x48] sm:$0xff]  }
 0x247   : > { %2528 = vmatprep.mubr.msk.bf16.mxu1 %vm1390_vm6, %v2603_v46 }
 0x24e   : > { %2529 = vmatmul.mubr.msk.bf16.gmra.mrb[36].mxu1 %vm1390_vm6, %v2605_v39  ;;  %v3542_v39 = vld [vmem:[%s3521_s17 + $0x40] sm:$0xff]  }
 0x301   : > { %v2514_v18 = vpop.f32.mrb[20].mxu1  ;;  %v2502_v16 = vpop.f32.mrb[20].mxu0 }
 0x302   : > { %v2214_v33 = vmul.f32 -1.442695, %v2514_v18  ;;  %v1525_v24 = vpop.f32.mrb[21].mxu1  ;;  %v1477_v38 = vpop.f32.mrb[21].mxu0  ;;  %v2202_v54 = vmul.f32 -1.442695, %v2502_v16  ;;  %v2347_v16 = vunpack.c.h.bf16 %v2401_v10 }
 0x303   : > { %v2212_v53 = vmul.f32 -1.442695, %v1525_v24  ;;  %v2515_v59 = vpop.f32.mrb[22].mxu1  ;;  %v2503_v63 = vpop.f32.mrb[22].mxu0  ;;  %v2200_v47 = vmul.f32 -1.442695, %v1477_v38 }
 0x304   : > { %2606 = vpow2.f32 %v2214_v33  ;;  %v2215_v20 = vmul.f32 -1.442695, %v2515_v59  ;;  %v1528_v31 = vpop.f32.mrb[23].mxu1  ;;  %v1480_v5 = vpop.f32.mrb[23].mxu0  ;;  %v2203_v11 = vmul.f32 -1.442695, %v2503_v63  ;;  %v2343_v63 = vunpack.c.h.bf16 %v2400_v42 }
 0x305   : > { %2608 = vpow2.f32 %v2212_v53  ;;  %v2213_v56 = vmul.f32 -1.442695, %v1528_v31  ;;  %v2201_v57 = vmul.f32 -1.442695, %v1480_v5  ;;  %v3545_v24 = vld [vmem:[%s3521_s17 + $0x8] sm:$0xff]   ;;  %v3552_v31 = vld [vmem:[%s3521_s17] sm:$0xff]  }
 0x306   : > { %2610 = vpow2.f32 %v2215_v20  ;;  %v1796_v42 = vld [vmem:[%s3536_s19] sm:$0xff] }
 0x307   : > { %2612 = vpow2.f32 %v2213_v56 }
 0x308   : > { %2614 = vpow2.f32 %v2202_v54 }
 0x309   : > { %v2518_v43 = vpop.f32.mrb[24].mxu1  ;;  %2616 = vpow2.f32 %v2200_v47  ;;  %v2506_v62 = vpop.f32.mrb[24].mxu0  ;;  %v1810_v47 = vld [vmem:[%s3536_s19 + $0x70] sm:$0xff] }
 0x30a   : > { %v2218_v52 = vmul.f32 -1.442695, %v2518_v43  ;;  %v1541_v7 = vpop.f32.mrb[25].mxu1  ;;  %2618 = vpow2.f32 %v2203_v11  ;;  %v3509_v51 = vpop.f32.mrb[25].mxu0  ;;  %v2206_v14 = vmul.f32 -1.442695, %v2506_v62  ;;  %v2354_v11 = vunpack.c.l.bf16 %v3539_v27 }
 0x30b   : > { %v2216_v3 = vmul.f32 -1.442695, %v1541_v7  ;;  %v2519_v41 = vpop.f32.mrb[26].mxu1  ;;  %2620 = vpow2.f32 %v2201_v57  ;;  %v3511_v8 = vpop.f32.mrb[26].mxu0  ;;  %v2350_v57 = vunpack.c.l.bf16 %v3542_v39 }
 0x30c   : > { %2622 = vpow2.f32 %v2218_v52  ;;  %v2219_v1 = vmul.f32 -1.442695, %v2519_v41  ;;  %v1544_v4 = vpop.f32.mrb[27].mxu1  ;;  %v3513_v22 = vpop.f32.mrb[27].mxu0  ;;  %v2322_v41 = vunpack.c.l.bf16 %v3545_v24 }
 0x30d   : > { %2624 = vpow2.f32 %v2216_v3  ;;  %v2217_v60 = vmul.f32 -1.442695, %v1544_v4  ;;  %v1808_v3 = vld [vmem:[%s3536_s19 + $0x60] sm:$0xff] }
 0x30e   : > { %v2607_v32 = vpop.eup %2606  ;;  %2626 = vpow2.f32 %v2219_v1 }
 0x30f   : > { %v2609_v12 = vpop.eup %2608  ;;  %v1714_v13 = vadd.f32 1.0, %v2607_v32  ;;  %2628 = vpow2.f32 %v2217_v60  ;;  %v1811_v32 = vld [vmem:[%s3536_s19 + $0x78] sm:$0xff] }
 0x310   : > { %v2611_v25 = vpop.eup %2610  ;;  %v1712_v29 = vadd.f32 1.0, %v2609_v12  ;;  %2630 = vpow2.f32 %v2206_v14  ;;  %v2318_v12 = vunpack.c.l.bf16 %v3552_v31 }
 0x311   : > { %v2613_v35 = vpop.eup %2612  ;;  %2632 = vrcp.f32 %v1714_v13  ;;  %v1715_v40 = vadd.f32 1.0, %v2611_v25  ;;  %v2522_v50 = vpop.f32.mrb[28].mxu1 }
 0x312   : > { %v3516_v55 = vpop.f32.mrb[28].mxu0  ;;  %v2615_v30 = vpop.eup %2614  ;;  %2634 = vrcp.f32 %v1712_v29  ;;  %v1713_v45 = vadd.f32 1.0, %v2613_v35  ;;  %v2222_v15 = vmul.f32 -1.442695, %v2522_v50 }
 0x313   : > { %v1557_v58 = vpop.f32.mrb[29].mxu1  ;;  %v2617_v2 = vpop.eup %2616  ;;  %2636 = vrcp.f32 %v1715_v40  ;;  %v1702_v6 = vadd.f32 1.0, %v2615_v30  ;;  %v1809_v40 = vld [vmem:[%s3536_s19 + $0x68] sm:$0xff] }
 0x314   : > { %v2523_v28 = vpop.f32.mrb[30].mxu1  ;;  %v3523_v37 = vpop.f32.mrb[29].mxu0  ;;  %2638 = vrcp.f32 %v1713_v45  ;;  %v1700_v26 = vadd.f32 1.0, %v2617_v2  ;;  %v2220_v34 = vmul.f32 -1.442695, %v1557_v58  ;;  %v2355_v58 = vunpack.c.h.bf16 %v3539_v27  ;;  %v1798_v2 = vld [vmem:[%s3536_s19 + $0x10] sm:$0xff] }
 0x315   : > { %v2619_v23 = vpop.eup %2618  ;;  %v1560_v9 = vpop.f32.mrb[31].mxu1  ;;  %2640 = vrcp.f32 %v1702_v6  ;;  %v2223_v54 = vmul.f32 -1.442695, %v2523_v28  ;;  %v1814_v27 = vld [vmem:[%s3536_s19 + $0x90] sm:$0xff] }
 0x316   : > { %v2621_v36 = vpop.eup %2620  ;;  %v3528_v61 = vpop.f32.mrb[30].mxu0  ;;  %2642 = vpow2.f32 %v2222_v15  ;;  %v1703_v38 = vadd.f32 1.0, %v2619_v23  ;;  %v2221_v1 = vmul.f32 -1.442695, %v1560_v9 }
 0x317   : > { %v2623_v44 = vpop.eup %2622  ;;  %v3530_v48 = vpop.f32.mrb[31].mxu0  ;;  %2644 = vrcp.f32 %v1700_v26  ;;  %v1701_v43 = vadd.f32 1.0, %v2621_v36  ;;  %v2204_v26 = vmul.f32 -1.442695, %v3509_v51  ;;  %v2351_v36 = vunpack.c.h.bf16 %v3542_v39 }
 0x318   : > { %v2625_v49 = vpop.eup %2624  ;;  %v1718_v17 = vadd.f32 1.0, %v2623_v44  ;;  %2646 = vpow2.f32 %v2220_v34 }
 0x319   : > { %v2627_v0 = vpop.eup %2626  ;;  %v1716_v46 = vadd.f32 1.0, %v2625_v49  ;;  %v2526_v53 = vpop.f32.mrb[32].mxu1 }
 0x31a   : > { %v2629_v18 = vpop.eup %2628  ;;  %2648 = vrcp.f32 %v1718_v17  ;;  %v1719_v33 = vadd.f32 1.0, %v2627_v0  ;;  %v1573_v5 = vpop.f32.mrb[33].mxu1  ;;  %v2226_v50 = vmul.f32 -1.442695, %v2526_v53 }
 0x31b   : > { %v2631_v59 = vpop.eup %2630  ;;  %2650 = vrcp.f32 %v1716_v46  ;;  %v1717_v20 = vadd.f32 1.0, %v2629_v18  ;;  %v2527_v62 = vpop.f32.mrb[34].mxu1  ;;  %v2224_v0 = vmul.f32 -1.442695, %v1573_v5  ;;  %v2323_v18 = vunpack.c.h.bf16 %v3545_v24 }
 0x31c   : > { %v2633_v56 = vpop.eup %2632  ;;  %2652 = vrcp.f32 %v1719_v33  ;;  %v3559_v4 = vpop.f32.mrb[35].mxu1  ;;  %v1706_v13 = vadd.f32 1.0, %v2631_v59  ;;  %v1812_v59 = vld [vmem:[%s3536_s19 + $0x80] sm:$0xff] }
 0x31d   : > { %v2635_v52 = vpop.eup %2634  ;;  %v1906_v7 = vmul.f32 %v2633_v56, %v2346_v21  ;;  %2654 = vrcp.f32 %v1717_v20  ;;  %v3593_v20 = vld [vmem:[%s3521_s17 + $0x18] sm:$0xff]   ;;  %v2225_v39 = vmul.f32 -1.442695, %v3559_v4  ;;  %v2210_v4 = vmul.f32 -1.442695, %v3516_v55 }
 0x31e   : > { %v2637_v14 = vpop.eup %2636  ;;  %v1904_v60 = vmul.f32 %v2635_v52, %v2342_v19  ;;  %2656 = vrcp.f32 %v1703_v38  ;;  %v1815_v56 = vld [vmem:[%s3536_s19 + $0x98] sm:$0xff] }
 0x31f   : > { %v2639_v25 = vpop.eup %2638  ;;  %v1938_v29 = vadd.f32 %v1906_v7, %v1810_v47  ;;  %v1907_v35 = vmul.f32 %v2637_v14, %v2347_v16  ;;  %2658 = vpow2.f32 %v2223_v54  ;;  %v2207_v16 = vmul.f32 -1.442695, %v3511_v8 }
 0x320   : > { %v2641_v30 = vpop.eup %2640  ;;  %v1936_v45 = vadd.f32 %v1904_v60, %v1808_v3  ;;  %v1905_v15 = vmul.f32 %v2639_v25, %v2343_v63  ;;  %2660 = vrcp.f32 %v1701_v43  ;;  %v2227_v54 = vmul.f32 -1.442695, %v2527_v62  ;;  %v1813_v3 = vld [vmem:[%s3536_s19 + $0x88] sm:$0xff]  ;;  %v3604_v62 = vld [vmem:[%s3521_s17 + $0x58] sm:$0xff]  }
 0x321   : > { %v2643_v6 = vpop.eup %2642  ;;  %1970 = vst.msk [vmem:[%s3567_s26 + $0x70] sm:$0xff] %vm1078_vm3, %v1938_v29  ;;  %v1939_v28 = vadd.f32 %v1907_v35, %v1811_v32  ;;  %v1894_v23 = vmul.f32 %v2641_v30, %v2322_v41  ;;  %2662 = vpow2.f32 %v2221_v1  ;;  %v3576_v44 = vpop.f32.mrb[36].mxu1  ;;  %v2319_v47 = vunpack.c.h.bf16 %v3552_v31  ;;  %v1799_v31 = vld [vmem:[%s3536_s19 + $0x18] sm:$0xff]  ;;  %v3614_v32 = vld [vmem:[%s3521_s17 + $0x50] sm:$0xff]  }
 0x322   : > { %v2645_v34 = vpop.eup %2644  ;;  %1968 = vst.msk [vmem:[%s3567_s26 + $0x60] sm:$0xff] %vm1078_vm3, %v1936_v45  ;;  %v1937_v9 = vadd.f32 %v1905_v15, %v1809_v40  ;;  %v1722_v10 = vadd.f32 1.0, %v2643_v6  ;;  %2664 = vrcp.f32 %v1706_v13  ;;  %v3580_v21 = vpop.f32.mrb[37].mxu1  ;;  %v2362_v29 = vunpack.c.l.bf16 %v3604_v62  ;;  %v1797_v40 = vld [vmem:[%s3536_s19 + $0x8] sm:$0xff]  ;;  %v1802_v6 = vld [vmem:[%s3536_s19 + $0x30] sm:$0xff] }
 0x323   : > { %v2647_v49 = vpop.eup %2646  ;;  %1971 = vst.msk [vmem:[%s3567_s26 + $0x78] sm:$0xff] %vm1078_vm3, %v1939_v28  ;;  %v1926_v17 = vadd.f32 %v1894_v23, %v1798_v2  ;;  %v1892_v51 = vmul.f32 %v2645_v34, %v2318_v12  ;;  %2666 = vpow2.f32 %v2226_v50  ;;  %v3587_v33 = vpop.f32.mrb[38].mxu1  ;;  %v2230_v55 = vmul.f32 -1.442695, %v3576_v44 }
 0x324   : > { %v2649_v19 = vpop.eup %2648  ;;  %1969 = vst.msk [vmem:[%s3567_s26 + $0x68] sm:$0xff] %vm1078_vm3, %v1937_v9  ;;  %2668 = vrcp.f32 %v1722_v10  ;;  %v1720_v46 = vadd.f32 1.0, %v2647_v49  ;;  %v3595_v5 = vpop.f32.mrb[39].mxu1  ;;  %v2208_v34 = vmul.f32 -1.442695, %v3523_v37 }
 0x325   : > { %v2651_v38 = vpop.eup %2650  ;;  %v1910_v53 = vmul.f32 %v2649_v19, %v2354_v11  ;;  %1958 = vst.msk [vmem:[%s3567_s26 + $0x10] sm:$0xff] %vm1078_vm3, %v1926_v17  ;;  %v1924_v63 = vadd.f32 %v1892_v51, %v1796_v42  ;;  %2670 = vpow2.f32 %v2204_v26  ;;  %v2205_v11 = vmul.f32 -1.442695, %v3513_v22 }
 0x326   : > { %v2653_v24 = vpop.eup %2652  ;;  %v1908_v8 = vmul.f32 %v2651_v38, %v2350_v57  ;;  %2672 = vrcp.f32 %v1720_v46  ;;  %v2330_v22 = vunpack.c.l.bf16 %v3593_v20  ;;  %v2228_v17 = vmul.f32 -1.442695, %v3580_v21 }
 0x327   : > { %v2655_v43 = vpop.eup %2654  ;;  %v1942_v52 = vadd.f32 %v1910_v53, %v1814_v27  ;;  %v1911_v7 = vmul.f32 %v2653_v24, %v2355_v58  ;;  %1956 = vst.msk [vmem:[%s3567_s26] sm:$0xff] %vm1078_vm3, %v1924_v63  ;;  %2674 = vpow2.f32 %v2224_v0  ;;  %v2358_v58 = vunpack.c.l.bf16 %v3614_v32  ;;  %v1816_v0 = vld [vmem:[%s3536_s19 + $0xa0] sm:$0xff] }
 0x328   : > { %v2657_v57 = vpop.eup %2656  ;;  %v1940_v41 = vadd.f32 %v1908_v8, %v1812_v59  ;;  %v1909_v1 = vmul.f32 %v2655_v43, %v2351_v36  ;;  %2676 = vpow2.f32 %v2207_v16  ;;  %v1818_v36 = vld [vmem:[%s3536_s19 + $0xb0] sm:$0xff]  ;;  %v2363_v53 = vunpack.c.h.bf16 %v3604_v62 }
 0x329   : > { %v2659_v14 = vpop.eup %2658  ;;  %1974 = vst.msk [vmem:[%s3567_s26 + $0x90] sm:$0xff] %vm1078_vm3, %v1942_v52  ;;  %v1943_v60 = vadd.f32 %v1911_v7, %v1815_v56  ;;  %v1895_v12 = vmul.f32 %v2657_v57, %v2323_v18  ;;  %2678 = vpow2.f32 %v2227_v54  ;;  %v3642_v54 = vld [vmem:[%s3521_s17 + $0x68] sm:$0xff]   ;;  %v2359_v56 = vunpack.c.h.bf16 %v3614_v32  ;;  %v1819_v7 = vld [vmem:[%s3536_s19 + $0xb8] sm:$0xff] }
 0x32a   : > { %v2661_v13 = vpop.eup %2660  ;;  %1972 = vst.msk [vmem:[%s3567_s26 + $0x80] sm:$0xff] %vm1078_vm3, %v1940_v41  ;;  %v1941_v25 = vadd.f32 %v1909_v1, %v1813_v3  ;;  %v1723_v35 = vadd.f32 1.0, %v2659_v14  ;;  %2680 = vpow2.f32 %v2205_v11  ;;  %v2211_v43 = vmul.f32 -1.442695, %v3528_v61  ;;  %v3654_v41 = vld [vmem:[%s3521_s17 + $0x60] sm:$0xff]  }
 0x32b   : > { %v2663_v50 = vpop.eup %2662  ;;  %1975 = vst.msk [vmem:[%s3567_s26 + $0x98] sm:$0xff] %vm1078_vm3, %v1943_v60  ;;  %v1927_v30 = vadd.f32 %v1895_v12, %v1799_v31  ;;  %v1893_v45 = vmul.f32 %v2661_v13, %v2319_v47  ;;  %2682 = vpow2.f32 %v2225_v39  ;;  %v3648_v47 = vld [vmem:[%s3521_s17 + $0x10] sm:$0xff]   ;;  %v2370_v57 = vunpack.c.l.bf16 %v3642_v54 }
 0x32c   : > { %v2665_v15 = vpop.eup %2664  ;;  %1973 = vst.msk [vmem:[%s3567_s26 + $0x88] sm:$0xff] %vm1078_vm3, %v1941_v25  ;;  %2684 = vrcp.f32 %v1723_v35  ;;  %v1721_v2 = vadd.f32 1.0, %v2663_v50  ;;  %v2231_v1 = vmul.f32 -1.442695, %v3587_v33  ;;  %v2326_v14 = vunpack.c.l.bf16 %v3648_v47  ;;  %v1822_v25 = vld [vmem:[%s3536_s19 + $0xd0] sm:$0xff] }
 0x32d   : > { %v2667_v28 = vpop.eup %2666  ;;  %1959 = vst.msk [vmem:[%s3567_s26 + $0x18] sm:$0xff] %vm1078_vm3, %v1927_v30  ;;  %v1925_v23 = vadd.f32 %v1893_v45, %v1797_v40  ;;  %v1898_v26 = vmul.f32 %v2665_v15, %v2330_v22  ;;  %2686 = vpow2.f32 %v2210_v4  ;;  %v1817_v22 = vld [vmem:[%s3536_s19 + $0xa8] sm:$0xff]  ;;  %v2209_v4 = vmul.f32 -1.442695, %v3530_v48 }
 0x32e   : > { %v2669_v9 = vpop.eup %2668  ;;  %2688 = vrcp.f32 %v1721_v2  ;;  %v1726_v10 = vadd.f32 1.0, %v2667_v28  ;;  %v2229_v30 = vmul.f32 -1.442695, %v3595_v5  ;;  %v2331_v48 = vunpack.c.h.bf16 %v3593_v20  ;;  %v1820_v5 = vld [vmem:[%s3536_s19 + $0xc0] sm:$0xff] }
 0x32f   : > { %v2671_v42 = vpop.eup %2670  ;;  %v1914_v44 = vmul.f32 %v2669_v9, %v2362_v29  ;;  %1957 = vst.msk [vmem:[%s3567_s26 + $0x8] sm:$0xff] %vm1078_vm3, %v1925_v23  ;;  %v1930_v49 = vadd.f32 %v1898_v26, %v1802_v6  ;;  %2690 = vpow2.f32 %v2230_v55  ;;  %v2366_v29 = vunpack.c.l.bf16 %v3654_v41  ;;  %v1800_v55 = vld [vmem:[%s3536_s19 + $0x20] sm:$0xff] }
 0x330   : > { %v2673_v51 = vpop.eup %2672  ;;  %2692 = vrcp.f32 %v1726_v10  ;;  %v1704_v19 = vadd.f32 1.0, %v2671_v42  ;;  %v2371_v28 = vunpack.c.h.bf16 %v3642_v54  ;;  %v2327_v26 = vunpack.c.h.bf16 %v3648_v47  ;;  %v1803_v42 = vld [vmem:[%s3536_s19 + $0x38] sm:$0xff] }
 0x331   : > { %v2675_v37 = vpop.eup %2674  ;;  %v1946_v27 = vadd.f32 %v1914_v44, %v1818_v36  ;;  %v1912_v46 = vmul.f32 %v2673_v51, %v2358_v58  ;;  %1962 = vst.msk [vmem:[%s3567_s26 + $0x30] sm:$0xff] %vm1078_vm3, %v1930_v49  ;;  %2694 = vpow2.f32 %v2208_v34  ;;  %v3673_v34 = vld [vmem:[%s3521_s17 + $0x28] sm:$0xff]   ;;  %v2367_v44 = vunpack.c.h.bf16 %v3654_v41  ;;  %v1823_v51 = vld [vmem:[%s3536_s19 + $0xd8] sm:$0xff]  ;;  %v1826_v41 = vld [vmem:[%s3536_s19 + $0xf0] sm:$0xff] }
 0x332   : > { %v2677_v18 = vpop.eup %2676  ;;  %2696 = vrcp.f32 %v1704_v19  ;;  %v1724_v16 = vadd.f32 1.0, %v2675_v37 }
 0x333   : > { %v2679_v38 = vpop.eup %2678  ;;  %1978 = vst.msk [vmem:[%s3567_s26 + $0xb0] sm:$0xff] %vm1078_vm3, %v1946_v27  ;;  %v1944_v21 = vadd.f32 %v1912_v46, %v1816_v0  ;;  %v1707_v59 = vadd.f32 1.0, %v2677_v18  ;;  %2698 = vpow2.f32 %v2228_v17  ;;  %v3681_v0 = vld [vmem:[%s3521_s17 + $0x78] sm:$0xff]   ;;  %v1801_v46 = vld [vmem:[%s3536_s19 + $0x28] sm:$0xff]  ;;  %v2338_v18 = vunpack.c.l.bf16 %v3673_v34 }
 0x334   : > { %v2681_v63 = vpop.eup %2680  ;;  %2700 = vrcp.f32 %v1724_v16  ;;  %v1727_v24 = vadd.f32 1.0, %v2679_v38 }
 0x335   : > { %v2683_v8 = vpop.eup %2682  ;;  %1976 = vst.msk [vmem:[%s3567_s26 + $0xa0] sm:$0xff] %vm1078_vm3, %v1944_v21  ;;  %2702 = vrcp.f32 %v1707_v59  ;;  %v1705_v11 = vadd.f32 1.0, %v2681_v63  ;;  %v2398_v59 = vld [vmem:[%s3521_s17 + $0x20] sm:$0xff]  }
 0x336   : > { %v2685_v52 = vpop.eup %2684  ;;  %2704 = vrcp.f32 %v1727_v24  ;;  %v1725_v3 = vadd.f32 1.0, %v2683_v8  ;;  %v2378_v8 = vunpack.c.l.bf16 %v3681_v0 }
 0x337   : > { %v2687_v62 = vpop.eup %2686  ;;  %v1915_v39 = vmul.f32 %v2685_v52, %v2363_v53  ;;  %2706 = vrcp.f32 %v1705_v11  ;;  %v1821_v53 = vld [vmem:[%s3536_s19 + $0xc8] sm:$0xff]  ;;  %v1806_v11 = vld [vmem:[%s3536_s19 + $0x50] sm:$0xff] }
 0x338   : > { %v2689_v31 = vpop.eup %2688  ;;  %2708 = vrcp.f32 %v1725_v3  ;;  %v1710_v61 = vadd.f32 1.0, %v2687_v62 }
 0x339   : > { %v2691_v60 = vpop.eup %2690  ;;  %v1947_v32 = vadd.f32 %v1915_v39, %v1819_v7  ;;  %v1913_v12 = vmul.f32 %v2689_v31, %v2359_v56  ;;  %2710 = vpow2.f32 %v2211_v43  ;;  %v2408_v43 = vld [vmem:[%s3521_s17 + $0x70] sm:$0xff]   ;;  %v2334_v39 = vunpack.c.l.bf16 %v2398_v59  ;;  %s2734_s17 = scalar_lea.vmem %s3730_s16, 4096 }
 0x33a   : > { %v2693_v13 = vpop.eup %2692  ;;  %2712 = vrcp.f32 %v1710_v61  ;;  %v1730_v33 = vadd.f32 1.0, %v2691_v60  ;;  %v2374_v61 = vunpack.c.l.bf16 %v2408_v43  ;;  %p2735_p11 = scmp.ne.s32.totalorder %s3730_s16, %s2734_s17  ;;  %p2742_p1 = scmp.lt.s32.totalorder %s2740_s20, %s2734_s17 }
 0x33b   : > { %v2695_v35 = vpop.eup %2694  ;;  %1979 = vst.msk [vmem:[%s3567_s26 + $0xb8] sm:$0xff] %vm1078_vm3, %v1947_v32  ;;  %v1945_v40 = vadd.f32 %v1913_v12, %v1817_v22  ;;  %v1918_v50 = vmul.f32 %v2693_v13, %v2370_v57  ;;  %2714 = vpow2.f32 %v2231_v1  ;;  %v1804_v32 = vld [vmem:[%s3536_s19 + $0x40] sm:$0xff] }
 0x33c   : > { %v2697_v45 = vpop.eup %2696  ;;  %2716 = vrcp.f32 %v1730_v33  ;;  %v1708_v15 = vadd.f32 1.0, %v2695_v35  ;;  %v1824_v33 = vld [vmem:[%s3536_s19 + $0xe0] sm:$0xff]  ;;  %p2736_p12 = pnand %p2735_p11, %p2906_p5  ;;  %p2743_p2 = por %p2742_p1, %p2741_p0 }
 0x33d   : > { %v2699_v58 = vpop.eup %2698  ;;  %1977 = vst.msk [vmem:[%s3567_s26 + $0xa8] sm:$0xff] %vm1078_vm3, %v1945_v40  ;;  %v1950_v2 = vadd.f32 %v1918_v50, %v1822_v25  ;;  %v1896_v6 = vmul.f32 %v2697_v45, %v2326_v14  ;;  %2718 = vpow2.f32 %v2209_v4  ;;  %v2339_v45 = vunpack.c.h.bf16 %v3673_v34  ;;  %v1805_v34 = vld [vmem:[%s3536_s19 + $0x48] sm:$0xff] }
 0x33e   : > { %v2701_v23 = vpop.eup %2700  ;;  %2720 = vrcp.f32 %v1708_v15  ;;  %v1728_v20 = vadd.f32 1.0, %v2699_v58  ;;  %v1807_v15 = vld [vmem:[%s3536_s19 + $0x58] sm:$0xff]  ;;  %p2737_p13 = pneg %p2736_p12 }
 0x33f   : > { %v2703_v9 = vpop.eup %2702  ;;  %1982 = vst.msk [vmem:[%s3567_s26 + $0xd0] sm:$0xff] %vm1078_vm3, %v1950_v2  ;;  %v1928_v36 = vadd.f32 %v1896_v6, %v1800_v55  ;;  %v1916_v10 = vmul.f32 %v2701_v23, %v2366_v29  ;;  %2722 = vpow2.f32 %v2229_v30  ;;  %v2379_v55 = vunpack.c.h.bf16 %v3681_v0 }
 0x340   : > { %v2705_v49 = vpop.eup %2704  ;;  %v1899_v17 = vmul.f32 %v2703_v9, %v2331_v48  ;;  %2724 = vrcp.f32 %v1728_v20  ;;  %v2335_v2 = vunpack.c.h.bf16 %v2398_v59  ;;  %p2744_p3 = pnand %p2743_p2, %p2737_p13 }
 0x341   : > { %v2707_v19 = vpop.eup %2706  ;;  %1960 = vst.msk [vmem:[%s3567_s26 + $0x20] sm:$0xff] %vm1078_vm3, %v1928_v36  ;;  %v1948_v37 = vadd.f32 %v1916_v10, %v1820_v5  ;;  %v1919_v27 = vmul.f32 %v2705_v49, %v2371_v28  ;;  %v1827_v28 = vld [vmem:[%s3536_s19 + $0xf8] sm:$0xff] }
 0x342   : > { %v2709_v16 = vpop.eup %2708  ;;  %v1931_v38 = vadd.f32 %v1899_v17, %v1803_v42  ;;  %v1897_v21 = vmul.f32 %v2707_v19, %v2327_v26  ;;  %v2375_v26 = vunpack.c.h.bf16 %v2408_v43  ;;  %v1825_v42 = vld [vmem:[%s3536_s19 + $0xe8] sm:$0xff] }
 0x343   : > { %v2711_v63 = vpop.eup %2710  ;;  %1980 = vst.msk [vmem:[%s3567_s26 + $0xc0] sm:$0xff] %vm1078_vm3, %v1948_v37  ;;  %v1951_v54 = vadd.f32 %v1919_v27, %v1823_v51  ;;  %v1917_v24 = vmul.f32 %v2709_v16, %v2367_v44 }
 0x344   : > { %v2713_v56 = vpop.eup %2712  ;;  %1963 = vst.msk [vmem:[%s3567_s26 + $0x38] sm:$0xff] %vm1078_vm3, %v1931_v38  ;;  %v1929_v47 = vadd.f32 %v1897_v21, %v1801_v46  ;;  %v1711_v52 = vadd.f32 1.0, %v2711_v63 }
 0x345   : > { %v2715_v7 = vpop.eup %2714  ;;  %1983 = vst.msk [vmem:[%s3567_s26 + $0xd8] sm:$0xff] %vm1078_vm3, %v1951_v54  ;;  %v1949_v3 = vadd.f32 %v1917_v24, %v1821_v53  ;;  %v1902_v62 = vmul.f32 %v2713_v56, %v2338_v18 }
 0x346   : > { %v2717_v57 = vpop.eup %2716  ;;  %1961 = vst.msk [vmem:[%s3567_s26 + $0x28] sm:$0xff] %vm1078_vm3, %v1929_v47  ;;  %2726 = vrcp.f32 %v1711_v52  ;;  %v1731_v1 = vadd.f32 1.0, %v2715_v7 }
 0x347   : > { %v2719_v31 = vpop.eup %2718  ;;  %1981 = vst.msk [vmem:[%s3567_s26 + $0xc8] sm:$0xff] %vm1078_vm3, %v1949_v3  ;;  %v1934_v22 = vadd.f32 %v1902_v62, %v1806_v11  ;;  %v1922_v14 = vmul.f32 %v2717_v57, %v2378_v8 }
 0x348   : > { %v2721_v60 = vpop.eup %2720  ;;  %2728 = vrcp.f32 %v1731_v1  ;;  %v1709_v12 = vadd.f32 1.0, %v2719_v31 }
 0x349   : > { %v2723_v4 = vpop.eup %2722  ;;  %1966 = vst.msk [vmem:[%s3567_s26 + $0x50] sm:$0xff] %vm1078_vm3, %v1934_v22  ;;  %v1954_v13 = vadd.f32 %v1922_v14, %v1826_v41  ;;  %v1900_v25 = vmul.f32 %v2721_v60, %v2334_v39 }
 0x34a   : > { %v2725_v29 = vpop.eup %2724  ;;  %2730 = vrcp.f32 %v1709_v12  ;;  %v1729_v35 = vadd.f32 1.0, %v2723_v4 }
 0x34b   : > { %1986 = vst.msk [vmem:[%s3567_s26 + $0xf0] sm:$0xff] %vm1078_vm3, %v1954_v13  ;;  %v1932_v40 = vadd.f32 %v1900_v25, %v1804_v32  ;;  %v1920_v50 = vmul.f32 %v2725_v29, %v2374_v61 }
 0x34c   : > { %2732 = vrcp.f32 %v1729_v35 }
 0x34d   : > { %1964 = vst.msk [vmem:[%s3567_s26 + $0x40] sm:$0xff] %vm1078_vm3, %v1932_v40  ;;  %v1952_v30 = vadd.f32 %v1920_v50, %v1824_v33 }
 0x34f   : > { %1984 = vst.msk [vmem:[%s3567_s26 + $0xe0] sm:$0xff] %vm1078_vm3, %v1952_v30 }
 0x350   : > { %v2727_v48 = vpop.eup %2726 }
 0x351   : > { %v1903_v58 = vmul.f32 %v2727_v48, %v2339_v45 }
 0x352   : > { %v2729_v6 = vpop.eup %2728 }
 0x353   : > { %v1935_v23 = vadd.f32 %v1903_v58, %v1807_v15  ;;  %v1923_v5 = vmul.f32 %v2729_v6, %v2379_v55 }
 0x354   : > { %v2731_v20 = vpop.eup %2730 }
 0x355   : > { %1967 = vst.msk [vmem:[%s3567_s26 + $0x58] sm:$0xff] %vm1078_vm3, %v1935_v23  ;;  %v1955_v9 = vadd.f32 %v1923_v5, %v1827_v28  ;;  %v1901_v36 = vmul.f32 %v2731_v20, %v2335_v2 }
 0x356   : > { %v2733_v10 = vpop.eup %2732 }
 0x357   : > { %1987 = vst.msk [vmem:[%s3567_s26 + $0xf8] sm:$0xff] %vm1078_vm3, %v1955_v9  ;;  %v1933_v44 = vadd.f32 %v1901_v36, %v1805_v34  ;;  %v1921_v49 = vmul.f32 %v2733_v10, %v2375_v26 }
 0x359   : > { %1965 = vst.msk [vmem:[%s3567_s26 + $0x48] sm:$0xff] %vm1078_vm3, %v1933_v44  ;;  %v1953_v17 = vadd.f32 %v1921_v49, %v1825_v42 }
 0x35b   : > { %1985 = vst.msk [vmem:[%s3567_s26 + $0xe8] sm:$0xff] %vm1078_vm3, %v1953_v17 }
 0x35c   : > { %2747 = shalt.err (!%p2744_p3)
}
 0x35d   : > { %s2748_s10 = scalar_lea.hbm %s3728_s29, 4096  ;;  %s2752_s26 = scalar_lea.hbm %s3791_s12, 8192 }
 0x35e   : > { %p2749_p4 = scmp.ne.s32.totalorder %s3728_s29, %s2748_s10  ;;  %p2753_p9 = scmp.lt.u32.totalorder %s3728_s29, %s3791_s12 }
 0x35f   : > { %p2754_p10 = scmp.lt.u32.totalorder %s2752_s26, %s2748_s10  ;;  %p2756_p12 = scmp.lt.u32.totalorder %s2748_s10, %s3728_s29 }
 0x360   : > { %p2750_p7 = pnand %p2749_p4, %p2906_p5 }
 0x361   : > { %p2755_p11 = por %p2754_p10, %p2753_p9 }
 0x362   : > { %p2751_p8 = pneg %p2750_p7 }
 0x363   : > { %p2757_p13 = por %p2756_p12, %p2755_p11 }
 0x365   : > { %p2758_p0 = pnand %p2757_p13, %p2751_p8 }
 0x367   : > { %2761 = shalt.err (!%p2758_p0)
}
 0x368   : > { %s2801_s23 = smov 128   ;;  %s2802_s17 = smov 8  }
 0x369   : > { %2545 = dma.vmem_to_hbm [thread:$0]  (%p2906_p5), %s3730_s16, 4096, %s3728_s29, %s3738_s25, %s2801_s23, %s2801_s23, %s2802_s17  }
 0x36a PF: > { %p2551_p1 = scmp.ge.s32.totalorder %s2796_s24, 2  ;;  %s2017_s15 = sand.u32 1, %s2784_s21  }
 0x36b   : > { %s2018_s30 = scalar_lea.sflag [#allocation3], %s2017_s15 }
 0x36c   : > { %p2548_p2 = pnand %p2551_p1, %p2910_p6 }
 0x36e   : > { %2779 = dma.done.wait (!%p2548_p2), %s2018_s30, 4096  }
 0x36f   : > { %2781 = vsyncadd (!%p2548_p2), %s2018_s30, 4294963200  ;;  %s3801_s20 = sld [smem:[#allocation5_spill]]  ;;  %s3802_s23 = sld [smem:[#allocation6_spill]] }
 0x370   : > { %p22_p3 = scmp.ge.s32.totalorder %s2893_s27, 4   ;;  %s3803_s21 = smov %s2788_s22 }
 0x371   : > { %s3805_s24 = smov %s2893_s27 }
 0x372   :  { %24 = sbr.rel (!%p22_p3) target bundleno = 6 (0x6), region = 126 }
 0x375   : > { %s3804_s22 = smov %s3801_s20 }
 0x379   :  { %2023 = vsyncpa [#allocation3], 1 }
 0x37a   :  { %2025 = vsyncpa [#allocation3 + $0x1], 1 }

// kernel: ge_block_forward.2
= control target key start
LH: loop header
LB: loop body
LE: loop exit
PB: predicated region body
PF: predicated region fallthrough
CT: control target
= control target key end

     0   :  { %s6133_s17 = smov 0   ;;  %s7618_s0 = inlined_call_operand.vmem [shape: bf16[2,328,32], index: 0, kind: input, shape index: {}]   ;;  %s7619_s1 = inlined_call_operand.vmem [shape: f32[328,1], index: 1, kind: input, shape index: {}]   ;;  %s7620_s2 = inlined_call_operand.vmem [shape: bf16[32,8], index: 2, kind: input, shape index: {}]   ;;  %s7621_s3 = inlined_call_operand.vmem [shape: f32[1,8], index: 3, kind: input, shape index: {}]   ;;  %s7622_s4 = inlined_call_operand.vmem [shape: f32[1,8], index: 4, kind: input, shape index: {}]   ;;  %s7623_s5 = inlined_call_operand.vmem [shape: bf16[9,8,8], index: 5, kind: input, shape index: {}]   ;;  %s7624_s6 = inlined_call_operand.vmem [shape: f32[1,8], index: 6, kind: input, shape index: {}]   ;;  %s7625_s7 = inlined_call_operand.vmem [shape: f32[1,8], index: 7, kind: input, shape index: {}]   ;;  %s7626_s8 = inlined_call_operand.vmem [shape: bf16[8,32], index: 8, kind: input, shape index: {}]   ;;  %s7627_s9 = inlined_call_operand.vmem [shape: f32[1,32], index: 9, kind: input, shape index: {}]   ;;  %s7628_s10 = inlined_call_operand.vmem [shape: f32[1,32], index: 10, kind: input, shape index: {}]   ;;  %s7629_s11 = inlined_call_operand.vmem [shape: bf16[2,288,32], index: 11, kind: output, shape index: {}]  }
   0x1 LB: > { %s4721_s18 = sadd.s32 4294967295, %s6068_s17   ;;  %p4725_p0 = scmp.ge.s32.totalorder %s6068_s17, 1  ;;  %s6068_s17 = sphi %s6133_s17, %s21_s17  }
   0x2   : > { %p337_p1 = scmp.lt.s32.totalorder %s6068_s17, 3 }
   0x4   : > { %p338_p2 = pnand %p4725_p0, %p337_p1 }
   0x6   : > { %341 = sbr.rel (%p338_p2) target bundleno = 1273 (0x4f9), region = 64 }
   0xd   : > { %v6037_v0 = vld [vmem:[%s7620_s2] sm:$0xff]   ;;  %v6070_v1 = vmov 0.0   ;;  %v6038_v2 = vld [vmem:[%s7620_s2 + $0x8] sm:$0xff]   ;;  %vm6071_vm0 = vmmov 0   ;;  %p377_p3 = scmp.lt.s32.totalorder %s4721_s18, 1  ;;  %v979_v4 = vld [vmem:[%s7619_s1 + $0xf0] sm:$0xff] }
   0xe   : > { %5253 = vmatprep.subr.bf16.mxu0 %v6070_v1  ;;  %5257 = vmatprep.mubr.msk.bf16.mxu0 %vm6071_vm0, %v6070_v1  ;;  %v977_v3 = vld [vmem:[%s7619_s1 + $0xe0] sm:$0xff]  ;;  %v6072_v5 = vmov 0   ;;  %v978_v6 = vld [vmem:[%s7619_s1 + $0xe8] sm:$0xff]  ;;  %v980_v7 = vld [vmem:[%s7619_s1 + $0xf8] sm:$0xff]  ;;  %vm548_vm1 = vcmask 261120   ;;  %vm1462_vm2 = vcmask 1043456  }
   0xf   : > { %5254 = vmatpush3.bf16.msra.mxu0 %v6037_v0  ;;  %6035 = vset.pattern.permute.xlu0 %v6072_v5  ;;  %s7683_s18 = smov (!%p377_p3, %s4721_s18), 1  ;;  %v981_v8 = vld [vmem:[%s7619_s1 + $0x100] sm:$0xff]  ;;  %v982_v10 = vld [vmem:[%s7619_s1 + $0x108] sm:$0xff]  ;;  %v983_v11 = vld [vmem:[%s7619_s1 + $0x110] sm:$0xff]  ;;  %vm1258_vm3 = vsmask.f32 7424 }
  0x10   : > { %5255 = vmatprep.subr.bf16.mxu0 %v6070_v1  ;;  %1132 = vperm.xlu0 %6035, %v977_v3   ;;  %s6022_s29 = smul.u32 164, %s7683_s18  ;;  %v984_v12 = vld [vmem:[%s7619_s1 + $0x118] sm:$0xff]  ;;  %v985_v14 = vld [vmem:[%s7619_s1 + $0x120] sm:$0xff]  ;;  %v951_v15 = vld [vmem:[%s7619_s1 + $0x10] sm:$0xff]  ;;  %vm1407_vm4 = vcmask 64512   ;;  %vm1880_vm7 = vcmask 1046528  }
  0x11   : > { %6036 = vset.pattern.permute.xlu1 %v6072_v5  ;;  %v952_v16 = vld [vmem:[%s7619_s1 + $0x18] sm:$0xff]  ;;  %v953_v17 = vld [vmem:[%s7619_s1 + $0x20] sm:$0xff]  ;;  %v954_v19 = vld [vmem:[%s7619_s1 + $0x28] sm:$0xff]  ;;  %vm2422_vm5 = vsmask.f32 6400  ;;  %vm2780_vm8 = vcmask 1045504  }
  0x12   : > { %1142 = vperm.xlu1 %6036, %v979_v4   ;;  %s6169_s15 = scalar_lea.vmem %s7618_s0, %s6022_s29  ;;  %v955_v20 = vld [vmem:[%s7619_s1 + $0x30] sm:$0xff]  ;;  %v956_v21 = vld [vmem:[%s7619_s1 + $0x38] sm:$0xff]  ;;  %v957_v22 = vld [vmem:[%s7619_s1 + $0x40] sm:$0xff]  ;;  %vm3322_vm6 = vsmask.f32 5376  ;;  %vm3680_vm9 = vcmask 1044480  }
  0x13   : > { %5256 = vmatpush3.bf16.msra.mxu0 %v6038_v2  ;;  %v6039_v9 = vld [vmem:[%s6169_s15] sm:$0xff]   ;;  %v6040_v13 = vld [vmem:[%s6169_s15 + $0x8] sm:$0xff]   ;;  %v6041_v18 = vld [vmem:[%s6169_s15 + $0x10] sm:$0xff]   ;;  %vm4629_vm10 = vcmask 257024  }
  0x14   : > { %1137 = vperm.xlu0 %6035, %v978_v6   ;;  %v6042_v23 = vld [vmem:[%s6169_s15 + $0x18] sm:$0xff]   ;;  %v958_v24 = vld [vmem:[%s7619_s1 + $0x48] sm:$0xff]  ;;  %v959_v25 = vld [vmem:[%s7619_s1 + $0x50] sm:$0xff] }
  0x15   : > { %v960_v26 = vld [vmem:[%s7619_s1 + $0x58] sm:$0xff]  ;;  %v961_v27 = vld [vmem:[%s7619_s1 + $0x60] sm:$0xff]  ;;  %v962_v29 = vld [vmem:[%s7619_s1 + $0x68] sm:$0xff] }
  0x16   : > { %1147 = vperm.xlu1 %6036, %v980_v7   ;;  %5258 = vmatmul.mubr.msk.bf16.vlgmr.msra.gmra.mrb[0].mxu0 %vm548_vm1, %v6039_v9  ;;  %v6043_v28 = vld [vmem:[%s6169_s15 + $0x20] sm:$0xff]   ;;  %v963_v30 = vld [vmem:[%s7619_s1 + $0x70] sm:$0xff]  ;;  %v964_v31 = vld [vmem:[%s7619_s1 + $0x78] sm:$0xff] }
  0x17   : > { %5261 = vmatprep.mubr.msk.bf16.mxu0 %vm6071_vm0, %v6070_v1  ;;  %v965_v32 = vld [vmem:[%s7619_s1 + $0x80] sm:$0xff]  ;;  %v6044_v33 = vld [vmem:[%s6169_s15 + $0x28] sm:$0xff]   ;;  %v967_v35 = vld [vmem:[%s7619_s1 + $0x90] sm:$0xff] }
  0x18   : > { %1152 = vperm.xlu0 %6035, %v981_v8   ;;  %v966_v34 = vld [vmem:[%s7619_s1 + $0x88] sm:$0xff]  ;;  %v968_v36 = vld [vmem:[%s7619_s1 + $0x98] sm:$0xff]  ;;  %v969_v37 = vld [vmem:[%s7619_s1 + $0xa0] sm:$0xff] }
  0x19   : > { %v6045_v38 = vld [vmem:[%s6169_s15 + $0x30] sm:$0xff]   ;;  %v970_v39 = vld [vmem:[%s7619_s1 + $0xa8] sm:$0xff]  ;;  %v972_v41 = vld [vmem:[%s7619_s1 + $0xb8] sm:$0xff] }
  0x1a   : > { %1157 = vperm.xlu1 %6036, %v982_v10   ;;  %v971_v40 = vld [vmem:[%s7619_s1 + $0xb0] sm:$0xff]  ;;  %v973_v42 = vld [vmem:[%s7619_s1 + $0xc0] sm:$0xff]  ;;  %v6046_v43 = vld [vmem:[%s6169_s15 + $0x38] sm:$0xff]  }
  0x1b   : > { %v974_v44 = vld [vmem:[%s7619_s1 + $0xc8] sm:$0xff]  ;;  %v975_v45 = vld [vmem:[%s7619_s1 + $0xd0] sm:$0xff]  ;;  %v976_v46 = vld [vmem:[%s7619_s1 + $0xd8] sm:$0xff] }
  0x1c   : > { %1162 = vperm.xlu0 %6035, %v983_v11   ;;  %v986_v47 = vld [vmem:[%s7619_s1 + $0x128] sm:$0xff]  ;;  %v6047_v48 = vld [vmem:[%s6169_s15 + $0x40] sm:$0xff]   ;;  %v987_v49 = vld [vmem:[%s7619_s1 + $0x130] sm:$0xff] }
  0x1d   : > { %v949_v50 = vld [vmem:[%s7619_s1] sm:$0xff]  ;;  %v950_v51 = vld [vmem:[%s7619_s1 + $0x8] sm:$0xff]  ;;  %v6049_v53 = vld [vmem:[%s6169_s15 + $0x50] sm:$0xff]  }
  0x1e   : > { %1167 = vperm.xlu1 %6036, %v984_v12   ;;  %5262 = vmatmul.mubr.msk.bf16.gmra.mrb[4].mxu0 %vm548_vm1, %v6040_v13  ;;  %v6048_v52 = vld [vmem:[%s6169_s15 + $0x48] sm:$0xff]   ;;  %v6050_v54 = vld [vmem:[%s6169_s15 + $0x58] sm:$0xff]   ;;  %v989_v55 = vld [vmem:[%s7619_s1 + $0x140] sm:$0xff] }
  0x1f   : > { %5265 = vmatprep.mubr.msk.bf16.mxu0 %vm6071_vm0, %v6070_v1  ;;  %v988_v56 = vld [vmem:[%s7619_s1 + $0x138] sm:$0xff]  ;;  %v6051_v57 = vld [vmem:[%s6169_s15 + $0x60] sm:$0xff]   ;;  %v6052_v58 = vld [vmem:[%s6169_s15 + $0x68] sm:$0xff]  }
  0x20   : > { %1172 = vperm.xlu0 %6035, %v985_v14   ;;  %v6053_v59 = vld [vmem:[%s6169_s15 + $0x70] sm:$0xff]   ;;  %v4774_v60 = vld [vmem:[%s7623_s5 + $0x4] sm:$0xf]  ;;  %v6054_v62 = vld [vmem:[%s6169_s15 + $0x78] sm:$0xff]  }
  0x21   : > { %6011 = vmatprep.subr.msk.bf16.mxu0 %vm1462_vm2, %v4774_v60  ;;  %v1464_v61 = vsel %vm1462_vm2, %v4774_v60, 0  ;;  %v6055_v2 = vld [vmem:[%s6169_s15 + $0x80] sm:$0xff]   ;;  %v6056_v7 = vld [vmem:[%s6169_s15 + $0x88] sm:$0xff]   ;;  %v6057_v12 = vld [vmem:[%s6169_s15 + $0x90] sm:$0xff]  }
  0x22   : > { %1002 = vperm.xlu1 %6036, %v951_v15   ;;  %5342 = vmatpush3.bf16.msra.mxu0 %v1464_v61 }
  0x24   : > { %1007 = vperm.xlu0 %6035, %v952_v16  }
  0x26   : > { %1012 = vperm.xlu1 %6036, %v953_v17   ;;  %5266 = vmatmul.mubr.msk.bf16.gmra.mrb[8].mxu0 %vm548_vm1, %v6041_v18  ;;  %v6058_v17 = vld [vmem:[%s6169_s15 + $0x98] sm:$0xff]  }
  0x27   : > { %5269 = vmatprep.mubr.msk.bf16.mxu0 %vm6071_vm0, %v6070_v1 }
  0x28   : > { %1017 = vperm.xlu0 %6035, %v954_v19  }
  0x2a   : > { %1022 = vperm.xlu1 %6036, %v955_v20  }
  0x2c   : > { %1027 = vperm.xlu0 %6035, %v956_v21   ;;  %v6059_v21 = vld [vmem:[%s6169_s15 + $0xa0] ss:$0 sps:$4 sm:$0xff]   ;;  %s6023_s15 = smul.u32 144, %s7683_s18 }
  0x2e   : > { %1032 = vperm.xlu1 %6036, %v957_v22   ;;  %5270 = vmatmul.mubr.msk.bf16.gmra.mrb[12].mxu0 %vm548_vm1, %v6042_v23  ;;  %s7476_s13 = scalar_lea.vmem %s7629_s11, %s6023_s15 }
  0x2f   : > { %5273 = vmatprep.mubr.msk.bf16.mxu0 %vm6071_vm0, %v6070_v1 }
  0x30   : > { %1037 = vperm.xlu0 %6035, %v958_v24  }
  0x32   : > { %1042 = vperm.xlu1 %6036, %v959_v25  }
  0x34   : > { %1047 = vperm.xlu0 %6035, %v960_v26  }
  0x36   : > { %1052 = vperm.xlu1 %6036, %v961_v27   ;;  %5274 = vmatmul.mubr.msk.bf16.gmra.mrb[16].mxu0 %vm548_vm1, %v6043_v28 }
  0x37   : > { %5277 = vmatprep.mubr.msk.bf16.mxu0 %vm6071_vm0, %v6070_v1 }
  0x38   : > { %1057 = vperm.xlu0 %6035, %v962_v29  }
  0x3a   : > { %1062 = vperm.xlu1 %6036, %v963_v30  }
  0x3c   : > { %1067 = vperm.xlu0 %6035, %v964_v31  }
  0x3e   : > { %1072 = vperm.xlu1 %6036, %v965_v32   ;;  %5278 = vmatmul.mubr.msk.bf16.gmra.mrb[20].mxu0 %vm548_vm1, %v6044_v33 }
  0x3f   : > { %5281 = vmatprep.mubr.msk.bf16.mxu0 %vm6071_vm0, %v6070_v1 }
  0x40   : > { %1077 = vperm.xlu0 %6035, %v966_v34  }
  0x42   : > { %1082 = vperm.xlu1 %6036, %v967_v35  }
  0x44   : > { %1087 = vperm.xlu0 %6035, %v968_v36  }
  0x46   : > { %1092 = vperm.xlu1 %6036, %v969_v37   ;;  %5282 = vmatmul.mubr.msk.bf16.gmra.mrb[24].mxu0 %vm548_vm1, %v6045_v38 }
  0x47   : > { %5285 = vmatprep.mubr.msk.bf16.mxu0 %vm6071_vm0, %v6070_v1 }
  0x48   : > { %1097 = vperm.xlu0 %6035, %v970_v39   ;;  %v6442_v39 = vld [vmem:[%s7621_s3] ss:$0 sm:$0xff] }
  0x4a   : > { %1102 = vperm.xlu1 %6036, %v971_v40  }
  0x4c   : > { %1107 = vperm.xlu0 %6035, %v972_v41  }
  0x4e   : > { %1112 = vperm.xlu1 %6036, %v973_v42   ;;  %5286 = vmatmul.mubr.msk.bf16.gmra.mrb[28].mxu0 %vm548_vm1, %v6046_v43  ;;  %v6449_v42 = vld [vmem:[%s7622_s4] ss:$0 sm:$0xff] }
  0x4f   : > { %5289 = vmatprep.mubr.msk.bf16.mxu0 %vm6071_vm0, %v6070_v1 }
  0x50   : > { %1117 = vperm.xlu0 %6035, %v974_v44  }
  0x52   : > { %1122 = vperm.xlu1 %6036, %v975_v45  }
  0x54   : > { %1127 = vperm.xlu0 %6035, %v976_v46  }
  0x56   : > { %1177 = vperm.xlu1 %6036, %v986_v47   ;;  %5290 = vmatmul.mubr.msk.bf16.gmra.mrb[32].mxu0 %vm548_vm1, %v6047_v48 }
  0x57   : > { %5293 = vmatprep.mubr.msk.bf16.mxu0 %vm6071_vm0, %v6070_v1 }
  0x58   : > { %1182 = vperm.xlu0 %6035, %v987_v49  }
  0x5a   : > { %992 = vperm.xlu1 %6036, %v949_v50  }
  0x5c   : > { %997 = vperm.xlu0 %6035, %v950_v51  }
  0x5e   : > { %5294 = vmatmul.mubr.msk.bf16.gmra.mrb[36].mxu0 %vm548_vm1, %v6048_v52  ;;  %1187 = vperm.xlu1 %6036, %v988_v56  }
  0x5f   : > { %5297 = vmatprep.mubr.msk.bf16.mxu0 %vm6071_vm0, %v6070_v1 }
  0x60   : > { %1192 = vperm.xlu0 %6035, %v989_v55  }
  0x66   : > { %5298 = vmatmul.mubr.msk.bf16.gmra.mrb[40].mxu0 %vm548_vm1, %v6049_v53 }
  0x67   : > { %5301 = vmatprep.mubr.msk.bf16.mxu0 %vm6071_vm0, %v6070_v1 }
  0x6e   : > { %5302 = vmatmul.mubr.msk.bf16.gmra.mrb[44].mxu0 %vm548_vm1, %v6050_v54 }
  0x6f   : > { %5305 = vmatprep.mubr.msk.bf16.mxu0 %vm6071_vm0, %v6070_v1 }
  0x76   : > { %5306 = vmatmul.mubr.msk.bf16.gmra.mrb[48].mxu0 %vm548_vm1, %v6051_v57 }
  0x77   : > { %5309 = vmatprep.mubr.msk.bf16.mxu0 %vm6071_vm0, %v6070_v1 }
  0x7e   : > { %5310 = vmatmul.mubr.msk.bf16.gmra.mrb[52].mxu0 %vm548_vm1, %v6052_v58 }
  0x7f   : > { %5313 = vmatprep.mubr.msk.bf16.mxu0 %vm6071_vm0, %v6070_v1 }
  0x86   : > { %5314 = vmatmul.mubr.msk.bf16.gmra.mrb[56].mxu0 %vm548_vm1, %v6053_v59 }
  0x87   : > { %5317 = vmatprep.mubr.msk.bf16.mxu0 %vm6071_vm0, %v6070_v1 }
  0x8e   : > { %5318 = vmatmul.mubr.msk.bf16.gmra.mrb[60].mxu0 %vm548_vm1, %v6054_v62 }
  0x8f   : > { %v6349_v63 = vpop.permute.xlu0 %1132  ;;  %5321 = vmatprep.mubr.msk.bf16.mxu0 %vm6071_vm0, %v6070_v1 }
  0x91   : > { %v6353_v0 = vpop.permute.xlu1 %1142 }
  0x93   : > { %v6356_v3 = vpop.permute.xlu0 %1137 }
  0x95   : > { %v6358_v4 = vpop.permute.xlu1 %1147 }
  0x96   : > { %5322 = vmatmul.mubr.msk.bf16.gmra.mrb[64].mxu0 %vm548_vm1, %v6055_v2 }
  0x97   : > { %v6361_v5 = vpop.permute.xlu0 %1152  ;;  %5325 = vmatprep.mubr.msk.bf16.mxu0 %vm6071_vm0, %v6070_v1 }
  0x99   : > { %v6365_v6 = vpop.permute.xlu1 %1157 }
  0x9b   : > { %v6368_v8 = vpop.permute.xlu0 %1162 }
  0x9d   : > { %v6370_v9 = vpop.permute.xlu1 %1167 }
  0x9e   : > { %5326 = vmatmul.mubr.msk.bf16.gmra.mrb[68].mxu0 %vm548_vm1, %v6056_v7 }
  0x9f   : > { %v6373_v10 = vpop.permute.xlu0 %1172  ;;  %5329 = vmatprep.mubr.msk.bf16.mxu0 %vm6071_vm0, %v6070_v1 }
  0xa1   : > { %v6377_v11 = vpop.permute.xlu1 %1002 }
  0xa3   : > { %v6380_v13 = vpop.permute.xlu0 %1007 }
  0xa5   : > { %v6382_v14 = vpop.permute.xlu1 %1012 }
  0xa6   : > { %5330 = vmatmul.mubr.msk.bf16.gmra.mrb[72].mxu0 %vm548_vm1, %v6057_v12  ;;  %v6465_v12 = vld [vmem:[%s7623_s5 + $0x8] sm:$0xf] }
  0xa7   : > { %v6385_v15 = vpop.permute.xlu0 %1017  ;;  %5333 = vmatprep.mubr.msk.bf16.mxu0 %vm6071_vm0, %v6070_v1  ;;  %6014 = vmatprep.subr.msk.bf16.mxu1 %vm1462_vm2, %v6465_v12 }
  0xa9   : > { %v6389_v16 = vpop.permute.xlu1 %1022 }
  0xab   : > { %v6392_v18 = vpop.permute.xlu0 %1027 }
  0xad   : > { %v6394_v19 = vpop.permute.xlu1 %1032 }
  0xae   : > { %5334 = vmatmul.mubr.msk.bf16.gmra.mrb[76].mxu0 %vm548_vm1, %v6058_v17 }
  0xaf   : > { %v6397_v20 = vpop.permute.xlu0 %1037  ;;  %5337 = vmatprep.mubr.msk.bf16.mxu0 %vm6071_vm0, %v6070_v1 }
  0xb1   : > { %v6402_v22 = vpop.permute.xlu1 %1042 }
  0xb3   : > { %v6404_v23 = vpop.permute.xlu0 %1047 }
  0xb5   : > { %v6407_v24 = vpop.permute.xlu1 %1052 }
  0xb6   : > { %5338 = vmatmul.mubr.msk.bf16.gmra.mrb[80].mxu0 %vm548_vm1, %v6059_v21 }
  0xb7   : > { %v6409_v25 = vpop.permute.xlu0 %1057 }
  0xb9   : > { %v6411_v26 = vpop.permute.xlu1 %1062 }
  0xbb   : > { %v6413_v27 = vpop.permute.xlu0 %1067 }
  0xbd   : > { %v6415_v28 = vpop.permute.xlu1 %1072 }
  0xbf   : > { %v6417_v29 = vpop.permute.xlu0 %1077 }
  0xc1   : > { %v6419_v1 = vpop.permute.xlu1 %1082 }
  0xc3   : > { %v6421_v30 = vpop.permute.xlu0 %1087 }
  0xc5   : > { %v6423_v31 = vpop.permute.xlu1 %1092 }
  0xc7   : > { %v6425_v32 = vpop.permute.xlu0 %1097 }
  0xc9   : > { %v6427_v33 = vpop.permute.xlu1 %1102 }
  0xcb   : > { %v6429_v34 = vpop.permute.xlu0 %1107 }
  0xcd   : > { %v6431_v35 = vpop.permute.xlu1 %1112 }
  0xcf   : > { %v6433_v36 = vpop.permute.xlu0 %1117 }
  0xd1   : > { %v6435_v37 = vpop.permute.xlu1 %1122 }
  0xd3   : > { %v6437_v38 = vpop.permute.xlu0 %1127 }
  0xd5   : > { %v6444_v40 = vpop.permute.xlu1 %1177 }
  0xd7   : > { %v6451_v43 = vpop.permute.xlu0 %1182 }
  0xd9   : > { %v993_v52 = vpop.permute.xlu1 %992 }
  0xdb   : > { %v998_v53 = vpop.permute.xlu0 %997 }
  0xe9   : > { %v646_v41 = vpop.f32.mrb[0].mxu0 }
  0xea   : > { %v819_v44 = vmul.f32 %v6442_v39, %v646_v41  ;;  %v5259_v45 = vpop.f32.mrb[1].mxu0  ;;  %v6472_v41 = vsel %vm1462_vm2, %v6465_v12, 0 }
  0xeb   : > { %v649_v46 = vpop.f32.mrb[2].mxu0  ;;  %5722 = vmatpush3.bf16.msra.mxu1 %v6472_v41 }
  0xec   : > { %v867_v47 = vadd.f32 %v6449_v42, %v819_v44  ;;  %v820_v48 = vmul.f32 %v6442_v39, %v649_v46  ;;  %v5260_v49 = vpop.f32.mrb[3].mxu0 }
  0xee   : > { %v868_v50 = vadd.f32 %v6449_v42, %v820_v48  ;;  %v908_v51 = vmax.f32 %v867_v47, 0.0 }
  0xf0   : > { %v909_v54 = vmax.f32 %v868_v50, 0.0  ;;  %v1195_v56 = vmul.f32 %v993_v52, %v908_v51 }
  0xf1   : > { %v654_v55 = vpop.f32.mrb[4].mxu0 }
  0xf2   : > { %v1196_v57 = vmul.f32 %v998_v53, %v909_v54  ;;  %v821_v58 = vmul.f32 %v6442_v39, %v654_v55  ;;  %v5263_v59 = vpop.f32.mrb[5].mxu0 }
  0xf3   : > { %v657_v60 = vpop.f32.mrb[6].mxu0 }
  0xf4   : > { %v6458_v61 = vpack.c.bf16 %v1196_v57, %v1195_v56  ;;  %v869_v62 = vadd.f32 %v6449_v42, %v821_v58  ;;  %v822_v2 = vmul.f32 %v6442_v39, %v657_v60  ;;  %v5264_v7 = vpop.f32.mrb[7].mxu0 }
  0xf6   : > { %v910_v17 = vmax.f32 %v869_v62, 0.0  ;;  %v870_v21 = vadd.f32 %v6449_v42, %v822_v2  ;;  %v1262_v45 = vshll.u32 %v6458_v61, 16  ;;  %v1260_v57 = vshrl.u32 %v6458_v61, 16 }
  0xf8   : > { %v911_v44 = vmax.f32 %v870_v21, 0.0  ;;  %v1197_v47 = vmul.f32 %v6377_v11, %v910_v17  ;;  %v1264_v56 = vrot.slane %v1262_v45, 1 }
  0xf9   : > { %v662_v46 = vpop.f32.mrb[8].mxu0 }
  0xfa   : > { %v1198_v48 = vmul.f32 %v6380_v13, %v911_v44  ;;  %v823_v49 = vmul.f32 %v6442_v39, %v662_v46  ;;  %v5267_v50 = vpop.f32.mrb[9].mxu0  ;;  %v1265_v62 = vor.u32 %v1264_v56, %v1260_v57 }
  0xfb   : > { %v665_v51 = vpop.f32.mrb[10].mxu0 }
  0xfc   : > { %v6479_v52 = vpack.c.bf16 %v1198_v48, %v1197_v47  ;;  %v871_v53 = vadd.f32 %v6449_v42, %v823_v49  ;;  %v824_v54 = vmul.f32 %v6442_v39, %v665_v51  ;;  %v5268_v55 = vpop.f32.mrb[11].mxu0 }
  0xfe   : > { %v912_v58 = vmax.f32 %v871_v53, 0.0  ;;  %v872_v59 = vadd.f32 %v6449_v42, %v824_v54  ;;  %v1267_v11 = vshll.u32 %v6479_v52, 16  ;;  %v1271_v13 = vshrl.u32 %v6479_v52, 16 }
 0x100   : > { %v913_v60 = vmax.f32 %v872_v59, 0.0  ;;  %v1269_v2 = vrot.slane %v1267_v11, 1  ;;  %v2423_v7 = vrot.slane %v1271_v13, 1  ;;  %v2424_v21 = vrot.slane %v1267_v11, 2 }
 0x101   : > { %v670_v17 = vpop.f32.mrb[12].mxu0  ;;  %v1199_v44 = vmul.f32 %v6382_v14, %v912_v58  ;;  %v6499_v14 = vld [vmem:[%s7623_s5 + $0xc] sm:$0xf] }
 0x102   : > { %v1200_v45 = vmul.f32 %v6385_v15, %v913_v60  ;;  %v825_v46 = vmul.f32 %v6442_v39, %v670_v17  ;;  %v5271_v47 = vpop.f32.mrb[13].mxu0  ;;  %v1270_v48 = vsel %vm1258_vm3, %v1265_v62, %v1269_v2  ;;  %v2425_v50 = vor.u32 %v2424_v21, %v2423_v7  ;;  %6015 = vmatprep.subr.msk.bf16.mxu1 %vm1462_vm2, %v6499_v14 }
 0x103   : > { %v673_v49 = vpop.f32.mrb[14].mxu0  ;;  %5343 = vmatprep.mubr.msk.bf16.mxu0 %vm1407_vm4, %v1270_v48  ;;  %v1273_v59 = vor.u32 %v1271_v13, %v1269_v2 }
 0x104   : > { %v6492_v51 = vpack.c.bf16 %v1200_v45, %v1199_v44  ;;  %v873_v53 = vadd.f32 %v6449_v42, %v825_v46  ;;  %v826_v54 = vmul.f32 %v6442_v39, %v673_v49  ;;  %v5272_v55 = vpop.f32.mrb[15].mxu0 }
 0x106   : > { %v914_v15 = vmax.f32 %v873_v53, 0.0  ;;  %v874_v56 = vadd.f32 %v6449_v42, %v826_v54  ;;  %v1275_v57 = vshll.u32 %v6492_v51, 16  ;;  %v1279_v58 = vshrl.u32 %v6492_v51, 16 }
 0x108   : > { %v1201_v11 = vmul.f32 %v6389_v16, %v914_v15  ;;  %v915_v60 = vmax.f32 %v874_v56, 0.0  ;;  %v1277_v62 = vrot.slane %v1275_v57, 1  ;;  %v2426_v7 = vrot.slane %v1279_v58, 1 }
 0x109   : > { %v678_v17 = vpop.f32.mrb[16].mxu0  ;;  %v2427_v21 = vrot.slane %v1275_v57, 2  ;;  %v3323_v44 = vrot.slane %v1279_v58, 2  ;;  %v3324_v2 = vrot.slane %v1275_v57, 3 }
 0x10a   : > { %v1202_v45 = vmul.f32 %v6392_v18, %v915_v60  ;;  %v827_v46 = vmul.f32 %v6442_v39, %v678_v17  ;;  %v5275_v47 = vpop.f32.mrb[17].mxu0  ;;  %v1278_v48 = vsel %vm1258_vm3, %v1273_v59, %v1277_v62  ;;  %v1254_v18 = vld [vmem:[%s7623_s5] sm:$0xf] }
 0x10b   : > { %v681_v49 = vpop.f32.mrb[18].mxu0  ;;  %5344 = vmatmul.mubr.msk.bf16.vlgmr.msra.gmra.mrb[84].mxu0 %vm1407_vm4, %v1278_v48  ;;  %v2428_v13 = vor.u32 %v2427_v21, %v2426_v7  ;;  %v3325_v56 = vor.u32 %v3324_v2, %v3323_v44  ;;  %6012 = vmatprep.subr.msk.bf16.mxu0 %vm1462_vm2, %v1254_v18  ;;  %v1680_v7 = vsel %vm1462_vm2, %v1254_v18, 0  ;;  %v1281_v21 = vor.u32 %v1279_v58, %v1277_v62 }
 0x10c   : > { %v6511_v16 = vpack.c.bf16 %v1202_v45, %v1201_v11  ;;  %v875_v53 = vadd.f32 %v6449_v42, %v827_v46  ;;  %v828_v54 = vmul.f32 %v6442_v39, %v681_v49  ;;  %v5276_v55 = vpop.f32.mrb[19].mxu0  ;;  %5380 = vmatpush3.bf16.msra.mxu0 %v1680_v7 }
 0x10d   : > { %v6519_v15 = vsel %vm2422_vm5, %v2425_v50, %v2428_v13  ;;  %6013 = vmatprep.subr.msk.bf16.mxu0 %vm1462_vm2, %v6465_v12 }
 0x10e   : > { %v916_v59 = vmax.f32 %v875_v53, 0.0  ;;  %v876_v60 = vadd.f32 %v6449_v42, %v828_v54  ;;  %v1283_v57 = vshll.u32 %v6511_v16, 16  ;;  %v1287_v11 = vshrl.u32 %v6511_v16, 16 }
 0x110   : > { %v917_v17 = vmax.f32 %v876_v60, 0.0  ;;  %v1285_v45 = vrot.slane %v1283_v57, 1  ;;  %v2430_v46 = vrot.slane %v1287_v11, 1  ;;  %v2431_v50 = vrot.slane %v1283_v57, 2 }
 0x111   : > { %v686_v47 = vpop.f32.mrb[20].mxu0  ;;  %v3326_v44 = vrot.slane %v1287_v11, 2  ;;  %v1203_v48 = vmul.f32 %v6394_v19, %v916_v59  ;;  %v3327_v62 = vrot.slane %v1283_v57, 3 }
 0x112   : > { %v1204_v49 = vmul.f32 %v6397_v20, %v917_v17  ;;  %v829_v2 = vmul.f32 %v6442_v39, %v686_v47  ;;  %v5279_v53 = vpop.f32.mrb[21].mxu0  ;;  %v1286_v54 = vsel %vm1258_vm3, %v1281_v21, %v1285_v45  ;;  %v2432_v58 = vor.u32 %v2431_v50, %v2430_v46 }
 0x113   : > { %v689_v55 = vpop.f32.mrb[22].mxu0  ;;  %5347 = vmatprep.mubr.msk.bf16.mxu0 %vm1407_vm4, %v1286_v54  ;;  %v3328_v20 = vor.u32 %v3327_v62, %v3326_v44  ;;  %v1289_v50 = vor.u32 %v1287_v11, %v1285_v45 }
 0x114   : > { %v6533_v18 = vpack.c.bf16 %v1204_v49, %v1203_v48  ;;  %v877_v12 = vadd.f32 %v6449_v42, %v829_v2  ;;  %v830_v60 = vmul.f32 %v6442_v39, %v689_v55  ;;  %v5280_v7 = vpop.f32.mrb[23].mxu0  ;;  %v6538_v19 = vsel %vm2422_vm5, %v2428_v13, %v2432_v58 }
 0x115   : > { %v6544_v57 = vsel %vm3322_vm6, %v3325_v56, %v3328_v20 }
 0x116   : > { %v918_v59 = vmax.f32 %v877_v12, 0.0  ;;  %v878_v17 = vadd.f32 %v6449_v42, %v830_v60  ;;  %v1291_v21 = vshll.u32 %v6533_v18, 16  ;;  %v1295_v46 = vshrl.u32 %v6533_v18, 16  ;;  %7633 = vst [vmem:[#allocation2_spill] sm:$0xff] %v6544_v57 }
 0x118   : > { %v919_v47 = vmax.f32 %v878_v17, 0.0  ;;  %v1293_v48 = vrot.slane %v1291_v21, 1  ;;  %v2434_v49 = vrot.slane %v1295_v46, 1  ;;  %v2435_v53 = vrot.slane %v1291_v21, 2 }
 0x119   : > { %v694_v2 = vpop.f32.mrb[24].mxu0  ;;  %v3330_v54 = vrot.slane %v1295_v46, 2  ;;  %v1205_v13 = vmul.f32 %v6402_v22, %v918_v59  ;;  %v3331_v7 = vrot.slane %v1291_v21, 3 }
 0x11a   : > { %v1206_v44 = vmul.f32 %v6404_v23, %v919_v47  ;;  %v831_v55 = vmul.f32 %v6442_v39, %v694_v2  ;;  %v5283_v62 = vpop.f32.mrb[25].mxu0  ;;  %v1294_v12 = vsel %vm1258_vm3, %v1289_v50, %v1293_v48  ;;  %v2436_v56 = vor.u32 %v2435_v53, %v2434_v49 }
 0x11b   : > { %v697_v60 = vpop.f32.mrb[26].mxu0  ;;  %5348 = vmatmul.mubr.msk.bf16.gmra.mrb[88].mxu0 %vm1407_vm4, %v1294_v12  ;;  %v3332_v23 = vor.u32 %v3331_v7, %v3330_v54  ;;  %v1297_v53 = vor.u32 %v1295_v46, %v1293_v48 }
 0x11c   : > { %v6551_v11 = vpack.c.bf16 %v1206_v44, %v1205_v13  ;;  %v879_v45 = vadd.f32 %v6449_v42, %v831_v55  ;;  %v832_v17 = vmul.f32 %v6442_v39, %v697_v60  ;;  %v5284_v57 = vpop.f32.mrb[27].mxu0  ;;  %v6556_v22 = vsel %vm2422_vm5, %v2432_v58, %v2436_v56 }
 0x11d   : > { %v6562_v21 = vsel %vm3322_vm6, %v3328_v20, %v3332_v23 }
 0x11e   : > { %v920_v59 = vmax.f32 %v879_v45, 0.0  ;;  %v880_v47 = vadd.f32 %v6449_v42, %v832_v17  ;;  %v1299_v50 = vshll.u32 %v6551_v11, 16  ;;  %v1303_v2 = vshrl.u32 %v6551_v11, 16  ;;  %7634 = vst [vmem:[#allocation3_spill] sm:$0xff] %v6562_v21 }
 0x120   : > { %v921_v49 = vmax.f32 %v880_v47, 0.0  ;;  %v1301_v13 = vrot.slane %v1299_v50, 1  ;;  %v2438_v44 = vrot.slane %v1303_v2, 1  ;;  %v2439_v57 = vrot.slane %v1299_v50, 2 }
 0x121   : > { %v702_v55 = vpop.f32.mrb[28].mxu0  ;;  %v3334_v62 = vrot.slane %v1303_v2, 2  ;;  %v1207_v58 = vmul.f32 %v6407_v24, %v920_v59  ;;  %v3335_v17 = vrot.slane %v1299_v50, 3 }
 0x122   : > { %v1208_v54 = vmul.f32 %v6409_v25, %v921_v49  ;;  %v833_v12 = vmul.f32 %v6442_v39, %v702_v55  ;;  %v5287_v60 = vpop.f32.mrb[29].mxu0  ;;  %v1302_v7 = vsel %vm1258_vm3, %v1297_v53, %v1301_v13  ;;  %v2440_v20 = vor.u32 %v2439_v57, %v2438_v44 }
 0x123   : > { %v705_v45 = vpop.f32.mrb[30].mxu0  ;;  %5351 = vmatprep.mubr.msk.bf16.mxu0 %vm1407_vm4, %v1302_v7  ;;  %v3336_v25 = vor.u32 %v3335_v17, %v3334_v62  ;;  %v1305_v57 = vor.u32 %v1303_v2, %v1301_v13 }
 0x124   : > { %v6569_v46 = vpack.c.bf16 %v1208_v54, %v1207_v58  ;;  %v881_v48 = vadd.f32 %v6449_v42, %v833_v12  ;;  %v834_v47 = vmul.f32 %v6442_v39, %v705_v45  ;;  %v5288_v21 = vpop.f32.mrb[31].mxu0  ;;  %v6574_v24 = vsel %vm2422_vm5, %v2436_v56, %v2440_v20 }
 0x125   : > { %v6580_v50 = vsel %vm3322_vm6, %v3332_v23, %v3336_v25 }
 0x126   : > { %v922_v59 = vmax.f32 %v881_v48, 0.0  ;;  %v882_v49 = vadd.f32 %v6449_v42, %v834_v47  ;;  %v1307_v53 = vshll.u32 %v6569_v46, 16  ;;  %v1311_v55 = vshrl.u32 %v6569_v46, 16  ;;  %7635 = vst [vmem:[#allocation4_spill] sm:$0xff] %v6580_v50 }
 0x128   : > { %v923_v44 = vmax.f32 %v882_v49, 0.0  ;;  %v1309_v58 = vrot.slane %v1307_v53, 1  ;;  %v2442_v54 = vrot.slane %v1311_v55, 1  ;;  %v2443_v21 = vrot.slane %v1307_v53, 2 }
 0x129   : > { %v710_v12 = vpop.f32.mrb[32].mxu0  ;;  %v3338_v60 = vrot.slane %v1311_v55, 2  ;;  %v1209_v56 = vmul.f32 %v6411_v26, %v922_v59  ;;  %v3339_v47 = vrot.slane %v1307_v53, 3 }
 0x12a   : > { %v1210_v62 = vmul.f32 %v6413_v27, %v923_v44  ;;  %v835_v7 = vmul.f32 %v6442_v39, %v710_v12  ;;  %v5291_v45 = vpop.f32.mrb[33].mxu0  ;;  %v1310_v17 = vsel %vm1258_vm3, %v1305_v57, %v1309_v58  ;;  %v2444_v23 = vor.u32 %v2443_v21, %v2442_v54 }
 0x12b   : > { %v713_v48 = vpop.f32.mrb[34].mxu0  ;;  %5352 = vmatmul.mubr.msk.bf16.gmra.mrb[92].mxu0 %vm1407_vm4, %v1310_v17  ;;  %v3340_v27 = vor.u32 %v3339_v47, %v3338_v60  ;;  %v1313_v21 = vor.u32 %v1311_v55, %v1309_v58 }
 0x12c   : > { %v6587_v2 = vpack.c.bf16 %v1210_v62, %v1209_v56  ;;  %v883_v13 = vadd.f32 %v6449_v42, %v835_v7  ;;  %v836_v49 = vmul.f32 %v6442_v39, %v713_v48  ;;  %v5292_v50 = vpop.f32.mrb[35].mxu0  ;;  %v6592_v26 = vsel %vm2422_vm5, %v2440_v20, %v2444_v23 }
 0x12d   : > { %v6598_v53 = vsel %vm3322_vm6, %v3336_v25, %v3340_v27 }
 0x12e   : > { %v924_v59 = vmax.f32 %v883_v13, 0.0  ;;  %v884_v44 = vadd.f32 %v6449_v42, %v836_v49  ;;  %v1315_v57 = vshll.u32 %v6587_v2, 16  ;;  %v1319_v12 = vshrl.u32 %v6587_v2, 16  ;;  %7636 = vst [vmem:[#allocation5_spill] sm:$0xff] %v6598_v53 }
 0x130   : > { %v925_v54 = vmax.f32 %v884_v44, 0.0  ;;  %v1317_v56 = vrot.slane %v1315_v57, 1  ;;  %v2446_v62 = vrot.slane %v1319_v12, 1  ;;  %v2447_v50 = vrot.slane %v1315_v57, 2 }
 0x131   : > { %v718_v7 = vpop.f32.mrb[36].mxu0  ;;  %v3342_v45 = vrot.slane %v1319_v12, 2  ;;  %v1211_v20 = vmul.f32 %v6415_v28, %v924_v59  ;;  %v3343_v49 = vrot.slane %v1315_v57, 3 }
 0x132   : > { %v1212_v60 = vmul.f32 %v6417_v29, %v925_v54  ;;  %v837_v17 = vmul.f32 %v6442_v39, %v718_v7  ;;  %v5295_v48 = vpop.f32.mrb[37].mxu0  ;;  %v1318_v47 = vsel %vm1258_vm3, %v1313_v21, %v1317_v56  ;;  %v2448_v25 = vor.u32 %v2447_v50, %v2446_v62 }
 0x133   : > { %v721_v13 = vpop.f32.mrb[38].mxu0  ;;  %5355 = vmatprep.mubr.msk.bf16.mxu0 %vm1407_vm4, %v1318_v47  ;;  %v3344_v29 = vor.u32 %v3343_v49, %v3342_v45  ;;  %v1321_v50 = vor.u32 %v1319_v12, %v1317_v56 }
 0x134   : > { %v6605_v55 = vpack.c.bf16 %v1212_v60, %v1211_v20  ;;  %v885_v58 = vadd.f32 %v6449_v42, %v837_v17  ;;  %v838_v44 = vmul.f32 %v6442_v39, %v721_v13  ;;  %v5296_v53 = vpop.f32.mrb[39].mxu0  ;;  %v6610_v28 = vsel %vm2422_vm5, %v2444_v23, %v2448_v25 }
 0x135   : > { %v6616_v57 = vsel %vm3322_vm6, %v3340_v27, %v3344_v29 }
 0x136   : > { %v926_v59 = vmax.f32 %v885_v58, 0.0  ;;  %v886_v54 = vadd.f32 %v6449_v42, %v838_v44  ;;  %v1323_v21 = vshll.u32 %v6605_v55, 16  ;;  %v1327_v7 = vshrl.u32 %v6605_v55, 16  ;;  %7637 = vst [vmem:[#allocation6_spill] sm:$0xff] %v6616_v57 }
 0x138   : > { %v927_v62 = vmax.f32 %v886_v54, 0.0  ;;  %v1325_v20 = vrot.slane %v1323_v21, 1  ;;  %v2450_v60 = vrot.slane %v1327_v7, 1  ;;  %v2451_v53 = vrot.slane %v1323_v21, 2 }
 0x139   : > { %v726_v17 = vpop.f32.mrb[40].mxu0  ;;  %v3346_v48 = vrot.slane %v1327_v7, 2  ;;  %v1213_v23 = vmul.f32 %v6419_v1, %v926_v59  ;;  %v3347_v44 = vrot.slane %v1323_v21, 3 }
 0x13a   : > { %v1214_v45 = vmul.f32 %v6421_v30, %v927_v62  ;;  %v839_v47 = vmul.f32 %v6442_v39, %v726_v17  ;;  %v5299_v13 = vpop.f32.mrb[41].mxu0  ;;  %v1326_v49 = vsel %vm1258_vm3, %v1321_v50, %v1325_v20  ;;  %v2452_v27 = vor.u32 %v2451_v53, %v2450_v60 }
 0x13b   : > { %v729_v58 = vpop.f32.mrb[42].mxu0  ;;  %5356 = vmatmul.mubr.msk.bf16.gmra.mrb[96].mxu0 %vm1407_vm4, %v1326_v49  ;;  %v3348_v30 = vor.u32 %v3347_v44, %v3346_v48  ;;  %v1329_v53 = vor.u32 %v1327_v7, %v1325_v20 }
 0x13c   : > { %v6623_v12 = vpack.c.bf16 %v1214_v45, %v1213_v23  ;;  %v887_v56 = vadd.f32 %v6449_v42, %v839_v47  ;;  %v840_v54 = vmul.f32 %v6442_v39, %v729_v58  ;;  %v5300_v57 = vpop.f32.mrb[43].mxu0  ;;  %v6628_v1 = vsel %vm2422_vm5, %v2448_v25, %v2452_v27 }
 0x13d   : > { %v6634_v21 = vsel %vm3322_vm6, %v3344_v29, %v3348_v30 }
 0x13e   : > { %v928_v59 = vmax.f32 %v887_v56, 0.0  ;;  %v888_v62 = vadd.f32 %v6449_v42, %v840_v54  ;;  %v1331_v50 = vshll.u32 %v6623_v12, 16  ;;  %v1335_v17 = vshrl.u32 %v6623_v12, 16  ;;  %7638 = vst [vmem:[#allocation7_spill] sm:$0xff] %v6634_v21 }
 0x140   : > { %v929_v60 = vmax.f32 %v888_v62, 0.0  ;;  %v1333_v23 = vrot.slane %v1331_v50, 1  ;;  %v2454_v45 = vrot.slane %v1335_v17, 1  ;;  %v2455_v57 = vrot.slane %v1331_v50, 2 }
 0x141   : > { %v734_v47 = vpop.f32.mrb[44].mxu0  ;;  %v3350_v13 = vrot.slane %v1335_v17, 2  ;;  %v1215_v25 = vmul.f32 %v6423_v31, %v928_v59  ;;  %v3351_v54 = vrot.slane %v1331_v50, 3 }
 0x142   : > { %v1216_v48 = vmul.f32 %v6425_v32, %v929_v60  ;;  %v841_v49 = vmul.f32 %v6442_v39, %v734_v47  ;;  %v5303_v58 = vpop.f32.mrb[45].mxu0  ;;  %v1334_v44 = vsel %vm1258_vm3, %v1329_v53, %v1333_v23  ;;  %v2456_v29 = vor.u32 %v2455_v57, %v2454_v45 }
 0x143   : > { %v737_v56 = vpop.f32.mrb[46].mxu0  ;;  %5359 = vmatprep.mubr.msk.bf16.mxu0 %vm1407_vm4, %v1334_v44  ;;  %v3352_v32 = vor.u32 %v3351_v54, %v3350_v13  ;;  %v1337_v57 = vor.u32 %v1335_v17, %v1333_v23 }
 0x144   : > { %v6641_v7 = vpack.c.bf16 %v1216_v48, %v1215_v25  ;;  %v889_v20 = vadd.f32 %v6449_v42, %v841_v49  ;;  %v842_v62 = vmul.f32 %v6442_v39, %v737_v56  ;;  %v5304_v21 = vpop.f32.mrb[47].mxu0  ;;  %v6646_v31 = vsel %vm2422_vm5, %v2452_v27, %v2456_v29 }
 0x145   : > { %v6652_v50 = vsel %vm3322_vm6, %v3348_v30, %v3352_v32 }
 0x146   : > { %v930_v59 = vmax.f32 %v889_v20, 0.0  ;;  %v890_v60 = vadd.f32 %v6449_v42, %v842_v62  ;;  %v1339_v53 = vshll.u32 %v6641_v7, 16  ;;  %v1343_v47 = vshrl.u32 %v6641_v7, 16  ;;  %7639 = vst [vmem:[#allocation8_spill] sm:$0xff] %v6652_v50 }
 0x148   : > { %v931_v45 = vmax.f32 %v890_v60, 0.0  ;;  %v1341_v25 = vrot.slane %v1339_v53, 1  ;;  %v2458_v48 = vrot.slane %v1343_v47, 1  ;;  %v2459_v21 = vrot.slane %v1339_v53, 2 }
 0x149   : > { %v742_v49 = vpop.f32.mrb[48].mxu0  ;;  %v3354_v58 = vrot.slane %v1343_v47, 2  ;;  %v1217_v27 = vmul.f32 %v6427_v33, %v930_v59  ;;  %v3355_v62 = vrot.slane %v1339_v53, 3 }
 0x14a   : > { %v1218_v13 = vmul.f32 %v6429_v34, %v931_v45  ;;  %v843_v44 = vmul.f32 %v6442_v39, %v742_v49  ;;  %v5307_v56 = vpop.f32.mrb[49].mxu0  ;;  %v1342_v54 = vsel %vm1258_vm3, %v1337_v57, %v1341_v25  ;;  %v2460_v30 = vor.u32 %v2459_v21, %v2458_v48 }
 0x14b   : > { %v745_v20 = vpop.f32.mrb[50].mxu0  ;;  %5360 = vmatmul.mubr.msk.bf16.gmra.mrb[100].mxu0 %vm1407_vm4, %v1342_v54  ;;  %v3356_v34 = vor.u32 %v3355_v62, %v3354_v58  ;;  %v1345_v21 = vor.u32 %v1343_v47, %v1341_v25 }
 0x14c   : > { %v6659_v17 = vpack.c.bf16 %v1218_v13, %v1217_v27  ;;  %v891_v23 = vadd.f32 %v6449_v42, %v843_v44  ;;  %v844_v60 = vmul.f32 %v6442_v39, %v745_v20  ;;  %v5308_v50 = vpop.f32.mrb[51].mxu0  ;;  %v6664_v33 = vsel %vm2422_vm5, %v2456_v29, %v2460_v30 }
 0x14d   : > { %7640 = vst [vmem:[#allocation9_spill] sm:$0xff] %v6664_v33  ;;  %v6670_v53 = vsel %vm3322_vm6, %v3352_v32, %v3356_v34 }
 0x14e   : > { %v932_v59 = vmax.f32 %v891_v23, 0.0  ;;  %v892_v45 = vadd.f32 %v6449_v42, %v844_v60  ;;  %v1347_v57 = vshll.u32 %v6659_v17, 16  ;;  %v1351_v49 = vshrl.u32 %v6659_v17, 16  ;;  %7641 = vst [vmem:[#allocation10_spill] sm:$0xff] %v6670_v53 }
 0x150   : > { %v933_v48 = vmax.f32 %v892_v45, 0.0  ;;  %v1349_v27 = vrot.slane %v1347_v57, 1  ;;  %v2462_v13 = vrot.slane %v1351_v49, 1  ;;  %v2463_v50 = vrot.slane %v1347_v57, 2 }
 0x151   : > { %v750_v44 = vpop.f32.mrb[52].mxu0  ;;  %v3358_v56 = vrot.slane %v1351_v49, 2  ;;  %v1219_v29 = vmul.f32 %v6431_v35, %v932_v59  ;;  %v3359_v60 = vrot.slane %v1347_v57, 3 }
 0x152   : > { %v1220_v58 = vmul.f32 %v6433_v36, %v933_v48  ;;  %v845_v54 = vmul.f32 %v6442_v39, %v750_v44  ;;  %v5311_v20 = vpop.f32.mrb[53].mxu0  ;;  %v1350_v62 = vsel %vm1258_vm3, %v1345_v21, %v1349_v27  ;;  %v2464_v32 = vor.u32 %v2463_v50, %v2462_v13 }
 0x153   : > { %v753_v23 = vpop.f32.mrb[54].mxu0  ;;  %5363 = vmatprep.mubr.msk.bf16.mxu0 %vm1407_vm4, %v1350_v62  ;;  %v3360_v36 = vor.u32 %v3359_v60, %v3358_v56  ;;  %v1353_v50 = vor.u32 %v1351_v49, %v1349_v27 }
 0x154   : > { %v6677_v47 = vpack.c.bf16 %v1220_v58, %v1219_v29  ;;  %v893_v25 = vadd.f32 %v6449_v42, %v845_v54  ;;  %v846_v45 = vmul.f32 %v6442_v39, %v753_v23  ;;  %v5312_v53 = vpop.f32.mrb[55].mxu0  ;;  %v6682_v35 = vsel %vm2422_vm5, %v2460_v30, %v2464_v32 }
 0x155   : > { %7642 = vst [vmem:[#allocation11_spill] sm:$0xff] %v6682_v35  ;;  %v6688_v57 = vsel %vm3322_vm6, %v3356_v34, %v3360_v36 }
 0x156   : > { %v934_v59 = vmax.f32 %v893_v25, 0.0  ;;  %v894_v48 = vadd.f32 %v6449_v42, %v846_v45  ;;  %v1355_v21 = vshll.u32 %v6677_v47, 16  ;;  %v1359_v44 = vshrl.u32 %v6677_v47, 16  ;;  %7643 = vst [vmem:[#allocation12_spill] sm:$0xff] %v6688_v57 }
 0x158   : > { %v935_v13 = vmax.f32 %v894_v48, 0.0  ;;  %v1357_v29 = vrot.slane %v1355_v21, 1  ;;  %v2466_v58 = vrot.slane %v1359_v44, 1  ;;  %v2467_v53 = vrot.slane %v1355_v21, 2 }
 0x159   : > { %v758_v54 = vpop.f32.mrb[56].mxu0  ;;  %v3362_v20 = vrot.slane %v1359_v44, 2  ;;  %v1221_v30 = vmul.f32 %v6435_v37, %v934_v59  ;;  %v3363_v45 = vrot.slane %v1355_v21, 3 }
 0x15a   : > { %v1222_v56 = vmul.f32 %v6437_v38, %v935_v13  ;;  %v847_v62 = vmul.f32 %v6442_v39, %v758_v54  ;;  %v5315_v23 = vpop.f32.mrb[57].mxu0  ;;  %v1358_v60 = vsel %vm1258_vm3, %v1353_v50, %v1357_v29  ;;  %v2468_v34 = vor.u32 %v2467_v53, %v2466_v58 }
 0x15b   : > { %v761_v25 = vpop.f32.mrb[58].mxu0  ;;  %5364 = vmatmul.mubr.msk.bf16.gmra.mrb[104].mxu0 %vm1407_vm4, %v1358_v60  ;;  %v3364_v38 = vor.u32 %v3363_v45, %v3362_v20  ;;  %v1361_v53 = vor.u32 %v1359_v44, %v1357_v29 }
 0x15c   : > { %v6695_v49 = vpack.c.bf16 %v1222_v56, %v1221_v30  ;;  %v895_v27 = vadd.f32 %v6449_v42, %v847_v62  ;;  %v848_v48 = vmul.f32 %v6442_v39, %v761_v25  ;;  %v5316_v57 = vpop.f32.mrb[59].mxu0  ;;  %v6700_v37 = vsel %vm2422_vm5, %v2464_v32, %v2468_v34 }
 0x15d   : > { %7644 = vst [vmem:[#allocation13_spill] sm:$0xff] %v6700_v37  ;;  %v6706_v21 = vsel %vm3322_vm6, %v3360_v36, %v3364_v38 }
 0x15e   : > { %v936_v59 = vmax.f32 %v895_v27, 0.0  ;;  %v896_v13 = vadd.f32 %v6449_v42, %v848_v48  ;;  %v1363_v50 = vshll.u32 %v6695_v49, 16  ;;  %v1367_v54 = vshrl.u32 %v6695_v49, 16  ;;  %7645 = vst [vmem:[#allocation14_spill] sm:$0xff] %v6706_v21 }
 0x160   : > { %v937_v58 = vmax.f32 %v896_v13, 0.0  ;;  %v1365_v30 = vrot.slane %v1363_v50, 1  ;;  %v2470_v56 = vrot.slane %v1367_v54, 1  ;;  %v2471_v57 = vrot.slane %v1363_v50, 2 }
 0x161   : > { %v766_v62 = vpop.f32.mrb[60].mxu0  ;;  %v3366_v23 = vrot.slane %v1367_v54, 2  ;;  %v1223_v32 = vmul.f32 %v6349_v63, %v936_v59  ;;  %v3367_v48 = vrot.slane %v1363_v50, 3 }
 0x162   : > { %v1224_v20 = vmul.f32 %v6356_v3, %v937_v58  ;;  %v849_v60 = vmul.f32 %v6442_v39, %v766_v62  ;;  %v5319_v25 = vpop.f32.mrb[61].mxu0  ;;  %v1366_v45 = vsel %vm1258_vm3, %v1361_v53, %v1365_v30  ;;  %v2472_v36 = vor.u32 %v2471_v57, %v2470_v56 }
 0x163   : > { %v769_v27 = vpop.f32.mrb[62].mxu0  ;;  %5367 = vmatprep.mubr.msk.bf16.mxu0 %vm1407_vm4, %v1366_v45  ;;  %v3368_v3 = vor.u32 %v3367_v48, %v3366_v23  ;;  %v1369_v57 = vor.u32 %v1367_v54, %v1365_v30 }
 0x164   : > { %v6713_v44 = vpack.c.bf16 %v1224_v20, %v1223_v32  ;;  %v897_v29 = vadd.f32 %v6449_v42, %v849_v60  ;;  %v850_v13 = vmul.f32 %v6442_v39, %v769_v27  ;;  %v5320_v21 = vpop.f32.mrb[63].mxu0  ;;  %v6718_v63 = vsel %vm2422_vm5, %v2468_v34, %v2472_v36 }
 0x165   : > { %7646 = vst [vmem:[#allocation15_spill] sm:$0xff] %v6718_v63  ;;  %v6724_v50 = vsel %vm3322_vm6, %v3364_v38, %v3368_v3 }
 0x166   : > { %v938_v59 = vmax.f32 %v897_v29, 0.0  ;;  %v898_v58 = vadd.f32 %v6449_v42, %v850_v13  ;;  %v1371_v53 = vshll.u32 %v6713_v44, 16  ;;  %v1375_v62 = vshrl.u32 %v6713_v44, 16  ;;  %7647 = vst [vmem:[#allocation16_spill] sm:$0xff] %v6724_v50 }
 0x168   : > { %v939_v56 = vmax.f32 %v898_v58, 0.0  ;;  %v1373_v32 = vrot.slane %v1371_v53, 1  ;;  %v2474_v60 = vrot.slane %v1375_v62, 1  ;;  %v2475_v21 = vrot.slane %v1371_v53, 2 }
 0x169   : > { %v774_v20 = vpop.f32.mrb[64].mxu0  ;;  %v3370_v25 = vrot.slane %v1375_v62, 2  ;;  %v1225_v34 = vmul.f32 %v6353_v0, %v938_v59  ;;  %v3371_v13 = vrot.slane %v1371_v53, 3  ;;  %v7630_v0 = vrot.slane %v6713_v44, 1 }
 0x16a   : > { %v1226_v23 = vmul.f32 %v6358_v4, %v939_v56  ;;  %v851_v45 = vmul.f32 %v6442_v39, %v774_v20  ;;  %v5323_v27 = vpop.f32.mrb[65].mxu0  ;;  %v1374_v48 = vsel %vm1258_vm3, %v1369_v57, %v1373_v32  ;;  %v2476_v38 = vor.u32 %v2475_v21, %v2474_v60 }
 0x16b   : > { %v777_v29 = vpop.f32.mrb[66].mxu0  ;;  %5368 = vmatmul.mubr.msk.bf16.gmra.mrb[108].mxu0 %vm1407_vm4, %v1374_v48  ;;  %v3372_v59 = vor.u32 %v3371_v13, %v3370_v25  ;;  %v1377_v25 = vor.u32 %v1375_v62, %v1373_v32 }
 0x16c   : > { %v6731_v54 = vpack.c.bf16 %v1226_v23, %v1225_v34  ;;  %v899_v30 = vadd.f32 %v6449_v42, %v851_v45  ;;  %v852_v58 = vmul.f32 %v6442_v39, %v777_v29  ;;  %v5324_v50 = vpop.f32.mrb[67].mxu0  ;;  %v6737_v4 = vsel %vm2422_vm5, %v2472_v36, %v2476_v38 }
 0x16d   : > { %7648 = vst [vmem:[#allocation17_spill] sm:$0xff] %v6737_v4  ;;  %v6744_v21 = vsel %vm3322_vm6, %v3368_v3, %v3372_v59 }
 0x16e   : > { %v940_v56 = vmax.f32 %v899_v30, 0.0  ;;  %v900_v57 = vadd.f32 %v6449_v42, %v852_v58  ;;  %v1910_v20 = vrot.slane %v6731_v54, 1  ;;  %v1379_v53 = vshll.u32 %v6731_v54, 16  ;;  %7649 = vst [vmem:[#allocation18_spill] sm:$0xff] %v6744_v21 }
 0x16f   : > { %v1383_v60 = vshrl.u32 %v6731_v54, 16 }
 0x170   : > { %v941_v50 = vmax.f32 %v900_v57, 0.0  ;;  %v6749_v36 = vsel %vm1880_vm7, %v7630_v0, %v1910_v20  ;;  %v1381_v34 = vrot.slane %v1379_v53, 1  ;;  %v2479_v27 = vrot.slane %v1379_v53, 2 }
 0x171   : > { %v782_v23 = vpop.f32.mrb[68].mxu0  ;;  %5447 = vmatprep.mubr.msk.bf16.mxu1 %vm1407_vm4, %v6749_v36  ;;  %v2478_v45 = vrot.slane %v1383_v60, 1  ;;  %v3374_v48 = vrot.slane %v1383_v60, 2  ;;  %v1227_v29 = vmul.f32 %v6361_v5, %v940_v56  ;;  %v3375_v32 = vrot.slane %v1379_v53, 3 }
 0x172   : > { %v1228_v3 = vmul.f32 %v6365_v6, %v941_v50  ;;  %v853_v13 = vmul.f32 %v6442_v39, %v782_v23  ;;  %v5327_v30 = vpop.f32.mrb[69].mxu0  ;;  %v1382_v58 = vsel %vm1258_vm3, %v1377_v25, %v1381_v34  ;;  %v2205_v53 = vsel %vm1462_vm2, %v6499_v14, 0 }
 0x173   : > { %v785_v57 = vpop.f32.mrb[70].mxu0  ;;  %5371 = vmatprep.mubr.msk.bf16.mxu0 %vm1407_vm4, %v1382_v58  ;;  %v2480_v62 = vor.u32 %v2479_v27, %v2478_v45  ;;  %v3376_v6 = vor.u32 %v3375_v32, %v3374_v48  ;;  %v1385_v48 = vor.u32 %v1383_v60, %v1381_v34 }
 0x174   : > { %v6758_v0 = vpack.c.bf16 %v1228_v3, %v1227_v29  ;;  %v901_v21 = vadd.f32 %v6449_v42, %v853_v13  ;;  %v854_v4 = vmul.f32 %v6442_v39, %v785_v57  ;;  %v5328_v63 = vpop.f32.mrb[71].mxu0 }
 0x175   : > { %v6763_v5 = vsel %vm2422_vm5, %v2476_v38, %v2480_v62  ;;  %v6772_v27 = vsel %vm3322_vm6, %v3372_v59, %v3376_v6 }
 0x176   : > { %7650 = vst [vmem:[#allocation19_spill] sm:$0xff] %v6763_v5  ;;  %v942_v56 = vmax.f32 %v901_v21, 0.0  ;;  %v902_v50 = vadd.f32 %v6449_v42, %v854_v4  ;;  %v1912_v25 = vrot.slane %v6758_v0, 1  ;;  %v1387_v23 = vshll.u32 %v6758_v0, 16  ;;  %7651 = vst [vmem:[#allocation20_spill] sm:$0xff] %v6772_v27 }
 0x177   : > { %v1391_v45 = vshrl.u32 %v6758_v0, 16  ;;  %v6780_v4 = vld [vmem:[%s7623_s5 + $0x10] sm:$0xf] }
 0x178   : > { %v943_v63 = vmax.f32 %v902_v50, 0.0  ;;  %v6775_v38 = vsel %vm1880_vm7, %v1910_v20, %v1912_v25  ;;  %v1389_v21 = vrot.slane %v1387_v23, 1  ;;  %v2483_v3 = vrot.slane %v1387_v23, 2 }
 0x179   : > { %v790_v29 = vpop.f32.mrb[72].mxu0  ;;  %5448 = vmatmul.mubr.msk.bf16.vlgmr.msra.gmra.mrb[0].mxu1 %vm1407_vm4, %v6775_v38  ;;  %v2482_v14 = vrot.slane %v1391_v45, 1  ;;  %v3378_v13 = vrot.slane %v1391_v45, 2  ;;  %v1229_v59 = vmul.f32 %v6368_v8, %v942_v56  ;;  %v3379_v32 = vrot.slane %v1387_v23, 3 }
 0x17a   : > { %v1230_v30 = vmul.f32 %v6370_v9, %v943_v63  ;;  %v855_v20 = vmul.f32 %v6442_v39, %v790_v29  ;;  %v5331_v60 = vpop.f32.mrb[73].mxu0  ;;  %v1390_v34 = vsel %vm1258_vm3, %v1385_v48, %v1389_v21  ;;  %5456 = vmatpush3.bf16.msra.mxu1 %v2205_v53  ;;  %v1884_v63 = vrot.slane %v6492_v51, 1 }
 0x17b   : > { %v793_v58 = vpop.f32.mrb[74].mxu0  ;;  %5372 = vmatmul.mubr.msk.bf16.gmra.mrb[112].mxu0 %vm1407_vm4, %v1390_v34  ;;  %6016 = vmatprep.subr.msk.bf16.mxu1 %vm1462_vm2, %v6780_v4  ;;  %v2484_v57 = vor.u32 %v2483_v3, %v2482_v14  ;;  %v3380_v53 = vor.u32 %v3379_v32, %v3378_v13  ;;  %v1393_v14 = vor.u32 %v1391_v45, %v1389_v21  ;;  %v7631_v45 = vrot.slane %v6479_v52, 1 }
 0x17c   : > { %v6791_v50 = vpack.c.bf16 %v1230_v30, %v1229_v59  ;;  %v903_v8 = vadd.f32 %v6449_v42, %v855_v20  ;;  %v856_v9 = vmul.f32 %v6442_v39, %v793_v58  ;;  %v5332_v56 = vpop.f32.mrb[75].mxu0  ;;  %v7632_v59 = vrot.slane %v6511_v16, 1 }
 0x17d   : > { %v6797_v48 = vsel %vm2422_vm5, %v2480_v62, %v2484_v57  ;;  %v6805_v39 = vsel %vm3322_vm6, %v3376_v6, %v3380_v53 }
 0x17e   : > { %7652 = vst [vmem:[#allocation21_spill] sm:$0xff] %v6797_v48  ;;  %v944_v29 = vmax.f32 %v903_v8, 0.0  ;;  %v904_v60 = vadd.f32 %v6449_v42, %v856_v9  ;;  %v1914_v34 = vrot.slane %v6791_v50, 1  ;;  %v1395_v23 = vshll.u32 %v6791_v50, 16  ;;  %7653 = vst [vmem:[#allocation22_spill] sm:$0xff] %v6805_v39 }
 0x17f   : > { %v1399_v3 = vshrl.u32 %v6791_v50, 16 }
 0x180   : > { %v1231_v30 = vmul.f32 %v6373_v10, %v944_v29  ;;  %v945_v62 = vmax.f32 %v904_v60, 0.0  ;;  %v6809_v13 = vsel %vm1880_vm7, %v1912_v25, %v1914_v34  ;;  %v1397_v20 = vrot.slane %v1395_v23, 1  ;;  %v6060_v10 = vld [vmem:[%s7621_s3] ss:$0 sm:$0xff] }
 0x181   : > { %v798_v42 = vpop.f32.mrb[76].mxu0  ;;  %5451 = vmatprep.mubr.msk.bf16.mxu1 %vm1407_vm4, %v6809_v13  ;;  %v2486_v21 = vrot.slane %v1399_v3, 1  ;;  %v2487_v58 = vrot.slane %v1395_v23, 2  ;;  %v3382_v32 = vrot.slane %v1399_v3, 2  ;;  %v6823_v60 = vsel %vm1880_vm7, %v7631_v45, %v1884_v63 }
 0x182   : > { %v1255_v8 = vpack.c.bf16 %v1231_v30, %v1231_v30  ;;  %v1232_v6 = vmul.f32 %v6444_v40, %v945_v62  ;;  %v857_v9 = vmul.f32 %v6060_v10, %v798_v42  ;;  %v5335_v25 = vpop.f32.mrb[77].mxu0  ;;  %v1398_v56 = vsel %vm1258_vm3, %v1393_v14, %v1397_v20  ;;  %v6061_v14 = vld [vmem:[%s7622_s4] ss:$0 sm:$0xff] }
 0x183   : > { %v801_v29 = vpop.f32.mrb[78].mxu0  ;;  %5375 = vmatprep.mubr.msk.bf16.mxu0 %vm1407_vm4, %v1398_v56  ;;  %v6828_v40 = vsel %vm1880_vm7, %v1884_v63, %v7632_v59  ;;  %v2488_v62 = vor.u32 %v2487_v58, %v2486_v21  ;;  %v3383_v39 = vrot.slane %v1395_v23, 3  ;;  %v1888_v45 = vrot.slane %v6533_v18, 1 }
 0x184   : > { %v6830_v27 = vpack.c.bf16 %v1232_v6, %v1231_v30  ;;  %v905_v42 = vadd.f32 %v6061_v14, %v857_v9  ;;  %v858_v25 = vmul.f32 %v6060_v10, %v801_v29  ;;  %v1916_v56 = vrot.slane %v1255_v8, 1  ;;  %v5336_v48 = vpop.f32.mrb[79].mxu0  ;;  %v1188_v29 = vpop.permute.xlu1 %1187 }
 0x185   : > { %v1403_v5 = vshll.u32 %v1255_v8, 16  ;;  %v6837_v37 = vsel %vm2422_vm5, %v2484_v57, %v2488_v62  ;;  %v3384_v63 = vor.u32 %v3383_v39, %v3382_v32  ;;  %v1401_v58 = vor.u32 %v1399_v3, %v1397_v20 }
 0x186   : > { %7654 = vst [vmem:[#allocation23_spill] sm:$0xff] %v6837_v37  ;;  %v946_v59 = vmax.f32 %v905_v42, 0.0  ;;  %v906_v21 = vadd.f32 %v6061_v14, %v858_v25  ;;  %v1917_v23 = vsel %vm1880_vm7, %v1914_v34, %v1916_v56  ;;  %v2194_v30 = vrot.slane %v6830_v27, 1 }
 0x187   : > { %5452 = vmatmul.mubr.msk.bf16.gmra.mrb[4].mxu1 %vm1407_vm4, %v1917_v23  ;;  %v1405_v6 = vrot.slane %v1403_v5, 1  ;;  %v2491_v48 = vshrl.u32 %v6830_v27, 16  ;;  %v2494_v8 = vshll.u32 %v6830_v27, 16  ;;  %v6851_v32 = vsel %vm3322_vm6, %v3380_v53, %v3384_v63 }
 0x188   : > { %v1233_v9 = vmul.f32 %v6451_v43, %v946_v59  ;;  %v947_v57 = vmax.f32 %v906_v21, 0.0  ;;  %5457 = vmatprep.mubr.msk.bf16.mxu1 %vm1407_vm4, %v6823_v60  ;;  %v6848_v39 = vsel %vm1880_vm7, %v1914_v34, %v2194_v30  ;;  %7655 = vst [vmem:[#allocation24_spill] sm:$0xff] %v6851_v32  ;;  %v2563_v3 = vsel %vm1462_vm2, %v6780_v4, 0 }
 0x189   : > { %v806_v42 = vpop.f32.mrb[80].mxu0  ;;  %v1406_v5 = vsel %vm1258_vm3, %v1401_v58, %v1405_v6  ;;  %v2493_v20 = vrot.slane %v2491_v48, 1  ;;  %v2496_v25 = vrot.slane %v2494_v8, 2  ;;  %v3386_v34 = vrot.slane %v2491_v48, 2 }
 0x18a   : > { %v2189_v43 = vpack.c.bf16 %v1233_v9, %v1233_v9  ;;  %v1234_v59 = vmul.f32 %v1188_v29, %v947_v57  ;;  %v859_v56 = vmul.f32 %v6060_v10, %v806_v42  ;;  %5376 = vmatmul.mubr.msk.bf16.gmra.mrb[116].mxu0 %vm1407_vm4, %v1406_v5  ;;  %v5339_v21 = vpop.f32.mrb[81].mxu0  ;;  %v7656_v53 = vrot.slane %v6511_v16, 1 }
 0x18b   : > { %5381 = vmatprep.mubr.msk.bf16.mxu0 %vm1407_vm4, %v6458_v61  ;;  %v2497_v4 = vor.u32 %v2496_v25, %v2493_v20  ;;  %v6867_v58 = vrot.slane %v6830_v27, 2  ;;  %v809_v6 = vpop.f32.mrb[82].mxu0  ;;  %v3387_v10 = vrot.slane %v2494_v8, 3  ;;  %v6878_v20 = vld [vmem:[%s7623_s5 + $0x14] sm:$0xf] }
 0x18c   : > { %v6864_v23 = vsel %vm1880_vm7, %v7656_v53, %v1888_v45  ;;  %v3088_v57 = vpack.c.bf16 %v1234_v59, %v1233_v9  ;;  %v907_v29 = vadd.f32 %v6061_v14, %v859_v56  ;;  %v2196_v42 = vrot.slane %v2189_v43, 1  ;;  %v5340_v5 = vpop.f32.mrb[83].mxu0  ;;  %v1193_v9 = vpop.permute.xlu0 %1192 }
 0x18d   : > { %v2500_v48 = vshrl.u32 %v2189_v43, 16  ;;  %v6870_v21 = vsel %vm2422_vm5, %v2488_v62, %v2497_v4  ;;  %v2503_v32 = vshll.u32 %v2189_v43, 16  ;;  %v2816_v37 = vrot.slane %v2189_v43, 2 }
 0x18e   : > { %v3388_v35 = vor.u32 %v3387_v10, %v3386_v34  ;;  %v948_v33 = vmax.f32 %v907_v29, 0.0  ;;  %v6873_v53 = vsel %vm1880_vm7, %v2194_v30, %v2196_v42  ;;  %v3094_v14 = vrot.slane %v3088_v57, 2 }
 0x18f   : > { %v2502_v8 = vrot.slane %v2500_v48, 1  ;;  %5458 = vmatmul.mubr.msk.bf16.vlgmr.msra.gmra.mrb[8].mxu1 %vm1407_vm4, %v6828_v40  ;;  %v2505_v62 = vrot.slane %v2503_v32, 2  ;;  %v6884_v25 = vsel %vm2780_vm8, %v6867_v58, %v2816_v37  ;;  %v3391_v30 = vshrl.u32 %v3088_v57, 16 }
 0x190   : > { %v6887_v43 = vsel %vm3322_vm6, %v3384_v63, %v3388_v35  ;;  %v1235_v59 = vmul.f32 %v1193_v9, %v948_v33  ;;  %5494 = vmatpush3.bf16.msra.mxu1 %v2563_v3  ;;  %5461 = vmatprep.mubr.msk.bf16.mxu1 %vm1407_vm4, %v6864_v23  ;;  %v1890_v56 = vrot.slane %v6551_v11, 1  ;;  %v6894_v34 = vsel %vm2780_vm8, %v6867_v58, %v3094_v14 }
 0x191   : > { %v3394_v32 = vshll.u32 %v3088_v57, 16  ;;  %6017 = vmatprep.subr.msk.bf16.mxu1 %vm1462_vm2, %v6878_v20  ;;  %v2506_v37 = vor.u32 %v2505_v62, %v2502_v8  ;;  %v3393_v6 = vrot.slane %v3391_v30, 2  ;;  %v3712_v63 = vrot.slane %v6830_v27, 3  ;;  %v7328_v27 = vld [vmem:[%s7625_s7] ss:$0 sm:$0xff] }
 0x192   : > { %v3714_v10 = vrot.slane %v3088_v57, 3  ;;  %v3089_v33 = vpack.c.bf16 %v1235_v59, %v1235_v59  ;;  %5382 = vmatmul.mubr.msk.bf16.vlgmr.msra.gmra.mrb[84].mxu0 %vm1407_vm4, %v6479_v52  ;;  %v1892_v29 = vrot.slane %v6569_v46, 1  ;;  %v6916_v62 = vsel %vm1880_vm7, %v1888_v45, %v1890_v56 }
 0x193   : > { %v3396_v3 = vrot.slane %v3394_v32, 3  ;;  %5385 = vmatprep.mubr.msk.bf16.mxu0 %vm1407_vm4, %v6492_v51  ;;  %5418 = vmatpush3.bf16.msra.mxu0 %v6472_v41  ;;  %v6906_v42 = vsel %vm2422_vm5, %v2497_v4, %v2506_v37 }
 0x194   : > { %v6911_v57 = vsel %vm3680_vm9, %v3712_v63, %v3714_v10  ;;  %v3096_v48 = vrot.slane %v3089_v33, 2  ;;  %v3400_v8 = vshrl.u32 %v3089_v33, 16  ;;  %v3403_v9 = vshll.u32 %v3089_v33, 16 }
 0x195   : > { %v3397_v5 = vor.u32 %v3396_v3, %v3393_v6  ;;  %v3716_v30 = vrot.slane %v3089_v33, 3  ;;  %v6927_v37 = vsel %vm1880_vm7, %v1890_v56, %v1892_v29  ;;  %v1896_v56 = vrot.slane %v6605_v55, 1 }
 0x196   : > { %v6919_v41 = vsel %vm2780_vm8, %v3094_v14, %v3096_v48  ;;  %v3402_v59 = vrot.slane %v3400_v8, 2  ;;  %v3405_v32 = vrot.slane %v3403_v9, 3  ;;  %v1898_v3 = vrot.slane %v6623_v12, 1 }
 0x197   : > { %v6922_v4 = vsel %vm3322_vm6, %v3388_v35, %v3397_v5  ;;  %5462 = vmatmul.mubr.msk.bf16.gmra.mrb[12].mxu1 %vm1407_vm4, %v6916_v62  ;;  %v6930_v6 = vsel %vm3680_vm9, %v3714_v10, %v3716_v30  ;;  %v1894_v35 = vrot.slane %v6587_v2, 1  ;;  %v1900_v48 = vrot.slane %v6641_v7, 1 }
 0x198   : > { %5465 = vmatprep.mubr.msk.bf16.mxu1 %vm1407_vm4, %v6927_v37  ;;  %v3406_v45 = vor.u32 %v3405_v32, %v3402_v59  ;;  %v1902_v8 = vrot.slane %v6659_v17, 1  ;;  %v1904_v9 = vrot.slane %v6677_v47, 1  ;;  %v1906_v32 = vrot.slane %v6695_v49, 1 }
 0x199   : > { %v1895_v10 = vsel %vm1880_vm7, %v1892_v29, %v1894_v35  ;;  %v1897_v33 = vsel %vm1880_vm7, %v1894_v35, %v1896_v56  ;;  %v1901_v29 = vsel %vm1880_vm7, %v1898_v3, %v1900_v48  ;;  %v7657_v35 = vrot.slane %v6713_v44, 1 }
 0x19a   : > { %5386 = vmatmul.mubr.msk.bf16.gmra.mrb[88].mxu0 %vm1407_vm4, %v6511_v16  ;;  %v6938_v14 = vsel %vm3322_vm6, %v3397_v5, %v3406_v45  ;;  %v1899_v5 = vsel %vm1880_vm7, %v1896_v56, %v1898_v3  ;;  %v1903_v30 = vsel %vm1880_vm7, %v1900_v48, %v1902_v8  ;;  %v1905_v59 = vsel %vm1880_vm7, %v1902_v8, %v1904_v9 }
 0x19b   : > { %5389 = vmatprep.mubr.msk.bf16.mxu0 %vm1407_vm4, %v6533_v18  ;;  %v1907_v45 = vsel %vm1880_vm7, %v1904_v9, %v1906_v32  ;;  %v1909_v56 = vsel %vm1880_vm7, %v1906_v32, %v7657_v35  ;;  %v2792_v48 = vrot.slane %v6587_v2, 2  ;;  %v2796_v9 = vrot.slane %v6623_v12, 2 }
 0x19c   : > { %v2802_v35 = vrot.slane %v6677_v47, 2 }
 0x19f   : > { %5466 = vmatmul.mubr.msk.bf16.gmra.mrb[16].mxu1 %vm1407_vm4, %v1895_v10 }
 0x1a0   : > { %5469 = vmatprep.mubr.msk.bf16.mxu1 %vm1407_vm4, %v1897_v33 }
 0x1a2   : > { %5390 = vmatmul.mubr.msk.bf16.gmra.mrb[92].mxu0 %vm1407_vm4, %v6551_v11 }
 0x1a3   : > { %5393 = vmatprep.mubr.msk.bf16.mxu0 %vm1407_vm4, %v6569_v46 }
 0x1a7   : > { %5470 = vmatmul.mubr.msk.bf16.gmra.mrb[20].mxu1 %vm1407_vm4, %v1899_v5 }
 0x1a8   : > { %5473 = vmatprep.mubr.msk.bf16.mxu1 %vm1407_vm4, %v1901_v29 }
 0x1aa   : > { %5394 = vmatmul.mubr.msk.bf16.gmra.mrb[96].mxu0 %vm1407_vm4, %v6587_v2 }
 0x1ab   : > { %5397 = vmatprep.mubr.msk.bf16.mxu0 %vm1407_vm4, %v6605_v55 }
 0x1af   : > { %5474 = vmatmul.mubr.msk.bf16.gmra.mrb[24].mxu1 %vm1407_vm4, %v1903_v30 }
 0x1b0   : > { %5477 = vmatprep.mubr.msk.bf16.mxu1 %vm1407_vm4, %v1905_v59 }
 0x1b2   : > { %5398 = vmatmul.mubr.msk.bf16.gmra.mrb[100].mxu0 %vm1407_vm4, %v6623_v12 }
 0x1b3   : > { %5401 = vmatprep.mubr.msk.bf16.mxu0 %vm1407_vm4, %v6641_v7 }
 0x1b7   : > { %5478 = vmatmul.mubr.msk.bf16.gmra.mrb[28].mxu1 %vm1407_vm4, %v1907_v45 }
 0x1b8   : > { %5481 = vmatprep.mubr.msk.bf16.mxu1 %vm1407_vm4, %v1909_v56 }
 0x1ba   : > { %5402 = vmatmul.mubr.msk.bf16.gmra.mrb[104].mxu0 %vm1407_vm4, %v6659_v17 }
 0x1bb   : > { %5405 = vmatprep.mubr.msk.bf16.mxu0 %vm1407_vm4, %v6677_v47 }
 0x1bf   : > { %5482 = vmatmul.mubr.msk.bf16.gmra.mrb[32].mxu1 %vm1407_vm4, %v6749_v36  ;;  %v1881_v36 = vrot.slane %v6458_v61, 1  ;;  %v7659_v61 = vld [vmem:[#allocation9_spill] sm:$0xff] }
 0x1c0   : > { %5485 = vmatprep.mubr.msk.bf16.mxu1 %vm1407_vm4, %v6775_v38  ;;  %v7658_v38 = vrot.slane %v6479_v52, 1 }
 0x1c2   : > { %5406 = vmatmul.mubr.msk.bf16.gmra.mrb[108].mxu0 %vm1407_vm4, %v6695_v49 }
 0x1c3   : > { %5409 = vmatprep.mubr.msk.bf16.mxu0 %vm1407_vm4, %v6713_v44 }
 0x1c7   : > { %5486 = vmatmul.mubr.msk.bf16.gmra.mrb[0].mxu1 %vm1407_vm4, %v6809_v13  ;;  %v1883_v13 = vsel %vm1880_vm7, %v1881_v36, %v7658_v38  ;;  %v2804_v38 = vrot.slane %v6695_v49, 2 }
 0x1c8   : > { %5489 = vmatprep.mubr.msk.bf16.mxu1 %vm1407_vm4, %v6848_v39  ;;  %v2873_v39 = vsel %vm1462_vm2, %v6878_v20, 0  ;;  %v2786_v20 = vrot.slane %v6533_v18, 2 }
 0x1ca   : > { %5410 = vmatmul.mubr.msk.bf16.gmra.mrb[112].mxu0 %vm1407_vm4, %v6731_v54 }
 0x1cb   : > { %5413 = vmatprep.mubr.msk.bf16.mxu0 %vm1407_vm4, %v6758_v0 }
 0x1cf   : > { %5490 = vmatmul.mubr.msk.bf16.gmra.mrb[4].mxu1 %vm1407_vm4, %v6873_v53  ;;  %v4887_v53 = vld [vmem:[%s7623_s5 + $0x18] sm:$0xf] }
 0x1d0   : > { %5495 = vmatprep.mubr.msk.bf16.mxu1 %vm1407_vm4, %v6519_v15  ;;  %v7660_v15 = vld [vmem:[#allocation11_spill] sm:$0xff] }
 0x1d2   : > { %5414 = vmatmul.mubr.msk.bf16.gmra.mrb[116].mxu0 %vm1407_vm4, %v6791_v50 }
 0x1d3   : > { %5419 = vmatprep.mubr.msk.bf16.mxu0 %vm1407_vm4, %v1883_v13  ;;  %v2806_v13 = vrot.slane %v6713_v44, 2 }
 0x1d7   : > { %5496 = vmatmul.mubr.msk.bf16.vlgmr.msra.gmra.mrb[8].mxu1 %vm1407_vm4, %v6538_v19  ;;  %v7661_v19 = vld [vmem:[#allocation13_spill] sm:$0xff] }
 0x1d8   : > { %5532 = vmatpush3.bf16.msra.mxu1 %v2873_v39  ;;  %5499 = vmatprep.mubr.msk.bf16.mxu1 %vm1407_vm4, %v6556_v22  ;;  %v7662_v22 = vld [vmem:[#allocation15_spill] sm:$0xff]  ;;  %v2805_v39 = vsel %vm2780_vm8, %v2802_v35, %v2804_v38 }
 0x1d9   : > { %6018 = vmatprep.subr.msk.bf16.mxu1 %vm1462_vm2, %v4887_v53 }
 0x1da   : > { %5420 = vmatmul.mubr.msk.bf16.vlgmr.msra.gmra.mrb[84].mxu0 %vm1407_vm4, %v6823_v60  ;;  %v2781_v60 = vrot.slane %v6479_v52, 2 }
 0x1db   : > { %5423 = vmatprep.mubr.msk.bf16.mxu0 %vm1407_vm4, %v6828_v40 }
 0x1df   : > { %5500 = vmatmul.mubr.msk.bf16.gmra.mrb[12].mxu1 %vm1407_vm4, %v6574_v24  ;;  %v7663_v24 = vld [vmem:[#allocation17_spill] sm:$0xff] }
 0x1e0   : > { %5503 = vmatprep.mubr.msk.bf16.mxu1 %vm1407_vm4, %v6592_v26  ;;  %v7664_v26 = vld [vmem:[#allocation19_spill] sm:$0xff] }
 0x1e2   : > { %5424 = vmatmul.mubr.msk.bf16.gmra.mrb[88].mxu0 %vm1407_vm4, %v6864_v23  ;;  %v2784_v23 = vrot.slane %v6511_v16, 2 }
 0x1e3   : > { %5427 = vmatprep.mubr.msk.bf16.mxu0 %vm1407_vm4, %v6916_v62  ;;  %v3105_v62 = vsel %vm1462_vm2, %v4887_v53, 0  ;;  %v2807_v53 = vsel %vm2780_vm8, %v2804_v38, %v2806_v13 }
 0x1e4   : > { %v2787_v52 = vsel %vm2780_vm8, %v2784_v23, %v2786_v20 }
 0x1e7   : > { %5504 = vmatmul.mubr.msk.bf16.gmra.mrb[16].mxu1 %vm1407_vm4, %v6610_v28  ;;  %v7665_v28 = vld [vmem:[#allocation21_spill] sm:$0xff] }
 0x1e8   : > { %5507 = vmatprep.mubr.msk.bf16.mxu1 %vm1407_vm4, %v6628_v1  ;;  %v7666_v1 = vld [vmem:[#allocation23_spill] sm:$0xff] }
 0x1ea   : > { %5428 = vmatmul.mubr.msk.bf16.gmra.mrb[92].mxu0 %vm1407_vm4, %v6927_v37 }
 0x1eb   : > { %5431 = vmatprep.mubr.msk.bf16.mxu0 %vm1407_vm4, %v1895_v10  ;;  %v2790_v10 = vrot.slane %v6569_v46, 2 }
 0x1ef   : > { %5508 = vmatmul.mubr.msk.bf16.gmra.mrb[20].mxu1 %vm1407_vm4, %v6646_v31  ;;  %v2782_v31 = vrot.slane %v6492_v51, 2 }
 0x1f0   : > { %5511 = vmatprep.mubr.msk.bf16.mxu1 %vm1407_vm4, %v7659_v61  ;;  %v2808_v61 = vrot.slane %v6731_v54, 2 }
 0x1f1   : > { %v2783_v40 = vsel %vm2780_vm8, %v2781_v60, %v2782_v31  ;;  %v2785_v37 = vsel %vm2780_vm8, %v2782_v31, %v2784_v23  ;;  %v4925_v31 = vld [vmem:[%s7623_s5 + $0x20] sm:$0xf] }
 0x1f2   : > { %5432 = vmatmul.mubr.msk.bf16.gmra.mrb[96].mxu0 %vm1407_vm4, %v1897_v33 }
 0x1f3   : > { %5435 = vmatprep.mubr.msk.bf16.mxu0 %vm1407_vm4, %v1899_v5  ;;  %v2794_v5 = vrot.slane %v6605_v55, 2 }
 0x1f5   : > { %v2795_v8 = vsel %vm2780_vm8, %v2792_v48, %v2794_v5 }
 0x1f7   : > { %5512 = vmatmul.mubr.msk.bf16.gmra.mrb[24].mxu1 %vm1407_vm4, %v7660_v15  ;;  %v2810_v15 = vrot.slane %v6758_v0, 2 }
 0x1f8   : > { %5515 = vmatprep.mubr.msk.bf16.mxu1 %vm1407_vm4, %v7661_v19  ;;  %v2809_v19 = vsel %vm2780_vm8, %v2806_v13, %v2808_v61  ;;  %v7673_v13 = vld [vmem:[#allocation8_spill] sm:$0xff] }
 0x1fa   : > { %5436 = vmatmul.mubr.msk.bf16.gmra.mrb[100].mxu0 %vm1407_vm4, %v1901_v29  ;;  %v2793_v29 = vsel %vm2780_vm8, %v2790_v10, %v2792_v48 }
 0x1fb   : > { %5439 = vmatprep.mubr.msk.bf16.mxu0 %vm1407_vm4, %v1903_v30  ;;  %v2798_v30 = vrot.slane %v6641_v7, 2 }
 0x1fd   : > { %v2799_v32 = vsel %vm2780_vm8, %v2796_v9, %v2798_v30 }
 0x1ff   : > { %5516 = vmatmul.mubr.msk.bf16.gmra.mrb[28].mxu1 %vm1407_vm4, %v7662_v22  ;;  %v2811_v22 = vsel %vm2780_vm8, %v2808_v61, %v2810_v15 }
 0x200   : > { %5519 = vmatprep.mubr.msk.bf16.mxu1 %vm1407_vm4, %v7663_v24  ;;  %v2812_v24 = vrot.slane %v6791_v50, 2 }
 0x202   : > { %5440 = vmatmul.mubr.msk.bf16.gmra.mrb[104].mxu0 %vm1407_vm4, %v1905_v59  ;;  %v2797_v59 = vsel %vm2780_vm8, %v2794_v5, %v2796_v9  ;;  %v4128_v9 = vld [vmem:[%s7626_s8] sm:$0xf] }
 0x203   : > { %5443 = vmatprep.mubr.msk.bf16.mxu0 %vm1407_vm4, %v1907_v45  ;;  %v2800_v45 = vrot.slane %v6659_v17, 2  ;;  %6021 = vmatprep.subr.msk.bf16.mxu0 %vm1462_vm2, %v4128_v9 }
 0x205   : > { %v2803_v36 = vsel %vm2780_vm8, %v2800_v45, %v2802_v35 }
 0x207   : > { %5520 = vmatmul.mubr.msk.bf16.gmra.mrb[32].mxu1 %vm1407_vm4, %v7664_v26  ;;  %v2813_v26 = vsel %vm2780_vm8, %v2810_v15, %v2812_v24  ;;  %v7674_v15 = vld [vmem:[#allocation10_spill] sm:$0xff] }
 0x208   : > { %5523 = vmatprep.mubr.msk.bf16.mxu1 %vm1407_vm4, %v7665_v28  ;;  %v2815_v28 = vsel %vm2780_vm8, %v2812_v24, %v6867_v58 }
 0x20a   : > { %5444 = vmatmul.mubr.msk.bf16.gmra.mrb[108].mxu0 %vm1407_vm4, %v1909_v56  ;;  %v2801_v56 = vsel %vm2780_vm8, %v2798_v30, %v2800_v45 }
 0x20f   : > { %5524 = vmatmul.mubr.msk.bf16.gmra.mrb[0].mxu1 %vm1407_vm4, %v7666_v1 }
 0x210   : > { %5527 = vmatprep.mubr.msk.bf16.mxu1 %vm1407_vm4, %v6870_v21  ;;  %v4906_v21 = vld [vmem:[%s7623_s5 + $0x1c] sm:$0xf] }
 0x211   : > { %v3463_v1 = vsel %vm1462_vm2, %v4906_v21, 0 }
 0x217   : > { %5528 = vmatmul.mubr.msk.bf16.gmra.mrb[4].mxu1 %vm1407_vm4, %v6906_v42  ;;  %v2788_v42 = vrot.slane %v6551_v11, 2 }
 0x218   : > { %5533 = vmatprep.mubr.msk.bf16.mxu1 %vm1407_vm4, %v2783_v40 }
 0x219   : > { %v2789_v33 = vsel %vm2780_vm8, %v2786_v20, %v2788_v42  ;;  %v2791_v3 = vsel %vm2780_vm8, %v2788_v42, %v2790_v10  ;;  %v3773_v42 = vsel %vm1462_vm2, %v4925_v31, 0 }
 0x21f   : > { %5534 = vmatmul.mubr.msk.bf16.vlgmr.msra.gmra.mrb[8].mxu1 %vm1407_vm4, %v2785_v37 }
 0x220   : > { %5570 = vmatpush3.bf16.msra.mxu1 %v3105_v62  ;;  %5537 = vmatprep.mubr.msk.bf16.mxu1 %vm1407_vm4, %v2787_v52 }
 0x221   : > { %6019 = vmatprep.subr.msk.bf16.mxu1 %vm1462_vm2, %v4906_v21  ;;  %v7667_v21 = vld [vmem:[#allocation2_spill] sm:$0xff] }
 0x227   : > { %5538 = vmatmul.mubr.msk.bf16.gmra.mrb[12].mxu1 %vm1407_vm4, %v2789_v33 }
 0x228   : > { %5541 = vmatprep.mubr.msk.bf16.mxu1 %vm1407_vm4, %v2791_v3 }
 0x22f   : > { %5542 = vmatmul.mubr.msk.bf16.gmra.mrb[16].mxu1 %vm1407_vm4, %v2793_v29 }
 0x230   : > { %5545 = vmatprep.mubr.msk.bf16.mxu1 %vm1407_vm4, %v2795_v8 }
 0x237   : > { %5546 = vmatmul.mubr.msk.bf16.gmra.mrb[20].mxu1 %vm1407_vm4, %v2797_v59 }
 0x238   : > { %5549 = vmatprep.mubr.msk.bf16.mxu1 %vm1407_vm4, %v2799_v32 }
 0x23f   : > { %5550 = vmatmul.mubr.msk.bf16.gmra.mrb[24].mxu1 %vm1407_vm4, %v2801_v56 }
 0x240   : > { %5553 = vmatprep.mubr.msk.bf16.mxu1 %vm1407_vm4, %v2803_v36 }
 0x247   : > { %5554 = vmatmul.mubr.msk.bf16.gmra.mrb[28].mxu1 %vm1407_vm4, %v2805_v39 }
 0x248   : > { %5557 = vmatprep.mubr.msk.bf16.mxu1 %vm1407_vm4, %v2807_v53 }
 0x24f   : > { %5558 = vmatmul.mubr.msk.bf16.gmra.mrb[32].mxu1 %vm1407_vm4, %v2809_v19 }
 0x250   : > { %5561 = vmatprep.mubr.msk.bf16.mxu1 %vm1407_vm4, %v2811_v22 }
 0x257   : > { %5562 = vmatmul.mubr.msk.bf16.gmra.mrb[0].mxu1 %vm1407_vm4, %v2813_v26 }
 0x258   : > { %5565 = vmatprep.mubr.msk.bf16.mxu1 %vm1407_vm4, %v2815_v28 }
 0x25f   : > { %5566 = vmatmul.mubr.msk.bf16.gmra.mrb[4].mxu1 %vm1407_vm4, %v6884_v25 }
 0x260   : > { %5571 = vmatprep.mubr.msk.bf16.mxu1 %vm1407_vm4, %v2785_v37 }
 0x267   : > { %5572 = vmatmul.mubr.msk.bf16.vlgmr.msra.gmra.mrb[8].mxu1 %vm1407_vm4, %v2787_v52 }
 0x268   : > { %5608 = vmatpush3.bf16.msra.mxu1 %v3463_v1  ;;  %5575 = vmatprep.mubr.msk.bf16.mxu1 %vm1407_vm4, %v2789_v33  ;;  %v7668_v33 = vld [vmem:[#allocation3_spill] sm:$0xff]  ;;  %v7676_v1 = vld [vmem:[#allocation14_spill] sm:$0xff] }
 0x269   : > { %6020 = vmatprep.subr.msk.bf16.mxu1 %vm1462_vm2, %v4925_v31 }
 0x26f   : > { %5576 = vmatmul.mubr.msk.bf16.gmra.mrb[12].mxu1 %vm1407_vm4, %v2791_v3 }
 0x270   : > { %5579 = vmatprep.mubr.msk.bf16.mxu1 %vm1407_vm4, %v2793_v29 }
 0x277   : > { %5580 = vmatmul.mubr.msk.bf16.gmra.mrb[16].mxu1 %vm1407_vm4, %v2795_v8  ;;  %v7670_v8 = vld [vmem:[#allocation5_spill] sm:$0xff] }
 0x278   : > { %5583 = vmatprep.mubr.msk.bf16.mxu1 %vm1407_vm4, %v2797_v59  ;;  %v7671_v59 = vld [vmem:[#allocation6_spill] sm:$0xff] }
 0x27f   : > { %5584 = vmatmul.mubr.msk.bf16.gmra.mrb[20].mxu1 %vm1407_vm4, %v2799_v32  ;;  %v4184_v32 = vsel %vm1462_vm2, %v4128_v9, 0 }
 0x280   : > { %5587 = vmatprep.mubr.msk.bf16.mxu1 %vm1407_vm4, %v2801_v56  ;;  %5684 = vmatpush3.bf16.msra.mxu0 %v4184_v32 }
 0x287   : > { %5588 = vmatmul.mubr.msk.bf16.gmra.mrb[24].mxu1 %vm1407_vm4, %v2803_v36  ;;  %v7672_v36 = vld [vmem:[#allocation7_spill] sm:$0xff] }
 0x288   : > { %5591 = vmatprep.mubr.msk.bf16.mxu1 %vm1407_vm4, %v2805_v39 }
 0x28f   : > { %5592 = vmatmul.mubr.msk.bf16.gmra.mrb[28].mxu1 %vm1407_vm4, %v2807_v53 }
 0x290   : > { %5595 = vmatprep.mubr.msk.bf16.mxu1 %vm1407_vm4, %v2809_v19 }
 0x297   : > { %5596 = vmatmul.mubr.msk.bf16.gmra.mrb[32].mxu1 %vm1407_vm4, %v2811_v22  ;;  %v7675_v22 = vld [vmem:[#allocation12_spill] sm:$0xff] }
 0x298   : > { %5599 = vmatprep.mubr.msk.bf16.mxu1 %vm1407_vm4, %v2813_v26 }
 0x29d   : > { %v7146_v58 = vpop.f32.mrb[112].mxu0 }
 0x29e   : > { %v7148_v25 = vpop.f32.mrb[113].mxu0 }
 0x29f   : > { %v7150_v60 = vpop.f32.mrb[114].mxu0  ;;  %5600 = vmatmul.mubr.msk.bf16.gmra.mrb[0].mxu1 %vm1407_vm4, %v2815_v28 }
 0x2a0   : > { %v7153_v40 = vpop.f32.mrb[115].mxu0  ;;  %5603 = vmatprep.mubr.msk.bf16.mxu1 %vm1407_vm4, %v6894_v34 }
 0x2a5   : > { %v7157_v23 = vpop.f32.mrb[116].mxu0 }
 0x2a6   : > { %v7159_v20 = vpop.f32.mrb[117].mxu0 }
 0x2a7   : > { %v7161_v62 = vpop.f32.mrb[118].mxu0  ;;  %5604 = vmatmul.mubr.msk.bf16.gmra.mrb[4].mxu1 %vm1407_vm4, %v6919_v41  ;;  %v7669_v41 = vld [vmem:[#allocation4_spill] sm:$0xff] }
 0x2a8   : > { %v7165_v37 = vpop.f32.mrb[119].mxu0  ;;  %5609 = vmatprep.mubr.msk.bf16.mxu1 %vm1407_vm4, %v7667_v21  ;;  %v7677_v21 = vld [vmem:[#allocation16_spill] sm:$0xff] }
 0x2ad   : > { %v7169_v52 = vpop.f32.mrb[84].mxu0 }
 0x2ae   : > { %v7172_v10 = vpop.f32.mrb[85].mxu0 }
 0x2af   : > { %v7174_v34 = vpop.f32.mrb[86].mxu0  ;;  %5610 = vmatmul.mubr.msk.bf16.vlgmr.msra.gmra.mrb[8].mxu1 %vm1407_vm4, %v7668_v33 }
 0x2b0   : > { %v7178_v3 = vpop.f32.mrb[87].mxu0  ;;  %5646 = vmatpush3.bf16.msra.mxu1 %v3773_v42  ;;  %5613 = vmatprep.mubr.msk.bf16.mxu1 %vm1407_vm4, %v7669_v41 }
 0x2b5   : > { %v7182_v48 = vpop.f32.mrb[88].mxu0 }
 0x2b6   : > { %v7184_v5 = vpop.f32.mrb[89].mxu0 }
 0x2b7   : > { %v7186_v29 = vpop.f32.mrb[90].mxu0  ;;  %5614 = vmatmul.mubr.msk.bf16.gmra.mrb[12].mxu1 %vm1407_vm4, %v7670_v8  ;;  %v7678_v8 = vld [vmem:[#allocation18_spill] sm:$0xff] }
 0x2b8   : > { %v7193_v30 = vpop.f32.mrb[91].mxu0  ;;  %5617 = vmatprep.mubr.msk.bf16.mxu1 %vm1407_vm4, %v7671_v59  ;;  %v7679_v59 = vld [vmem:[#allocation20_spill] sm:$0xff] }
 0x2bd   : > { %v7199_v45 = vpop.f32.mrb[92].mxu0 }
 0x2be   : > { %v7201_v35 = vpop.f32.mrb[93].mxu0 }
 0x2bf   : > { %v7203_v56 = vpop.f32.mrb[94].mxu0  ;;  %5618 = vmatmul.mubr.msk.bf16.gmra.mrb[16].mxu1 %vm1407_vm4, %v7672_v36 }
 0x2c0   : > { %v7207_v38 = vpop.f32.mrb[95].mxu0  ;;  %5621 = vmatprep.mubr.msk.bf16.mxu1 %vm1407_vm4, %v7673_v13 }
 0x2c5   : > { %v7211_v39 = vpop.f32.mrb[96].mxu0 }
 0x2c6   : > { %v7213_v53 = vpop.f32.mrb[97].mxu0 }
 0x2c7   : > { %v7215_v61 = vpop.f32.mrb[98].mxu0  ;;  %5622 = vmatmul.mubr.msk.bf16.gmra.mrb[20].mxu1 %vm1407_vm4, %v7674_v15  ;;  %v7680_v15 = vld [vmem:[#allocation22_spill] sm:$0xff] }
 0x2c8   : > { %v7219_v19 = vpop.f32.mrb[99].mxu0  ;;  %5625 = vmatprep.mubr.msk.bf16.mxu1 %vm1407_vm4, %v7675_v22 }
 0x2cd   : > { %v7223_v24 = vpop.f32.mrb[100].mxu0 }
 0x2ce   : > { %v7225_v26 = vpop.f32.mrb[101].mxu0 }
 0x2cf   : > { %v7227_v28 = vpop.f32.mrb[102].mxu0  ;;  %5626 = vmatmul.mubr.msk.bf16.gmra.mrb[24].mxu1 %vm1407_vm4, %v7676_v1  ;;  %v7681_v1 = vld [vmem:[#allocation24_spill] sm:$0xff] }
 0x2d0   : > { %v7231_v31 = vpop.f32.mrb[103].mxu0  ;;  %5629 = vmatprep.mubr.msk.bf16.mxu1 %vm1407_vm4, %v7677_v21  ;;  %v3682_v21 = vrot.slane %v6511_v16, 3  ;;  %v3690_v16 = vrot.slane %v6587_v2, 3  ;;  %v3696_v2 = vrot.slane %v6641_v7, 3 }
 0x2d5   : > { %v7235_v42 = vpop.f32.mrb[104].mxu0 }
 0x2d6   : > { %v7237_v33 = vpop.f32.mrb[105].mxu0 }
 0x2d7   : > { %v7239_v41 = vpop.f32.mrb[106].mxu0  ;;  %5630 = vmatmul.mubr.msk.bf16.gmra.mrb[28].mxu1 %vm1407_vm4, %v7678_v8  ;;  %v3681_v8 = vrot.slane %v6492_v51, 3  ;;  %v3688_v51 = vrot.slane %v6569_v46, 3 }
 0x2d8   : > { %v7243_v9 = vpop.f32.mrb[107].mxu0  ;;  %5633 = vmatprep.mubr.msk.bf16.mxu1 %vm1407_vm4, %v7679_v59 }
 0x2d9   : > { %v3683_v59 = vsel %vm3680_vm9, %v3681_v8, %v3682_v21 }
 0x2dd   : > { %v7247_v32 = vpop.f32.mrb[108].mxu0 }
 0x2de   : > { %v7249_v36 = vpop.f32.mrb[109].mxu0 }
 0x2df   : > { %v7251_v13 = vpop.f32.mrb[110].mxu0  ;;  %5634 = vmatmul.mubr.msk.bf16.gmra.mrb[32].mxu1 %vm1407_vm4, %v7680_v15  ;;  %v3684_v15 = vrot.slane %v6533_v18, 3  ;;  %v3691_v18 = vsel %vm3680_vm9, %v3688_v51, %v3690_v16 }
 0x2e0   : > { %v7255_v22 = vpop.f32.mrb[111].mxu0  ;;  %5637 = vmatprep.mubr.msk.bf16.mxu1 %vm1407_vm4, %v7681_v1  ;;  %v3686_v1 = vrot.slane %v6551_v11, 3  ;;  %v3692_v11 = vrot.slane %v6605_v55, 3 }
 0x2e2   : > { %v3693_v8 = vsel %vm3680_vm9, %v3690_v16, %v3692_v11  ;;  %v3710_v16 = vrot.slane %v6791_v50, 3  ;;  %v7322_v50 = vld [vmem:[%s7624_s6] ss:$0 sm:$0xff] }
 0x2e7   : > { %5638 = vmatmul.mubr.msk.bf16.gmra.mrb[0].mxu1 %vm1407_vm4, %v6887_v43  ;;  %v3685_v43 = vsel %vm3680_vm9, %v3682_v21, %v3684_v15  ;;  %v3694_v21 = vrot.slane %v6623_v12, 3  ;;  %v3700_v12 = vrot.slane %v6677_v47, 3 }
 0x2e8   : > { %5641 = vmatprep.mubr.msk.bf16.mxu1 %vm1407_vm4, %v6922_v4  ;;  %v3687_v4 = vsel %vm3680_vm9, %v3684_v15, %v3686_v1 }
 0x2e9   : > { %v3695_v46 = vsel %vm3680_vm9, %v3692_v11, %v3694_v21  ;;  %v3697_v15 = vsel %vm3680_vm9, %v3694_v21, %v3696_v2 }
 0x2ef   : > { %5642 = vmatmul.mubr.msk.bf16.gmra.mrb[4].mxu1 %vm1407_vm4, %v6938_v14  ;;  %v3689_v14 = vsel %vm3680_vm9, %v3686_v1, %v3688_v51  ;;  %v3702_v1 = vrot.slane %v6695_v49, 3  ;;  %v3708_v49 = vrot.slane %v6758_v0, 3 }
 0x2f0   : > { %5647 = vmatprep.mubr.msk.bf16.mxu1 %vm1407_vm4, %v3683_v59  ;;  %v3698_v59 = vrot.slane %v6659_v17, 3  ;;  %v3704_v17 = vrot.slane %v6713_v44, 3 }
 0x2f1   : > { %v3703_v7 = vsel %vm3680_vm9, %v3700_v12, %v3702_v1  ;;  %v3711_v44 = vsel %vm3680_vm9, %v3708_v49, %v3710_v16 }
 0x2f2   : > { %v3699_v55 = vsel %vm3680_vm9, %v3696_v2, %v3698_v59  ;;  %v3705_v51 = vsel %vm3680_vm9, %v3702_v1, %v3704_v17 }
 0x2f7   : > { %5648 = vmatmul.mubr.msk.bf16.vlgmr.msra.gmra.mrb[8].mxu1 %vm1407_vm4, %v3685_v43  ;;  %v3701_v43 = vsel %vm3680_vm9, %v3698_v59, %v3700_v12 }
 0x2f8   : > { %5651 = vmatprep.mubr.msk.bf16.mxu1 %vm1407_vm4, %v3687_v4  ;;  %v3706_v4 = vrot.slane %v6731_v54, 3  ;;  %v3713_v54 = vsel %vm3680_vm9, %v3710_v16, %v3712_v63 }
 0x2fa   : > { %v3707_v47 = vsel %vm3680_vm9, %v3704_v17, %v3706_v4 }
 0x2ff   : > { %5652 = vmatmul.mubr.msk.bf16.gmra.mrb[12].mxu1 %vm1407_vm4, %v3689_v14  ;;  %v3709_v14 = vsel %vm3680_vm9, %v3706_v4, %v3708_v49 }
 0x300   : > { %5655 = vmatprep.mubr.msk.bf16.mxu1 %vm1407_vm4, %v3691_v18 }
 0x307   : > { %5656 = vmatmul.mubr.msk.bf16.gmra.mrb[16].mxu1 %vm1407_vm4, %v3693_v8 }
 0x308   : > { %5659 = vmatprep.mubr.msk.bf16.mxu1 %vm1407_vm4, %v3695_v46 }
 0x30f   : > { %5660 = vmatmul.mubr.msk.bf16.gmra.mrb[20].mxu1 %vm1407_vm4, %v3697_v15 }
 0x310   : > { %5663 = vmatprep.mubr.msk.bf16.mxu1 %vm1407_vm4, %v3699_v55 }
 0x317   : > { %5664 = vmatmul.mubr.msk.bf16.gmra.mrb[24].mxu1 %vm1407_vm4, %v3701_v43 }
 0x318   : > { %5667 = vmatprep.mubr.msk.bf16.mxu1 %vm1407_vm4, %v3703_v7 }
 0x31f   : > { %5668 = vmatmul.mubr.msk.bf16.gmra.mrb[28].mxu1 %vm1407_vm4, %v3705_v51 }
 0x320   : > { %5671 = vmatprep.mubr.msk.bf16.mxu1 %vm1407_vm4, %v3707_v47 }
 0x327   : > { %5672 = vmatmul.mubr.msk.bf16.gmra.mrb[32].mxu1 %vm1407_vm4, %v3709_v14 }
 0x328   : > { %5675 = vmatprep.mubr.msk.bf16.mxu1 %vm1407_vm4, %v3711_v44 }
 0x32f   : > { %5676 = vmatmul.mubr.msk.bf16.gmra.mrb[0].mxu1 %vm1407_vm4, %v3713_v54 }
 0x330   : > { %5679 = vmatprep.mubr.msk.bf16.mxu1 %vm1407_vm4, %v6911_v57 }
 0x337   : > { %5680 = vmatmul.mubr.msk.bf16.gmra.mrb[4].mxu1 %vm1407_vm4, %v6930_v6 }
 0x3ca   : > { %v5649_v0 = vpop.f32.mrb[8].mxu1 }
 0x3cb   : > { %v5723_v18 = vadd.f32 %v5649_v0, %v7169_v52  ;;  %v3809_v11 = vpop.f32.mrb[9].mxu1 }
 0x3cc   : > { %v5724_v63 = vadd.f32 %v3809_v11, %v7172_v10  ;;  %v5650_v57 = vpop.f32.mrb[10].mxu1 }
 0x3cd   : > { %v3997_v21 = vmul.f32 %v5723_v18, %v7322_v50  ;;  %v5725_v6 = vadd.f32 %v5650_v57, %v7174_v34  ;;  %v3812_v8 = vpop.f32.mrb[11].mxu1 }
 0x3ce   : > { %v3995_v46 = vmul.f32 %v5724_v63, %v7322_v50  ;;  %v5726_v2 = vadd.f32 %v3812_v8, %v7178_v3 }
 0x3cf   : > { %v4040_v52 = vadd.f32 %v7328_v27, %v3997_v21  ;;  %v3998_v59 = vmul.f32 %v5725_v6, %v7322_v50 }
 0x3d0   : > { %v4038_v15 = vadd.f32 %v7328_v27, %v3995_v46  ;;  %v3996_v55 = vmul.f32 %v5726_v2, %v7322_v50 }
 0x3d1   : > { %v4041_v10 = vadd.f32 %v7328_v27, %v3998_v59  ;;  %v4076_v43 = vmax.f32 %v4040_v52, 0.0 }
 0x3d2   : > { %v4039_v12 = vadd.f32 %v7328_v27, %v3996_v55  ;;  %v5653_v1 = vpop.f32.mrb[12].mxu1  ;;  %v4074_v4 = vmax.f32 %v4038_v15, 0.0 }
 0x3d3   : > { %v4077_v34 = vmax.f32 %v4041_v10, 0.0  ;;  %v5727_v7 = vadd.f32 %v5653_v1, %v7182_v48  ;;  %v3825_v17 = vpop.f32.mrb[13].mxu1 }
 0x3d4   : > { %v4075_v3 = vmax.f32 %v4039_v12, 0.0  ;;  %v5728_v51 = vadd.f32 %v3825_v17, %v7184_v5  ;;  %v5654_v47 = vpop.f32.mrb[14].mxu1 }
 0x3d5   : > { %v4111_v49 = vpack.c.bf16 %v4077_v34, %v4076_v43  ;;  %v4001_v16 = vmul.f32 %v5727_v7, %v7322_v50  ;;  %v5729_v14 = vadd.f32 %v5654_v47, %v7186_v29  ;;  %v3828_v44 = vpop.f32.mrb[15].mxu1 }
 0x3d6   : > { %v4110_v54 = vpack.c.bf16 %v4075_v3, %v4074_v4  ;;  %v3999_v0 = vmul.f32 %v5728_v51, %v7322_v50  ;;  %v5730_v18 = vadd.f32 %v3828_v44, %v7193_v30 }
 0x3d7   : > { %v4044_v11 = vadd.f32 %v7328_v27, %v4001_v16  ;;  %v4002_v48 = vmul.f32 %v5729_v14, %v7322_v50 }
 0x3d8   : > { %v4042_v63 = vadd.f32 %v7328_v27, %v3999_v0  ;;  %v4000_v5 = vmul.f32 %v5730_v18, %v7322_v50  ;;  %5685 = vmatprep.mubr.msk.bf16.mxu0 %vm1407_vm4, %v4110_v54 }
 0x3d9   : > { %v4045_v57 = vadd.f32 %v7328_v27, %v4002_v48  ;;  %5686 = vmatmul.mubr.msk.bf16.vlgmr.msra.gmra.mrb[120].mxu0 %vm1407_vm4, %v4111_v49  ;;  %v4080_v6 = vmax.f32 %v4044_v11, 0.0 }
 0x3da   : > { %v4043_v29 = vadd.f32 %v7328_v27, %v4000_v5  ;;  %v5657_v21 = vpop.f32.mrb[16].mxu1  ;;  %v4078_v2 = vmax.f32 %v4042_v63, 0.0 }
 0x3db   : > { %v4081_v8 = vmax.f32 %v4045_v57, 0.0  ;;  %v5731_v30 = vadd.f32 %v5657_v21, %v7199_v45  ;;  %v3841_v46 = vpop.f32.mrb[17].mxu1 }
 0x3dc   : > { %v4079_v52 = vmax.f32 %v4043_v29, 0.0  ;;  %v5732_v59 = vadd.f32 %v3841_v46, %v7201_v35  ;;  %v5658_v15 = vpop.f32.mrb[18].mxu1 }
 0x3dd   : > { %v4113_v55 = vpack.c.bf16 %v4081_v8, %v4080_v6  ;;  %v4005_v10 = vmul.f32 %v5731_v30, %v7322_v50  ;;  %v5733_v12 = vadd.f32 %v5658_v15, %v7203_v56  ;;  %v3844_v1 = vpop.f32.mrb[19].mxu1 }
 0x3de   : > { %v4112_v43 = vpack.c.bf16 %v4079_v52, %v4078_v2  ;;  %v4003_v34 = vmul.f32 %v5732_v59, %v7322_v50  ;;  %v5734_v7 = vadd.f32 %v3844_v1, %v7207_v38 }
 0x3df   : > { %v4048_v17 = vadd.f32 %v7328_v27, %v4005_v10  ;;  %v4006_v45 = vmul.f32 %v5733_v12, %v7322_v50 }
 0x3e0   : > { %v4046_v4 = vadd.f32 %v7328_v27, %v4003_v34  ;;  %v4004_v35 = vmul.f32 %v5734_v7, %v7322_v50  ;;  %5689 = vmatprep.mubr.msk.bf16.mxu0 %vm1407_vm4, %v4112_v43 }
 0x3e1   : > { %v4049_v3 = vadd.f32 %v7328_v27, %v4006_v45  ;;  %5690 = vmatmul.mubr.msk.bf16.gmra.mrb[124].mxu0 %vm1407_vm4, %v4113_v55  ;;  %v4084_v47 = vmax.f32 %v4048_v17, 0.0 }
 0x3e2   : > { %v4047_v56 = vadd.f32 %v7328_v27, %v4004_v35  ;;  %v5661_v51 = vpop.f32.mrb[20].mxu1  ;;  %v4082_v14 = vmax.f32 %v4046_v4, 0.0 }
 0x3e3   : > { %v4085_v49 = vmax.f32 %v4049_v3, 0.0  ;;  %v5735_v38 = vadd.f32 %v5661_v51, %v7211_v39  ;;  %v3857_v16 = vpop.f32.mrb[21].mxu1 }
 0x3e4   : > { %v4083_v44 = vmax.f32 %v4047_v56, 0.0  ;;  %v5736_v54 = vadd.f32 %v3857_v16, %v7213_v53  ;;  %v5662_v0 = vpop.f32.mrb[22].mxu1 }
 0x3e5   : > { %v4115_v18 = vpack.c.bf16 %v4085_v49, %v4084_v47  ;;  %v4009_v11 = vmul.f32 %v5735_v38, %v7322_v50  ;;  %v5737_v48 = vadd.f32 %v5662_v0, %v7215_v61  ;;  %v3860_v63 = vpop.f32.mrb[23].mxu1 }
 0x3e6   : > { %v4114_v5 = vpack.c.bf16 %v4083_v44, %v4082_v14  ;;  %v4007_v57 = vmul.f32 %v5736_v54, %v7322_v50  ;;  %v5738_v29 = vadd.f32 %v3860_v63, %v7219_v19 }
 0x3e7   : > { %v4052_v21 = vadd.f32 %v7328_v27, %v4009_v11  ;;  %v4010_v39 = vmul.f32 %v5737_v48, %v7322_v50 }
 0x3e8   : > { %v4050_v6 = vadd.f32 %v7328_v27, %v4007_v57  ;;  %v4008_v53 = vmul.f32 %v5738_v29, %v7322_v50  ;;  %5693 = vmatprep.mubr.msk.bf16.mxu0 %vm1407_vm4, %v4114_v5 }
 0x3e9   : > { %v4053_v8 = vadd.f32 %v7328_v27, %v4010_v39  ;;  %5694 = vmatmul.mubr.msk.bf16.gmra.mrb[128].mxu0 %vm1407_vm4, %v4115_v18  ;;  %v4088_v46 = vmax.f32 %v4052_v21, 0.0 }
 0x3ea   : > { %v4051_v61 = vadd.f32 %v7328_v27, %v4008_v53  ;;  %v5665_v30 = vpop.f32.mrb[24].mxu1  ;;  %v4086_v59 = vmax.f32 %v4050_v6, 0.0 }
 0x3eb   : > { %v4089_v2 = vmax.f32 %v4053_v8, 0.0  ;;  %v5739_v19 = vadd.f32 %v5665_v30, %v7223_v24  ;;  %v3873_v52 = vpop.f32.mrb[25].mxu1 }
 0x3ec   : > { %v4087_v15 = vmax.f32 %v4051_v61, 0.0  ;;  %v5740_v55 = vadd.f32 %v3873_v52, %v7225_v26  ;;  %v5666_v10 = vpop.f32.mrb[26].mxu1 }
 0x3ed   : > { %v4117_v12 = vpack.c.bf16 %v4089_v2, %v4088_v46  ;;  %v4013_v1 = vmul.f32 %v5739_v19, %v7322_v50  ;;  %v5741_v43 = vadd.f32 %v5666_v10, %v7227_v28  ;;  %v3876_v34 = vpop.f32.mrb[27].mxu1 }
 0x3ee   : > { %v4116_v7 = vpack.c.bf16 %v4087_v15, %v4086_v59  ;;  %v4011_v17 = vmul.f32 %v5740_v55, %v7322_v50  ;;  %v5742_v45 = vadd.f32 %v3876_v34, %v7231_v31 }
 0x3ef   : > { %v4056_v4 = vadd.f32 %v7328_v27, %v4013_v1  ;;  %v4014_v24 = vmul.f32 %v5741_v43, %v7322_v50 }
 0x3f0   : > { %v4054_v35 = vadd.f32 %v7328_v27, %v4011_v17  ;;  %v4012_v26 = vmul.f32 %v5742_v45, %v7322_v50  ;;  %5697 = vmatprep.mubr.msk.bf16.mxu0 %vm1407_vm4, %v4116_v7 }
 0x3f1   : > { %v4057_v3 = vadd.f32 %v7328_v27, %v4014_v24  ;;  %5698 = vmatmul.mubr.msk.bf16.gmra.mrb[132].mxu0 %vm1407_vm4, %v4117_v12  ;;  %v4092_v51 = vmax.f32 %v4056_v4, 0.0 }
 0x3f2   : > { %v4055_v28 = vadd.f32 %v7328_v27, %v4012_v26  ;;  %v5669_v56 = vpop.f32.mrb[28].mxu1  ;;  %v4090_v38 = vmax.f32 %v4054_v35, 0.0 }
 0x3f3   : > { %v4093_v47 = vmax.f32 %v4057_v3, 0.0  ;;  %v5743_v31 = vadd.f32 %v5669_v56, %v7235_v42  ;;  %v3889_v49 = vpop.f32.mrb[29].mxu1 }
 0x3f4   : > { %v4091_v16 = vmax.f32 %v4055_v28, 0.0  ;;  %v5744_v14 = vadd.f32 %v3889_v49, %v7237_v33  ;;  %v5670_v44 = vpop.f32.mrb[30].mxu1 }
 0x3f5   : > { %v4119_v54 = vpack.c.bf16 %v4093_v47, %v4092_v51  ;;  %v4017_v0 = vmul.f32 %v5743_v31, %v7322_v50  ;;  %v5745_v18 = vadd.f32 %v5670_v44, %v7239_v41  ;;  %v3892_v11 = vpop.f32.mrb[31].mxu1 }
 0x3f6   : > { %v4118_v48 = vpack.c.bf16 %v4091_v16, %v4090_v38  ;;  %v4015_v63 = vmul.f32 %v5744_v14, %v7322_v50  ;;  %v5746_v5 = vadd.f32 %v3892_v11, %v7243_v9 }
 0x3f7   : > { %v4060_v57 = vadd.f32 %v7328_v27, %v4017_v0  ;;  %v4018_v42 = vmul.f32 %v5745_v18, %v7322_v50 }
 0x3f8   : > { %v4058_v29 = vadd.f32 %v7328_v27, %v4015_v63  ;;  %v4016_v33 = vmul.f32 %v5746_v5, %v7322_v50  ;;  %5701 = vmatprep.mubr.msk.bf16.mxu0 %vm1407_vm4, %v4118_v48 }
 0x3f9   : > { %v4061_v21 = vadd.f32 %v7328_v27, %v4018_v42  ;;  %5702 = vmatmul.mubr.msk.bf16.gmra.mrb[136].mxu0 %vm1407_vm4, %v4119_v54  ;;  %v4096_v6 = vmax.f32 %v4060_v57, 0.0 }
 0x3fa   : > { %v4059_v41 = vadd.f32 %v7328_v27, %v4016_v33  ;;  %v5673_v39 = vpop.f32.mrb[32].mxu1  ;;  %v4094_v61 = vmax.f32 %v4058_v29, 0.0 }
 0x3fb   : > { %v4097_v53 = vmax.f32 %v4061_v21, 0.0  ;;  %v5747_v9 = vadd.f32 %v5673_v39, %v7247_v32  ;;  %v3905_v8 = vpop.f32.mrb[33].mxu1 }
 0x3fc   : > { %v4095_v30 = vmax.f32 %v4059_v41, 0.0  ;;  %v5748_v46 = vadd.f32 %v3905_v8, %v7249_v36  ;;  %v5674_v2 = vpop.f32.mrb[34].mxu1 }
 0x3fd   : > { %v4121_v19 = vpack.c.bf16 %v4097_v53, %v4096_v6  ;;  %v4021_v52 = vmul.f32 %v5747_v9, %v7322_v50  ;;  %v5749_v59 = vadd.f32 %v5674_v2, %v7251_v13  ;;  %v3908_v15 = vpop.f32.mrb[35].mxu1 }
 0x3fe   : > { %v4120_v55 = vpack.c.bf16 %v4095_v30, %v4094_v61  ;;  %v4019_v10 = vmul.f32 %v5748_v46, %v7322_v50  ;;  %v5750_v12 = vadd.f32 %v3908_v15, %v7255_v22 }
 0x3ff   : > { %v4064_v1 = vadd.f32 %v7328_v27, %v4021_v52  ;;  %v4022_v32 = vmul.f32 %v5749_v59, %v7322_v50 }
 0x400   : > { %v4062_v43 = vadd.f32 %v7328_v27, %v4019_v10  ;;  %v4020_v36 = vmul.f32 %v5750_v12, %v7322_v50  ;;  %5705 = vmatprep.mubr.msk.bf16.mxu0 %vm1407_vm4, %v4120_v55 }
 0x401   : > { %v4065_v34 = vadd.f32 %v7328_v27, %v4022_v32  ;;  %5706 = vmatmul.mubr.msk.bf16.gmra.mrb[140].mxu0 %vm1407_vm4, %v4121_v19  ;;  %v4100_v17 = vmax.f32 %v4064_v1, 0.0 }
 0x402   : > { %v4063_v13 = vadd.f32 %v7328_v27, %v4020_v36  ;;  %v5677_v7 = vpop.f32.mrb[0].mxu1  ;;  %v4098_v24 = vmax.f32 %v4062_v43, 0.0 }
 0x403   : > { %v4101_v45 = vmax.f32 %v4065_v34, 0.0  ;;  %v5751_v22 = vadd.f32 %v5677_v7, %v7146_v58  ;;  %v3921_v4 = vpop.f32.mrb[1].mxu1 }
 0x404   : > { %v4099_v35 = vmax.f32 %v4063_v13, 0.0  ;;  %v5752_v26 = vadd.f32 %v3921_v4, %v7148_v25  ;;  %v5678_v3 = vpop.f32.mrb[2].mxu1 }
 0x405   : > { %v4123_v28 = vpack.c.bf16 %v4101_v45, %v4100_v17  ;;  %v4025_v56 = vmul.f32 %v5751_v22, %v7322_v50  ;;  %v5753_v51 = vadd.f32 %v5678_v3, %v7150_v60  ;;  %v3924_v47 = vpop.f32.mrb[3].mxu1 }
 0x406   : > { %v4122_v31 = vpack.c.bf16 %v4099_v35, %v4098_v24  ;;  %v4023_v49 = vmul.f32 %v5752_v26, %v7322_v50  ;;  %v5754_v38 = vadd.f32 %v3924_v47, %v7153_v40 }
 0x407   : > { %v4068_v16 = vadd.f32 %v7328_v27, %v4025_v56  ;;  %v4026_v58 = vmul.f32 %v5753_v51, %v7322_v50 }
 0x408   : > { %v4066_v14 = vadd.f32 %v7328_v27, %v4023_v49  ;;  %v4024_v25 = vmul.f32 %v5754_v38, %v7322_v50  ;;  %5709 = vmatprep.mubr.msk.bf16.mxu0 %vm1407_vm4, %v4122_v31 }
 0x409   : > { %v4069_v44 = vadd.f32 %v7328_v27, %v4026_v58  ;;  %5710 = vmatmul.mubr.msk.bf16.gmra.mrb[144].mxu0 %vm1407_vm4, %v4123_v28  ;;  %v4104_v0 = vmax.f32 %v4068_v16, 0.0 }
 0x40a   : > { %v4067_v60 = vadd.f32 %v7328_v27, %v4024_v25  ;;  %v5681_v54 = vpop.f32.mrb[4].mxu1  ;;  %v4102_v48 = vmax.f32 %v4066_v14, 0.0 }
 0x40b   : > { %v4105_v18 = vmax.f32 %v4069_v44, 0.0  ;;  %v5755_v40 = vadd.f32 %v5681_v54, %v7157_v23  ;;  %v3937_v11 = vpop.f32.mrb[5].mxu1 }
 0x40c   : > { %v4103_v63 = vmax.f32 %v4067_v60, 0.0  ;;  %v5756_v5 = vadd.f32 %v3937_v11, %v7159_v20  ;;  %v5682_v57 = vpop.f32.mrb[6].mxu1 }
 0x40d   : > { %v4125_v42 = vpack.c.bf16 %v4105_v18, %v4104_v0  ;;  %v4029_v29 = vmul.f32 %v5755_v40, %v7322_v50  ;;  %v5757_v33 = vadd.f32 %v5682_v57, %v7161_v62  ;;  %v3940_v21 = vpop.f32.mrb[7].mxu1 }
 0x40e   : > { %v4124_v41 = vpack.c.bf16 %v4103_v63, %v4102_v48  ;;  %v4027_v39 = vmul.f32 %v5756_v5, %v7322_v50  ;;  %v5758_v6 = vadd.f32 %v3940_v21, %v7165_v37 }
 0x40f   : > { %v4072_v53 = vadd.f32 %v7328_v27, %v4029_v29  ;;  %v4030_v23 = vmul.f32 %v5757_v33, %v7322_v50 }
 0x410   : > { %v4070_v9 = vadd.f32 %v7328_v27, %v4027_v39  ;;  %v4028_v20 = vmul.f32 %v5758_v6, %v7322_v50  ;;  %5713 = vmatprep.mubr.msk.bf16.mxu0 %vm1407_vm4, %v4124_v41  ;;  %v7458_v50 = vld [vmem:[%s7627_s9] ss:$0 sm:$0xff] }
 0x411   : > { %v4073_v8 = vadd.f32 %v7328_v27, %v4030_v23  ;;  %5714 = vmatmul.mubr.msk.bf16.gmra.mrb[148].mxu0 %vm1407_vm4, %v4125_v42  ;;  %v4108_v61 = vmax.f32 %v4072_v53, 0.0 }
 0x412   : > { %v4071_v62 = vadd.f32 %v7328_v27, %v4028_v20  ;;  %v4106_v37 = vmax.f32 %v4070_v9, 0.0  ;;  %v7463_v27 = vld [vmem:[%s7628_s10] ss:$0 sm:$0xff] }
 0x413   : > { %v4109_v30 = vmax.f32 %v4073_v8, 0.0 }
 0x414   : > { %v4107_v46 = vmax.f32 %v4071_v62, 0.0 }
 0x415   : > { %v4127_v2 = vpack.c.bf16 %v4109_v30, %v4108_v61 }
 0x416   : > { %v4126_v19 = vpack.c.bf16 %v4107_v46, %v4106_v37 }
 0x418   : > { %5717 = vmatprep.mubr.msk.bf16.mxu0 %vm1407_vm4, %v4126_v19 }
 0x419   : > { %5718 = vmatmul.mubr.msk.bf16.gmra.mrb[152].mxu0 %vm1407_vm4, %v4127_v2 }
 0x4ac   : > { %v5687_v52 = vpop.f32.mrb[120].mxu0 }
 0x4ad   : > { %v4372_v59 = vmul.f32 %v5687_v52, %v7458_v50  ;;  %v4220_v15 = vpop.f32.mrb[121].mxu0 }
 0x4ae   : > { %v4370_v55 = vmul.f32 %v7458_v50, %v4220_v15  ;;  %v5688_v10 = vpop.f32.mrb[122].mxu0 }
 0x4af   : > { %v4415_v12 = vadd.f32 %v7463_v27, %v4372_v59  ;;  %v4373_v1 = vmul.f32 %v5688_v10, %v7458_v50  ;;  %v4223_v32 = vpop.f32.mrb[123].mxu0 }
 0x4b0   : > { %v4413_v43 = vadd.f32 %v7463_v27, %v4370_v55  ;;  %v4371_v36 = vmul.f32 %v7458_v50, %v4223_v32 }
 0x4b1   : > { %v4451_v34 = vmax.f32 %v4415_v12, 0.0  ;;  %v4416_v13 = vadd.f32 %v7463_v27, %v4373_v1 }
 0x4b2   : > { %v4449_v7 = vmax.f32 %v4413_v43, 0.0  ;;  %v4414_v17 = vadd.f32 %v7463_v27, %v4371_v36 }
 0x4b3   : > { %v5006_v45 = vpack.c.bf16 %v4451_v34, %v4451_v34  ;;  %v4452_v22 = vmax.f32 %v4416_v13, 0.0 }
 0x4b4   : > { %v5004_v4 = vpack.c.bf16 %v4449_v7, %v4449_v7  ;;  %v4450_v24 = vmax.f32 %v4414_v17, 0.0  ;;  %v5691_v35 = vpop.f32.mrb[124].mxu0 }
 0x4b5   : > { %4632 = vst.msk [vmem:[%s7476_s13 + $0x8] sm:$0xf] %vm4629_vm10, %v5006_v45  ;;  %v5007_v26 = vpack.c.bf16 %v4452_v22, %v4452_v22  ;;  %v4376_v3 = vmul.f32 %v5691_v35, %v7458_v50  ;;  %v4236_v28 = vpop.f32.mrb[125].mxu0 }
 0x4b6   : > { %4630 = vst.msk [vmem:[%s7476_s13] sm:$0xf] %vm4629_vm10, %v5004_v4  ;;  %v5005_v56 = vpack.c.bf16 %v4450_v24, %v4450_v24  ;;  %v4374_v51 = vmul.f32 %v7458_v50, %v4236_v28  ;;  %v5692_v47 = vpop.f32.mrb[126].mxu0 }
 0x4b7   : > { %4633 = vst.msk [vmem:[%s7476_s13 + $0xc] sm:$0xf] %vm4629_vm10, %v5007_v26  ;;  %v4419_v31 = vadd.f32 %v7463_v27, %v4376_v3  ;;  %v4377_v49 = vmul.f32 %v5692_v47, %v7458_v50  ;;  %v4239_v38 = vpop.f32.mrb[127].mxu0 }
 0x4b8   : > { %4631 = vst.msk [vmem:[%s7476_s13 + $0x4] sm:$0xf] %vm4629_vm10, %v5005_v56  ;;  %v4417_v16 = vadd.f32 %v7463_v27, %v4374_v51  ;;  %v4375_v58 = vmul.f32 %v7458_v50, %v4239_v38 }
 0x4b9   : > { %v4455_v14 = vmax.f32 %v4419_v31, 0.0  ;;  %v4420_v25 = vadd.f32 %v7463_v27, %v4377_v49 }
 0x4ba   : > { %v4453_v44 = vmax.f32 %v4417_v16, 0.0  ;;  %v4418_v60 = vadd.f32 %v7463_v27, %v4375_v58 }
 0x4bb   : > { %v5010_v54 = vpack.c.bf16 %v4455_v14, %v4455_v14  ;;  %v4456_v0 = vmax.f32 %v4420_v25, 0.0 }
 0x4bc   : > { %v5008_v18 = vpack.c.bf16 %v4453_v44, %v4453_v44  ;;  %v4454_v40 = vmax.f32 %v4418_v60, 0.0  ;;  %v5695_v11 = vpop.f32.mrb[128].mxu0 }
 0x4bd   : > { %4636 = vst.msk [vmem:[%s7476_s13 + $0x18] sm:$0xf] %vm4629_vm10, %v5010_v54  ;;  %v5011_v48 = vpack.c.bf16 %v4456_v0, %v4456_v0  ;;  %v4380_v63 = vmul.f32 %v5695_v11, %v7458_v50  ;;  %v4252_v5 = vpop.f32.mrb[129].mxu0 }
 0x4be   : > { %4634 = vst.msk [vmem:[%s7476_s13 + $0x10] sm:$0xf] %vm4629_vm10, %v5008_v18  ;;  %v5009_v57 = vpack.c.bf16 %v4454_v40, %v4454_v40  ;;  %v4378_v42 = vmul.f32 %v7458_v50, %v4252_v5  ;;  %v5696_v29 = vpop.f32.mrb[130].mxu0 }
 0x4bf   : > { %4637 = vst.msk [vmem:[%s7476_s13 + $0x1c] sm:$0xf] %vm4629_vm10, %v5011_v48  ;;  %v4423_v33 = vadd.f32 %v7463_v27, %v4380_v63  ;;  %v4381_v21 = vmul.f32 %v5696_v29, %v7458_v50  ;;  %v4255_v41 = vpop.f32.mrb[131].mxu0 }
 0x4c0   : > { %4635 = vst.msk [vmem:[%s7476_s13 + $0x14] sm:$0xf] %vm4629_vm10, %v5009_v57  ;;  %v4421_v39 = vadd.f32 %v7463_v27, %v4378_v42  ;;  %v4379_v6 = vmul.f32 %v7458_v50, %v4255_v41 }
 0x4c1   : > { %v4459_v53 = vmax.f32 %v4423_v33, 0.0  ;;  %v4424_v23 = vadd.f32 %v7463_v27, %v4381_v21 }
 0x4c2   : > { %v4457_v9 = vmax.f32 %v4421_v39, 0.0  ;;  %v4422_v20 = vadd.f32 %v7463_v27, %v4379_v6 }
 0x4c3   : > { %v5014_v8 = vpack.c.bf16 %v4459_v53, %v4459_v53  ;;  %v4460_v62 = vmax.f32 %v4424_v23, 0.0 }
 0x4c4   : > { %v5012_v61 = vpack.c.bf16 %v4457_v9, %v4457_v9  ;;  %v4458_v30 = vmax.f32 %v4422_v20, 0.0  ;;  %v5699_v37 = vpop.f32.mrb[132].mxu0 }
 0x4c5   : > { %4640 = vst.msk [vmem:[%s7476_s13 + $0x28] sm:$0xf] %vm4629_vm10, %v5014_v8  ;;  %v5015_v46 = vpack.c.bf16 %v4460_v62, %v4460_v62  ;;  %v4384_v2 = vmul.f32 %v5699_v37, %v7458_v50  ;;  %v4268_v19 = vpop.f32.mrb[133].mxu0 }
 0x4c6   : > { %4638 = vst.msk [vmem:[%s7476_s13 + $0x20] sm:$0xf] %vm4629_vm10, %v5012_v61  ;;  %v5013_v52 = vpack.c.bf16 %v4458_v30, %v4458_v30  ;;  %v4382_v59 = vmul.f32 %v7458_v50, %v4268_v19  ;;  %v5700_v15 = vpop.f32.mrb[134].mxu0 }
 0x4c7   : > { %4641 = vst.msk [vmem:[%s7476_s13 + $0x2c] sm:$0xf] %vm4629_vm10, %v5015_v46  ;;  %v4427_v55 = vadd.f32 %v7463_v27, %v4384_v2  ;;  %v4385_v10 = vmul.f32 %v5700_v15, %v7458_v50  ;;  %v4271_v12 = vpop.f32.mrb[135].mxu0 }
 0x4c8   : > { %4639 = vst.msk [vmem:[%s7476_s13 + $0x24] sm:$0xf] %vm4629_vm10, %v5013_v52  ;;  %v4425_v1 = vadd.f32 %v7463_v27, %v4382_v59  ;;  %v4383_v32 = vmul.f32 %v7458_v50, %v4271_v12 }
 0x4c9   : > { %v4463_v43 = vmax.f32 %v4427_v55, 0.0  ;;  %v4428_v36 = vadd.f32 %v7463_v27, %v4385_v10 }
 0x4ca   : > { %v4461_v34 = vmax.f32 %v4425_v1, 0.0  ;;  %v4426_v13 = vadd.f32 %v7463_v27, %v4383_v32 }
 0x4cb   : > { %v5018_v7 = vpack.c.bf16 %v4463_v43, %v4463_v43  ;;  %v4464_v17 = vmax.f32 %v4428_v36, 0.0 }
 0x4cc   : > { %v5016_v45 = vpack.c.bf16 %v4461_v34, %v4461_v34  ;;  %v4462_v22 = vmax.f32 %v4426_v13, 0.0  ;;  %v5703_v4 = vpop.f32.mrb[136].mxu0 }
 0x4cd   : > { %4644 = vst.msk [vmem:[%s7476_s13 + $0x38] sm:$0xf] %vm4629_vm10, %v5018_v7  ;;  %v5019_v24 = vpack.c.bf16 %v4464_v17, %v4464_v17  ;;  %v4388_v35 = vmul.f32 %v5703_v4, %v7458_v50  ;;  %v4284_v26 = vpop.f32.mrb[137].mxu0 }
 0x4ce   : > { %4642 = vst.msk [vmem:[%s7476_s13 + $0x30] sm:$0xf] %vm4629_vm10, %v5016_v45  ;;  %v5017_v3 = vpack.c.bf16 %v4462_v22, %v4462_v22  ;;  %v4386_v28 = vmul.f32 %v7458_v50, %v4284_v26  ;;  %v5704_v56 = vpop.f32.mrb[138].mxu0 }
 0x4cf   : > { %4645 = vst.msk [vmem:[%s7476_s13 + $0x3c] sm:$0xf] %vm4629_vm10, %v5019_v24  ;;  %v4431_v51 = vadd.f32 %v7463_v27, %v4388_v35  ;;  %v4389_v47 = vmul.f32 %v5704_v56, %v7458_v50  ;;  %v4287_v31 = vpop.f32.mrb[139].mxu0 }
 0x4d0   : > { %4643 = vst.msk [vmem:[%s7476_s13 + $0x34] sm:$0xf] %vm4629_vm10, %v5017_v3  ;;  %v4429_v49 = vadd.f32 %v7463_v27, %v4386_v28  ;;  %v4387_v38 = vmul.f32 %v7458_v50, %v4287_v31 }
 0x4d1   : > { %v4467_v16 = vmax.f32 %v4431_v51, 0.0  ;;  %v4432_v58 = vadd.f32 %v7463_v27, %v4389_v47 }
 0x4d2   : > { %v4465_v14 = vmax.f32 %v4429_v49, 0.0  ;;  %v4430_v25 = vadd.f32 %v7463_v27, %v4387_v38 }
 0x4d3   : > { %v5022_v44 = vpack.c.bf16 %v4467_v16, %v4467_v16  ;;  %v4468_v60 = vmax.f32 %v4432_v58, 0.0 }
 0x4d4   : > { %v5020_v54 = vpack.c.bf16 %v4465_v14, %v4465_v14  ;;  %v4466_v0 = vmax.f32 %v4430_v25, 0.0  ;;  %v5707_v18 = vpop.f32.mrb[140].mxu0 }
 0x4d5   : > { %4648 = vst.msk [vmem:[%s7476_s13 + $0x48] sm:$0xf] %vm4629_vm10, %v5022_v44  ;;  %v5023_v40 = vpack.c.bf16 %v4468_v60, %v4468_v60  ;;  %v4392_v11 = vmul.f32 %v5707_v18, %v7458_v50  ;;  %v4300_v48 = vpop.f32.mrb[141].mxu0 }
 0x4d6   : > { %4646 = vst.msk [vmem:[%s7476_s13 + $0x40] sm:$0xf] %vm4629_vm10, %v5020_v54  ;;  %v5021_v63 = vpack.c.bf16 %v4466_v0, %v4466_v0  ;;  %v4390_v5 = vmul.f32 %v7458_v50, %v4300_v48  ;;  %v5708_v57 = vpop.f32.mrb[142].mxu0 }
 0x4d7   : > { %4649 = vst.msk [vmem:[%s7476_s13 + $0x4c] sm:$0xf] %vm4629_vm10, %v5023_v40  ;;  %v4435_v42 = vadd.f32 %v7463_v27, %v4392_v11  ;;  %v4393_v29 = vmul.f32 %v5708_v57, %v7458_v50  ;;  %v4303_v33 = vpop.f32.mrb[143].mxu0 }
 0x4d8   : > { %4647 = vst.msk [vmem:[%s7476_s13 + $0x44] sm:$0xf] %vm4629_vm10, %v5021_v63  ;;  %v4433_v21 = vadd.f32 %v7463_v27, %v4390_v5  ;;  %v4391_v41 = vmul.f32 %v7458_v50, %v4303_v33 }
 0x4d9   : > { %v4471_v39 = vmax.f32 %v4435_v42, 0.0  ;;  %v4436_v6 = vadd.f32 %v7463_v27, %v4393_v29 }
 0x4da   : > { %v4469_v53 = vmax.f32 %v4433_v21, 0.0  ;;  %v4434_v23 = vadd.f32 %v7463_v27, %v4391_v41 }
 0x4db   : > { %v5026_v9 = vpack.c.bf16 %v4471_v39, %v4471_v39  ;;  %v4472_v20 = vmax.f32 %v4436_v6, 0.0 }
 0x4dc   : > { %v5024_v8 = vpack.c.bf16 %v4469_v53, %v4469_v53  ;;  %v4470_v62 = vmax.f32 %v4434_v23, 0.0  ;;  %v5711_v61 = vpop.f32.mrb[144].mxu0 }
 0x4dd   : > { %4652 = vst.msk [vmem:[%s7476_s13 + $0x58] sm:$0xf] %vm4629_vm10, %v5026_v9  ;;  %v5027_v30 = vpack.c.bf16 %v4472_v20, %v4472_v20  ;;  %v4396_v37 = vmul.f32 %v5711_v61, %v7458_v50  ;;  %v4316_v46 = vpop.f32.mrb[145].mxu0 }
 0x4de   : > { %4650 = vst.msk [vmem:[%s7476_s13 + $0x50] sm:$0xf] %vm4629_vm10, %v5024_v8  ;;  %v5025_v2 = vpack.c.bf16 %v4470_v62, %v4470_v62  ;;  %v4394_v19 = vmul.f32 %v7458_v50, %v4316_v46  ;;  %v5712_v52 = vpop.f32.mrb[146].mxu0 }
 0x4df   : > { %4653 = vst.msk [vmem:[%s7476_s13 + $0x5c] sm:$0xf] %vm4629_vm10, %v5027_v30  ;;  %v4439_v59 = vadd.f32 %v7463_v27, %v4396_v37  ;;  %v4397_v15 = vmul.f32 %v5712_v52, %v7458_v50  ;;  %v4319_v55 = vpop.f32.mrb[147].mxu0 }
 0x4e0   : > { %4651 = vst.msk [vmem:[%s7476_s13 + $0x54] sm:$0xf] %vm4629_vm10, %v5025_v2  ;;  %v4437_v10 = vadd.f32 %v7463_v27, %v4394_v19  ;;  %v4395_v12 = vmul.f32 %v7458_v50, %v4319_v55 }
 0x4e1   : > { %v4475_v1 = vmax.f32 %v4439_v59, 0.0  ;;  %v4440_v32 = vadd.f32 %v7463_v27, %v4397_v15 }
 0x4e2   : > { %v4473_v43 = vmax.f32 %v4437_v10, 0.0  ;;  %v4438_v36 = vadd.f32 %v7463_v27, %v4395_v12 }
 0x4e3   : > { %v5030_v34 = vpack.c.bf16 %v4475_v1, %v4475_v1  ;;  %v4476_v13 = vmax.f32 %v4440_v32, 0.0 }
 0x4e4   : > { %v5028_v7 = vpack.c.bf16 %v4473_v43, %v4473_v43  ;;  %v4474_v17 = vmax.f32 %v4438_v36, 0.0  ;;  %v5715_v45 = vpop.f32.mrb[148].mxu0 }
 0x4e5   : > { %4656 = vst.msk [vmem:[%s7476_s13 + $0x68] sm:$0xf] %vm4629_vm10, %v5030_v34  ;;  %v5031_v22 = vpack.c.bf16 %v4476_v13, %v4476_v13  ;;  %v4400_v4 = vmul.f32 %v5715_v45, %v7458_v50  ;;  %v4332_v24 = vpop.f32.mrb[149].mxu0 }
 0x4e6   : > { %4654 = vst.msk [vmem:[%s7476_s13 + $0x60] sm:$0xf] %vm4629_vm10, %v5028_v7  ;;  %v5029_v35 = vpack.c.bf16 %v4474_v17, %v4474_v17  ;;  %v4398_v26 = vmul.f32 %v7458_v50, %v4332_v24  ;;  %v5716_v3 = vpop.f32.mrb[150].mxu0 }
 0x4e7   : > { %4657 = vst.msk [vmem:[%s7476_s13 + $0x6c] sm:$0xf] %vm4629_vm10, %v5031_v22  ;;  %v4443_v28 = vadd.f32 %v7463_v27, %v4400_v4  ;;  %v4401_v56 = vmul.f32 %v5716_v3, %v7458_v50  ;;  %v4335_v51 = vpop.f32.mrb[151].mxu0 }
 0x4e8   : > { %4655 = vst.msk [vmem:[%s7476_s13 + $0x64] sm:$0xf] %vm4629_vm10, %v5029_v35  ;;  %v4441_v47 = vadd.f32 %v7463_v27, %v4398_v26  ;;  %v4399_v31 = vmul.f32 %v7458_v50, %v4335_v51 }
 0x4e9   : > { %v4479_v49 = vmax.f32 %v4443_v28, 0.0  ;;  %v4444_v38 = vadd.f32 %v7463_v27, %v4401_v56 }
 0x4ea   : > { %v4477_v16 = vmax.f32 %v4441_v47, 0.0  ;;  %v4442_v58 = vadd.f32 %v7463_v27, %v4399_v31 }
 0x4eb   : > { %v5034_v14 = vpack.c.bf16 %v4479_v49, %v4479_v49  ;;  %v4480_v25 = vmax.f32 %v4444_v38, 0.0 }
 0x4ec   : > { %v5032_v44 = vpack.c.bf16 %v4477_v16, %v4477_v16  ;;  %v4478_v60 = vmax.f32 %v4442_v58, 0.0  ;;  %v5719_v54 = vpop.f32.mrb[152].mxu0 }
 0x4ed   : > { %4660 = vst.msk [vmem:[%s7476_s13 + $0x78] sm:$0xf] %vm4629_vm10, %v5034_v14  ;;  %v5035_v0 = vpack.c.bf16 %v4480_v25, %v4480_v25  ;;  %v4404_v18 = vmul.f32 %v5719_v54, %v7458_v50  ;;  %v4348_v40 = vpop.f32.mrb[153].mxu0 }
 0x4ee   : > { %4658 = vst.msk [vmem:[%s7476_s13 + $0x70] sm:$0xf] %vm4629_vm10, %v5032_v44  ;;  %v5033_v11 = vpack.c.bf16 %v4478_v60, %v4478_v60  ;;  %v4402_v48 = vmul.f32 %v7458_v50, %v4348_v40  ;;  %v5720_v63 = vpop.f32.mrb[154].mxu0 }
 0x4ef   : > { %4661 = vst.msk [vmem:[%s7476_s13 + $0x7c] sm:$0xf] %vm4629_vm10, %v5035_v0  ;;  %v4447_v5 = vadd.f32 %v7463_v27, %v4404_v18  ;;  %v4405_v57 = vmul.f32 %v5720_v63, %v7458_v50  ;;  %v4351_v42 = vpop.f32.mrb[155].mxu0 }
 0x4f0   : > { %4659 = vst.msk [vmem:[%s7476_s13 + $0x74] sm:$0xf] %vm4629_vm10, %v5033_v11  ;;  %v4445_v29 = vadd.f32 %v7463_v27, %v4402_v48  ;;  %v4403_v33 = vmul.f32 %v7458_v50, %v4351_v42 }
 0x4f1   : > { %v4483_v21 = vmax.f32 %v4447_v5, 0.0  ;;  %v4448_v41 = vadd.f32 %v7463_v27, %v4405_v57 }
 0x4f2   : > { %v4481_v39 = vmax.f32 %v4445_v29, 0.0  ;;  %v4446_v6 = vadd.f32 %v7463_v27, %v4403_v33 }
 0x4f3   : > { %v5038_v53 = vpack.c.bf16 %v4483_v21, %v4483_v21  ;;  %v4484_v23 = vmax.f32 %v4448_v41, 0.0 }
 0x4f4   : > { %v5036_v9 = vpack.c.bf16 %v4481_v39, %v4481_v39  ;;  %v4482_v20 = vmax.f32 %v4446_v6, 0.0 }
 0x4f5   : > { %4664 = vst.msk [vmem:[%s7476_s13 + $0x88] sm:$0xf] %vm4629_vm10, %v5038_v53  ;;  %v5039_v8 = vpack.c.bf16 %v4484_v23, %v4484_v23 }
 0x4f6   : > { %4662 = vst.msk [vmem:[%s7476_s13 + $0x80] sm:$0xf] %vm4629_vm10, %v5036_v9  ;;  %v5037_v62 = vpack.c.bf16 %v4482_v20, %v4482_v20 }
 0x4f7   : > { %4665 = vst.msk [vmem:[%s7476_s13 + $0x8c] sm:$0xf] %vm4629_vm10, %v5039_v8 }
 0x4f8   : > { %4663 = vst.msk [vmem:[%s7476_s13 + $0x84] sm:$0xf] %vm4629_vm10, %v5037_v62 }
 0x4f9 PF: > { %s21_s17 = sadd.s32 1, %s6068_s17  }
 0x4fa   : > { %p18_p4 = scmp.ge.s32.totalorder %s21_s17, 4  }
 0x4fc   :  { %20 = sbr.rel (!%p18_p4) target bundleno = 1 (0x1), region = 102 }

</bundles_post_ra>
